<compile_context>
chip_gen: v7x
topology: tpu7x:2x2x1
jax: 0.10.0
libtpu: 0.0.40
codegen_flags: <defaults>
</compile_context>

<pallas_src>
import functools

import jax
import jax.numpy as jnp
from jax.experimental import pallas as pl
from jax.experimental.pallas import tpu as pltpu

EPS = 1e-5  # PyTorch BatchNorm default eps


# --------------------------------------------------------------------------
# Fused STN3d kernel: conv1/2/3 (pointwise) + BN + ReLU  ->  max over points
# -> fc1 + BN + ReLU -> fc2 + BN + ReLU -> fc3 (+ identity folded into bias).
# Point layout is (B*N, C): points on the sublane axis, channels on lanes, so
# a Conv1d(kernel_size=1) on NCL input is exactly (B*N, Cin) @ (Cin, Cout).
# --------------------------------------------------------------------------
def _stn3d_kernel(pts_ref,
                  w1_ref, s1_ref, t1_ref,
                  w2_ref, s2_ref, t2_ref,
                  w3_ref, s3_ref, t3_ref,
                  fw1_ref, fs1_ref, ft1_ref,
                  fw2_ref, fs2_ref, ft2_ref,
                  fw3_ref, fb3_ref,
                  out_ref, *, B, N):
    f32 = jnp.float32
    bf16 = jnp.bfloat16

    x = pts_ref[...].astype(bf16)                                         # (B*N, 3)

    # ----- trunk (per-point MLP), bf16 on the MXU, f32 accumulate/epilogue -----
    h = jnp.dot(x, w1_ref[...], preferred_element_type=f32)               # (B*N, 64)
    h = jnp.maximum(h * s1_ref[...] + t1_ref[...], 0.0)

    h = jnp.dot(h.astype(bf16), w2_ref[...], preferred_element_type=f32)  # (B*N, 128)
    h = jnp.maximum(h * s2_ref[...] + t2_ref[...], 0.0)

    h = jnp.dot(h.astype(bf16), w3_ref[...], preferred_element_type=f32)  # (B*N, 1024)
    h = jnp.maximum(h * s3_ref[...] + t3_ref[...], 0.0)

    # ----- torch.max(x, 2): per-batch max over the point axis -----
    # Static slices (B, N are Python ints); values are >= 0 post-ReLU so no
    # padding mask is needed (blocks are full-extent anyway).
    g = jnp.concatenate(
        [jnp.max(h[b * N:(b + 1) * N, :], axis=0, keepdims=True) for b in range(B)],
        axis=0)                                                           # (B, 1024)

    # ----- FC head (weight-streaming bound at B=2; bf16 weights halve bytes) -----
    z = jnp.dot(g.astype(bf16), fw1_ref[...], preferred_element_type=f32)  # (B, 512)
    z = jnp.maximum(z * fs1_ref[...] + ft1_ref[...], 0.0)

    z = jnp.dot(z.astype(bf16), fw2_ref[...], preferred_element_type=f32)  # (B, 256)
    z = jnp.maximum(z * fs2_ref[...] + ft2_ref[...], 0.0)

    z = jnp.dot(z.astype(bf16), fw3_ref[...], preferred_element_type=f32)  # (B, 9)
    out_ref[...] = z + fb3_ref[...]          # bias already contains the identity


def stn3d_forward(x_ncl, params):
    """x_ncl: (B, 3, N) float32 in PyTorch NCL layout. Returns (B, 3, 3)."""
    B, C, N = x_ncl.shape
    pts = jnp.transpose(x_ncl, (0, 2, 1)).reshape(B * N, C).astype(jnp.float32)

    args = (pts,) + tuple(params)
    kern = functools.partial(_stn3d_kernel, B=B, N=N)

    out = pl.pallas_call(
        kern,
        out_shape=jax.ShapeDtypeStruct((B, 9), jnp.float32),
        grid=(1,),
        in_specs=[pl.BlockSpec(a.shape, lambda i: (0, 0)) for a in args],
        out_specs=pl.BlockSpec((B, 9), lambda i: (0, 0)),
        compiler_params=pltpu.CompilerParams(
            dimension_semantics=("arbitrary",)),
    )(*args)
    return out.reshape(B, 3, 3)


# --------------------------------------------------------------------------
# Parameter construction (deterministic, synthetic) and BN folding.
# --------------------------------------------------------------------------
def _fold_bn(w, b, gamma, beta, mean, var):
    """BN(xW + b) in eval mode == (xW) * scale + shift."""
    scale = gamma / jnp.sqrt(var + EPS)
    shift = scale * (b - mean) + beta
    return w, scale.reshape(1, -1), shift.reshape(1, -1)


def init_params(key):
    keys = iter(jax.random.split(key, 64))

    def linear(cin, cout):
        w = jax.random.normal(next(keys), (cin, cout), jnp.float32) / jnp.sqrt(float(cin))
        b = 0.05 * jax.random.normal(next(keys), (cout,), jnp.float32)
        return w, b

    def bn(c):
        gamma = 1.0 + 0.1 * jax.random.normal(next(keys), (c,), jnp.float32)
        beta = 0.1 * jax.random.normal(next(keys), (c,), jnp.float32)
        mean = 0.1 * jax.random.normal(next(keys), (c,), jnp.float32)
        var = 1.0 + 0.1 * jnp.abs(jax.random.normal(next(keys), (c,), jnp.float32))
        return gamma, beta, mean, var

    out = []
    # conv1(3->64)+bn1, conv2(64->128)+bn2, conv3(128->1024)+bn3
    for cin, cout in ((3, 64), (64, 128), (128, 1024)):
        w, b = linear(cin, cout)
        w, s, t = _fold_bn(w, b, *bn(cout))
        out.extend([w.astype(jnp.bfloat16), s, t])
    # fc1(1024->512)+bn4, fc2(512->256)+bn5
    for cin, cout in ((1024, 512), (512, 256)):
        w, b = linear(cin, cout)
        w, s, t = _fold_bn(w, b, *bn(cout))
        out.extend([w.astype(jnp.bfloat16), s, t])
    # fc3(256->9), identity folded into the bias
    w3, b3 = linear(256, 9)
    b3 = b3 + jnp.eye(3, dtype=jnp.float32).reshape(-1)
    out.extend([w3.astype(jnp.bfloat16), b3.reshape(1, -1)])
    return tuple(out)   # (w1,s1,t1, w2,s2,t2, w3,s3,t3, fw1,fs1,ft1, fw2,fs2,ft2, fw3,fb3)


# --------------------------------------------------------------------------
# Pure-JAX reference (f32 math, same bf16-rounded weights).
# --------------------------------------------------------------------------
def reference_forward(x_ncl, params):
    B, C, N = x_ncl.shape
    pts = jnp.transpose(x_ncl, (0, 2, 1)).astype(jnp.float32)            # (B, N, 3)
    (w1, s1, t1, w2, s2, t2, w3, s3, t3,
     fw1, fs1, ft1, fw2, fs2, ft2, fw3, fb3) = [p.astype(jnp.float32) for p in params]

    h = jnp.maximum(pts @ w1 * s1 + t1, 0.0)
    h = jnp.maximum(h @ w2 * s2 + t2, 0.0)
    h = jnp.maximum(h @ w3 * s3 + t3, 0.0)
    g = jnp.max(h, axis=1)                                               # (B, 1024)

    z = jnp.maximum(g @ fw1 * fs1 + ft1, 0.0)
    z = jnp.maximum(z @ fw2 * fs2 + ft2, 0.0)
    z = z @ fw3 + fb3
    return z.reshape(B, 3, 3)


if __name__ == "__main__":
    key = jax.random.PRNGKey(0)
    k_param, k_x = jax.random.split(key)

    B, N = 2, 128                       # batch of 2 point clouds, 128 points each
    x = jax.random.normal(k_x, (B, 3, N), jnp.float32)   # NCL, as in PyTorch

    params = init_params(k_param)

    trans = stn3d_forward(x, params)
    jax.block_until_ready(trans)

    trans_ref = reference_forward(x, params)
    assert trans.shape == (B, 3, 3)
    assert jnp.allclose(trans, trans_ref, rtol=5e-2, atol=5e-2), (
        float(jnp.max(jnp.abs(trans - trans_ref))))

    print("KERNEL_OK")
</pallas_src>

<mosaic_0001>
module attributes {stable_mosaic.version = 11 : i64} {
  func.func @_stn3d_kernel(%arg0: i32, %arg1: memref<256x3xf32, #tpu.memory_space<vmem>>, %arg2: memref<3x64xbf16, #tpu.memory_space<vmem>>, %arg3: memref<1x64xf32, #tpu.memory_space<vmem>>, %arg4: memref<1x64xf32, #tpu.memory_space<vmem>>, %arg5: memref<64x128xbf16, #tpu.memory_space<vmem>>, %arg6: memref<1x128xf32, #tpu.memory_space<vmem>>, %arg7: memref<1x128xf32, #tpu.memory_space<vmem>>, %arg8: memref<128x1024xbf16, #tpu.memory_space<vmem>>, %arg9: memref<1x1024xf32, #tpu.memory_space<vmem>>, %arg10: memref<1x1024xf32, #tpu.memory_space<vmem>>, %arg11: memref<1024x512xbf16, #tpu.memory_space<vmem>>, %arg12: memref<1x512xf32, #tpu.memory_space<vmem>>, %arg13: memref<1x512xf32, #tpu.memory_space<vmem>>, %arg14: memref<512x256xbf16, #tpu.memory_space<vmem>>, %arg15: memref<1x256xf32, #tpu.memory_space<vmem>>, %arg16: memref<1x256xf32, #tpu.memory_space<vmem>>, %arg17: memref<256x9xbf16, #tpu.memory_space<vmem>>, %arg18: memref<1x9xf32, #tpu.memory_space<vmem>>, %arg19: memref<2x9xf32, #tpu.memory_space<vmem>>) attributes {dimension_semantics = [#tpu.dimension_semantics<arbitrary>], iteration_bounds = array<i64: 1>, scalar_prefetch = 0 : i64, scratch_operands = 0 : i64, tpu.core_type = #tpu.core_type<tc>, window_params = [{pipeline_mode = #tpu.pipeline_mode<synchronous>, transform_indices = @transform_0, window_bounds = array<i64: 256, 3>}, {pipeline_mode = #tpu.pipeline_mode<synchronous>, transform_indices = @transform_1, window_bounds = array<i64: 3, 64>}, {pipeline_mode = #tpu.pipeline_mode<synchronous>, transform_indices = @transform_2, window_bounds = array<i64: 1, 64>}, {pipeline_mode = #tpu.pipeline_mode<synchronous>, transform_indices = @transform_3, window_bounds = array<i64: 1, 64>}, {pipeline_mode = #tpu.pipeline_mode<synchronous>, transform_indices = @transform_4, window_bounds = array<i64: 64, 128>}, {pipeline_mode = #tpu.pipeline_mode<synchronous>, transform_indices = @transform_5, window_bounds = array<i64: 1, 128>}, {pipeline_mode = #tpu.pipeline_mode<synchronous>, transform_indices = @transform_6, window_bounds = array<i64: 1, 128>}, {pipeline_mode = #tpu.pipeline_mode<synchronous>, transform_indices = @transform_7, window_bounds = array<i64: 128, 1024>}, {pipeline_mode = #tpu.pipeline_mode<synchronous>, transform_indices = @transform_8, window_bounds = array<i64: 1, 1024>}, {pipeline_mode = #tpu.pipeline_mode<synchronous>, transform_indices = @transform_9, window_bounds = array<i64: 1, 1024>}, {pipeline_mode = #tpu.pipeline_mode<synchronous>, transform_indices = @transform_10, window_bounds = array<i64: 1024, 512>}, {pipeline_mode = #tpu.pipeline_mode<synchronous>, transform_indices = @transform_11, window_bounds = array<i64: 1, 512>}, {pipeline_mode = #tpu.pipeline_mode<synchronous>, transform_indices = @transform_12, window_bounds = array<i64: 1, 512>}, {pipeline_mode = #tpu.pipeline_mode<synchronous>, transform_indices = @transform_13, window_bounds = array<i64: 512, 256>}, {pipeline_mode = #tpu.pipeline_mode<synchronous>, transform_indices = @transform_14, window_bounds = array<i64: 1, 256>}, {pipeline_mode = #tpu.pipeline_mode<synchronous>, transform_indices = @transform_15, window_bounds = array<i64: 1, 256>}, {pipeline_mode = #tpu.pipeline_mode<synchronous>, transform_indices = @transform_16, window_bounds = array<i64: 256, 9>}, {pipeline_mode = #tpu.pipeline_mode<synchronous>, transform_indices = @transform_17, window_bounds = array<i64: 1, 9>}, {pipeline_mode = #tpu.pipeline_mode<synchronous>, transform_indices = @transform_18, window_bounds = array<i64: 2, 9>}]} {
    %c0 = arith.constant 0 : index
    %c0_0 = arith.constant 0 : index
    %0 = vector.load %arg1[%c0, %c0_0] : memref<256x3xf32, #tpu.memory_space<vmem>>, vector<256x3xf32>
    %1 = arith.truncf %0 : vector<256x3xf32> to vector<256x3xbf16>
    %c0_1 = arith.constant 0 : index
    %c0_2 = arith.constant 0 : index
    %2 = vector.load %arg2[%c0_1, %c0_2] : memref<3x64xbf16, #tpu.memory_space<vmem>>, vector<3x64xbf16>
    %cst = arith.constant dense<0.000000e+00> : vector<256x64xf32>
    %3 = tpu.matmul %1, %2, %cst {dimension_numbers = #tpu.dot_dimension_numbers<[1], [0], [0], [1], [0, 0, 1, 1], [], []>} : vector<256x3xbf16>, vector<3x64xbf16>, vector<256x64xf32> -> vector<256x64xf32>
    %c0_3 = arith.constant 0 : index
    %c0_4 = arith.constant 0 : index
    %4 = vector.load %arg3[%c0_3, %c0_4] : memref<1x64xf32, #tpu.memory_space<vmem>>, vector<1x64xf32>
    %5 = vector.broadcast %4 : vector<1x64xf32> to vector<256x64xf32>
    %6 = arith.mulf %3, %5 : vector<256x64xf32>
    %c0_5 = arith.constant 0 : index
    %c0_6 = arith.constant 0 : index
    %7 = vector.load %arg4[%c0_5, %c0_6] : memref<1x64xf32, #tpu.memory_space<vmem>>, vector<1x64xf32>
    %8 = vector.broadcast %7 : vector<1x64xf32> to vector<256x64xf32>
    %9 = arith.addf %6, %8 : vector<256x64xf32>
    %cst_7 = arith.constant 0.000000e+00 : f32
    %10 = vector.broadcast %cst_7 : f32 to vector<256x64xf32>
    %11 = arith.maximumf %9, %10 : vector<256x64xf32>
    %12 = arith.truncf %11 : vector<256x64xf32> to vector<256x64xbf16>
    %c0_8 = arith.constant 0 : index
    %c0_9 = arith.constant 0 : index
    %13 = vector.load %arg5[%c0_8, %c0_9] : memref<64x128xbf16, #tpu.memory_space<vmem>>, vector<64x128xbf16>
    %cst_10 = arith.constant dense<0.000000e+00> : vector<256x128xf32>
    %14 = tpu.matmul %12, %13, %cst_10 {dimension_numbers = #tpu.dot_dimension_numbers<[1], [0], [0], [1], [0, 0, 1, 1], [], []>} : vector<256x64xbf16>, vector<64x128xbf16>, vector<256x128xf32> -> vector<256x128xf32>
    %c0_11 = arith.constant 0 : index
    %c0_12 = arith.constant 0 : index
    %15 = vector.load %arg6[%c0_11, %c0_12] : memref<1x128xf32, #tpu.memory_space<vmem>>, vector<1x128xf32>
    %16 = vector.broadcast %15 : vector<1x128xf32> to vector<256x128xf32>
    %17 = arith.mulf %14, %16 : vector<256x128xf32>
    %c0_13 = arith.constant 0 : index
    %c0_14 = arith.constant 0 : index
    %18 = vector.load %arg7[%c0_13, %c0_14] : memref<1x128xf32, #tpu.memory_space<vmem>>, vector<1x128xf32>
    %19 = vector.broadcast %18 : vector<1x128xf32> to vector<256x128xf32>
    %20 = arith.addf %17, %19 : vector<256x128xf32>
    %cst_15 = arith.constant 0.000000e+00 : f32
    %21 = vector.broadcast %cst_15 : f32 to vector<256x128xf32>
    %22 = arith.maximumf %20, %21 : vector<256x128xf32>
    %23 = arith.truncf %22 : vector<256x128xf32> to vector<256x128xbf16>
    %c0_16 = arith.constant 0 : index
    %c0_17 = arith.constant 0 : index
    %24 = vector.load %arg8[%c0_16, %c0_17] : memref<128x1024xbf16, #tpu.memory_space<vmem>>, vector<128x1024xbf16>
    %cst_18 = arith.constant dense<0.000000e+00> : vector<256x1024xf32>
    %25 = tpu.matmul %23, %24, %cst_18 {dimension_numbers = #tpu.dot_dimension_numbers<[1], [0], [0], [1], [0, 0, 1, 1], [], []>} : vector<256x128xbf16>, vector<128x1024xbf16>, vector<256x1024xf32> -> vector<256x1024xf32>
    %c0_19 = arith.constant 0 : index
    %c0_20 = arith.constant 0 : index
    %26 = vector.load %arg9[%c0_19, %c0_20] : memref<1x1024xf32, #tpu.memory_space<vmem>>, vector<1x1024xf32>
    %27 = vector.broadcast %26 : vector<1x1024xf32> to vector<256x1024xf32>
    %28 = arith.mulf %25, %27 : vector<256x1024xf32>
    %c0_21 = arith.constant 0 : index
    %c0_22 = arith.constant 0 : index
    %29 = vector.load %arg10[%c0_21, %c0_22] : memref<1x1024xf32, #tpu.memory_space<vmem>>, vector<1x1024xf32>
    %30 = vector.broadcast %29 : vector<1x1024xf32> to vector<256x1024xf32>
    %31 = arith.addf %28, %30 : vector<256x1024xf32>
    %cst_23 = arith.constant 0.000000e+00 : f32
    %32 = vector.broadcast %cst_23 : f32 to vector<256x1024xf32>
    %33 = arith.maximumf %31, %32 : vector<256x1024xf32>
    %34 = vector.extract_strided_slice %33 {offsets = [0, 0], sizes = [128, 1024], strides = [1, 1]} : vector<256x1024xf32> to vector<128x1024xf32>
    %cst_24 = arith.constant dense<0xFF800000> : vector<1024xf32>
    %35 = vector.multi_reduction <maximumf>, %34, %cst_24 [0] : vector<128x1024xf32> to vector<1024xf32>
    %36 = vector.shape_cast %35 : vector<1024xf32> to vector<1x1024xf32>
    %37 = vector.extract_strided_slice %33 {offsets = [128, 0], sizes = [128, 1024], strides = [1, 1]} : vector<256x1024xf32> to vector<128x1024xf32>
    %cst_25 = arith.constant dense<0xFF800000> : vector<1024xf32>
    %38 = vector.multi_reduction <maximumf>, %37, %cst_25 [0] : vector<128x1024xf32> to vector<1024xf32>
    %39 = vector.shape_cast %38 : vector<1024xf32> to vector<1x1024xf32>
    %40 = tpu.concatenate %36, %39 in 0 : vector<1x1024xf32>, vector<1x1024xf32> -> vector<2x1024xf32>
    %41 = arith.truncf %40 : vector<2x1024xf32> to vector<2x1024xbf16>
    %c0_26 = arith.constant 0 : index
    %c0_27 = arith.constant 0 : index
    %42 = vector.load %arg11[%c0_26, %c0_27] : memref<1024x512xbf16, #tpu.memory_space<vmem>>, vector<1024x512xbf16>
    %cst_28 = arith.constant dense<0.000000e+00> : vector<2x512xf32>
    %43 = tpu.matmul %41, %42, %cst_28 {dimension_numbers = #tpu.dot_dimension_numbers<[1], [0], [0], [1], [0, 0, 1, 1], [], []>} : vector<2x1024xbf16>, vector<1024x512xbf16>, vector<2x512xf32> -> vector<2x512xf32>
    %c0_29 = arith.constant 0 : index
    %c0_30 = arith.constant 0 : index
    %44 = vector.load %arg12[%c0_29, %c0_30] : memref<1x512xf32, #tpu.memory_space<vmem>>, vector<1x512xf32>
    %45 = vector.broadcast %44 : vector<1x512xf32> to vector<2x512xf32>
    %46 = arith.mulf %43, %45 : vector<2x512xf32>
    %c0_31 = arith.constant 0 : index
    %c0_32 = arith.constant 0 : index
    %47 = vector.load %arg13[%c0_31, %c0_32] : memref<1x512xf32, #tpu.memory_space<vmem>>, vector<1x512xf32>
    %48 = vector.broadcast %47 : vector<1x512xf32> to vector<2x512xf32>
    %49 = arith.addf %46, %48 : vector<2x512xf32>
    %cst_33 = arith.constant 0.000000e+00 : f32
    %50 = vector.broadcast %cst_33 : f32 to vector<2x512xf32>
    %51 = arith.maximumf %49, %50 : vector<2x512xf32>
    %52 = arith.truncf %51 : vector<2x512xf32> to vector<2x512xbf16>
    %c0_34 = arith.constant 0 : index
    %c0_35 = arith.constant 0 : index
    %53 = vector.load %arg14[%c0_34, %c0_35] : memref<512x256xbf16, #tpu.memory_space<vmem>>, vector<512x256xbf16>
    %cst_36 = arith.constant dense<0.000000e+00> : vector<2x256xf32>
    %54 = tpu.matmul %52, %53, %cst_36 {dimension_numbers = #tpu.dot_dimension_numbers<[1], [0], [0], [1], [0, 0, 1, 1], [], []>} : vector<2x512xbf16>, vector<512x256xbf16>, vector<2x256xf32> -> vector<2x256xf32>
    %c0_37 = arith.constant 0 : index
    %c0_38 = arith.constant 0 : index
    %55 = vector.load %arg15[%c0_37, %c0_38] : memref<1x256xf32, #tpu.memory_space<vmem>>, vector<1x256xf32>
    %56 = vector.broadcast %55 : vector<1x256xf32> to vector<2x256xf32>
    %57 = arith.mulf %54, %56 : vector<2x256xf32>
    %c0_39 = arith.constant 0 : index
    %c0_40 = arith.constant 0 : index
    %58 = vector.load %arg16[%c0_39, %c0_40] : memref<1x256xf32, #tpu.memory_space<vmem>>, vector<1x256xf32>
    %59 = vector.broadcast %58 : vector<1x256xf32> to vector<2x256xf32>
    %60 = arith.addf %57, %59 : vector<2x256xf32>
    %cst_41 = arith.constant 0.000000e+00 : f32
    %61 = vector.broadcast %cst_41 : f32 to vector<2x256xf32>
    %62 = arith.maximumf %60, %61 : vector<2x256xf32>
    %63 = arith.truncf %62 : vector<2x256xf32> to vector<2x256xbf16>
    %c0_42 = arith.constant 0 : index
    %c0_43 = arith.constant 0 : index
    %64 = vector.load %arg17[%c0_42, %c0_43] : memref<256x9xbf16, #tpu.memory_space<vmem>>, vector<256x9xbf16>
    %cst_44 = arith.constant dense<0.000000e+00> : vector<2x9xf32>
    %65 = tpu.matmul %63, %64, %cst_44 {dimension_numbers = #tpu.dot_dimension_numbers<[1], [0], [0], [1], [0, 0, 1, 1], [], []>} : vector<2x256xbf16>, vector<256x9xbf16>, vector<2x9xf32> -> vector<2x9xf32>
    %c0_45 = arith.constant 0 : index
    %c0_46 = arith.constant 0 : index
    %66 = vector.load %arg18[%c0_45, %c0_46] : memref<1x9xf32, #tpu.memory_space<vmem>>, vector<1x9xf32>
    %67 = vector.broadcast %66 : vector<1x9xf32> to vector<2x9xf32>
    %68 = arith.addf %65, %67 : vector<2x9xf32>
    %c0_47 = arith.constant 0 : index
    %c0_48 = arith.constant 0 : index
    %69 = vector.load %arg19[%c0_47, %c0_48] : memref<2x9xf32, #tpu.memory_space<vmem>>, vector<2x9xf32>
    tpu.vector_store %arg19[%c0_47, %c0_48], %68 {strides = array<i32>} : memref<2x9xf32, #tpu.memory_space<vmem>>, vector<2x9xf32>,
    return
  }
  func.func @transform_0(%arg0: i32) -> (i32, i32) {
    %c0_i32 = arith.constant 0 : i32
    %c0_i32_0 = arith.constant 0 : i32
    %c0_i32_1 = arith.constant 0 : i32
    return %c0_i32, %c0_i32_0 : i32, i32
  }
  func.func @transform_1(%arg0: i32) -> (i32, i32) {
    %c0_i32 = arith.constant 0 : i32
    %c0_i32_0 = arith.constant 0 : i32
    %c0_i32_1 = arith.constant 0 : i32
    return %c0_i32, %c0_i32_0 : i32, i32
  }
  func.func @transform_2(%arg0: i32) -> (i32, i32) {
    %c0_i32 = arith.constant 0 : i32
    %c0_i32_0 = arith.constant 0 : i32
    %c0_i32_1 = arith.constant 0 : i32
    return %c0_i32, %c0_i32_0 : i32, i32
  }
  func.func @transform_3(%arg0: i32) -> (i32, i32) {
    %c0_i32 = arith.constant 0 : i32
    %c0_i32_0 = arith.constant 0 : i32
    %c0_i32_1 = arith.constant 0 : i32
    return %c0_i32, %c0_i32_0 : i32, i32
  }
  func.func @transform_4(%arg0: i32) -> (i32, i32) {
    %c0_i32 = arith.constant 0 : i32
    %c0_i32_0 = arith.constant 0 : i32
    %c0_i32_1 = arith.constant 0 : i32
    return %c0_i32, %c0_i32_0 : i32, i32
  }
  func.func @transform_5(%arg0: i32) -> (i32, i32) {
    %c0_i32 = arith.constant 0 : i32
    %c0_i32_0 = arith.constant 0 : i32
    %c0_i32_1 = arith.constant 0 : i32
    return %c0_i32, %c0_i32_0 : i32, i32
  }
  func.func @transform_6(%arg0: i32) -> (i32, i32) {
    %c0_i32 = arith.constant 0 : i32
    %c0_i32_0 = arith.constant 0 : i32
    %c0_i32_1 = arith.constant 0 : i32
    return %c0_i32, %c0_i32_0 : i32, i32
  }
  func.func @transform_7(%arg0: i32) -> (i32, i32) {
    %c0_i32 = arith.constant 0 : i32
    %c0_i32_0 = arith.constant 0 : i32
    %c0_i32_1 = arith.constant 0 : i32
    return %c0_i32, %c0_i32_0 : i32, i32
  }
  func.func @transform_8(%arg0: i32) -> (i32, i32) {
    %c0_i32 = arith.constant 0 : i32
    %c0_i32_0 = arith.constant 0 : i32
    %c0_i32_1 = arith.constant 0 : i32
    return %c0_i32, %c0_i32_0 : i32, i32
  }
  func.func @transform_9(%arg0: i32) -> (i32, i32) {
    %c0_i32 = arith.constant 0 : i32
    %c0_i32_0 = arith.constant 0 : i32
    %c0_i32_1 = arith.constant 0 : i32
    return %c0_i32, %c0_i32_0 : i32, i32
  }
  func.func @transform_10(%arg0: i32) -> (i32, i32) {
    %c0_i32 = arith.constant 0 : i32
    %c0_i32_0 = arith.constant 0 : i32
    %c0_i32_1 = arith.constant 0 : i32
    return %c0_i32, %c0_i32_0 : i32, i32
  }
  func.func @transform_11(%arg0: i32) -> (i32, i32) {
    %c0_i32 = arith.constant 0 : i32
    %c0_i32_0 = arith.constant 0 : i32
    %c0_i32_1 = arith.constant 0 : i32
    return %c0_i32, %c0_i32_0 : i32, i32
  }
  func.func @transform_12(%arg0: i32) -> (i32, i32) {
    %c0_i32 = arith.constant 0 : i32
    %c0_i32_0 = arith.constant 0 : i32
    %c0_i32_1 = arith.constant 0 : i32
    return %c0_i32, %c0_i32_0 : i32, i32
  }
  func.func @transform_13(%arg0: i32) -> (i32, i32) {
    %c0_i32 = arith.constant 0 : i32
    %c0_i32_0 = arith.constant 0 : i32
    %c0_i32_1 = arith.constant 0 : i32
    return %c0_i32, %c0_i32_0 : i32, i32
  }
  func.func @transform_14(%arg0: i32) -> (i32, i32) {
    %c0_i32 = arith.constant 0 : i32
    %c0_i32_0 = arith.constant 0 : i32
    %c0_i32_1 = arith.constant 0 : i32
    return %c0_i32, %c0_i32_0 : i32, i32
  }
  func.func @transform_15(%arg0: i32) -> (i32, i32) {
    %c0_i32 = arith.constant 0 : i32
    %c0_i32_0 = arith.constant 0 : i32
    %c0_i32_1 = arith.constant 0 : i32
    return %c0_i32, %c0_i32_0 : i32, i32
  }
  func.func @transform_16(%arg0: i32) -> (i32, i32) {
    %c0_i32 = arith.constant 0 : i32
    %c0_i32_0 = arith.constant 0 : i32
    %c0_i32_1 = arith.constant 0 : i32
    return %c0_i32, %c0_i32_0 : i32, i32
  }
  func.func @transform_17(%arg0: i32) -> (i32, i32) {
    %c0_i32 = arith.constant 0 : i32
    %c0_i32_0 = arith.constant 0 : i32
    %c0_i32_1 = arith.constant 0 : i32
    return %c0_i32, %c0_i32_0 : i32, i32
  }
  func.func @transform_18(%arg0: i32) -> (i32, i32) {
    %c0_i32 = arith.constant 0 : i32
    %c0_i32_0 = arith.constant 0 : i32
    %c0_i32_1 = arith.constant 0 : i32
    return %c0_i32, %c0_i32_0 : i32, i32
  }
}

</mosaic_0001>

<bundles_post_ra>
// kernel: tpu_custom_call.1
= control target key start
LH: loop header
LB: loop body
LE: loop exit
PB: predicated region body
PF: predicated region fallthrough
CT: control target
= control target key end

     0   :  { %s8617_s0 = inlined_call_operand.vmem [shape: f32[256,3], index: 0, kind: input, shape index: {}]   ;;  %s8618_s1 = inlined_call_operand.vmem [shape: bf16[3,64], index: 1, kind: input, shape index: {}]   ;;  %s8619_s2 = inlined_call_operand.vmem [shape: f32[1,64], index: 2, kind: input, shape index: {}]   ;;  %s8620_s3 = inlined_call_operand.vmem [shape: f32[1,64], index: 3, kind: input, shape index: {}]   ;;  %s8621_s4 = inlined_call_operand.vmem [shape: bf16[64,128], index: 4, kind: input, shape index: {}]   ;;  %s8622_s5 = inlined_call_operand.vmem [shape: f32[1,128], index: 5, kind: input, shape index: {}]   ;;  %s8623_s6 = inlined_call_operand.vmem [shape: f32[1,128], index: 6, kind: input, shape index: {}]   ;;  %s8624_s7 = inlined_call_operand.hbm [shape: bf16[128,1024], index: 7, kind: input, shape index: {}]   ;;  %s8625_s8 = inlined_call_operand.vmem [shape: f32[1,1024], index: 8, kind: input, shape index: {}]   ;;  %s8626_s9 = inlined_call_operand.vmem [shape: f32[1,1024], index: 9, kind: input, shape index: {}]   ;;  %s8627_s10 = inlined_call_operand.hbm [shape: bf16[1024,512], index: 10, kind: input, shape index: {}]   ;;  %s8628_s11 = inlined_call_operand.vmem [shape: f32[1,512], index: 11, kind: input, shape index: {}]   ;;  %s8629_s12 = inlined_call_operand.vmem [shape: f32[1,512], index: 12, kind: input, shape index: {}]   ;;  %s8630_s13 = inlined_call_operand.hbm [shape: bf16[512,256], index: 13, kind: input, shape index: {}]   ;;  %s8631_s14 = inlined_call_operand.vmem [shape: f32[1,256], index: 14, kind: input, shape index: {}]   ;;  %s8632_s15 = inlined_call_operand.vmem [shape: f32[1,256], index: 15, kind: input, shape index: {}]   ;;  %s8633_s16 = inlined_call_operand.vmem [shape: bf16[256,9], index: 16, kind: input, shape index: {}]   ;;  %s8634_s17 = inlined_call_operand.vmem [shape: f32[1,9], index: 17, kind: input, shape index: {}]   ;;  %s8635_s18 = inlined_call_operand.hbm [shape: f32[2,9], index: 18, kind: output, shape index: {}]  }
   0x1   :  { %8637 = sst [smem:[#allocation12_spill]] %s8617_s0 }
   0x2   :  { %8638 = sst [smem:[#allocation13_spill]] %s8618_s1 }
   0x3   :  { %8639 = sst [smem:[#allocation14_spill]] %s8619_s2 }
   0x4   :  { %23 = vsyncpa [#allocation3], 0 }
   0x5   :  { %24 = vsyncpa [#allocation6], 0 }
   0x6   :  { %25 = vsyncpa [#allocation4], 0  ;;  %s7063_s27 = smov [#allocation5]   ;;  %s6969_s0 = scalar_lea.hbm %s8627_s10, 32768 }
   0x7   :  { %s61_s28 = sshll.u32 %s7063_s27, 4  ;;  %p6970_p0 = scmp.ne.s32.totalorder %s8627_s10, %s6969_s0  ;;  %s62_s28 = int_to_ptr.vmem [resolvable:$true] %s61_s28 }
   0x8   :  { %p6973_p1 = scmp.lt.u32.totalorder %s6969_s0, %s8627_s10 }
   0xa   :  { %p6975_p2 = pnand %p6973_p1, %p6970_p0 }
   0xc   :  { %6978 = shalt.err (!%p6975_p2)
}
   0xd   :  { %s6979_s22 = scalar_lea.vmem %s62_s28, 32768  ;;  %p6984_p4 = scmp.lt.s32.totalorder %s62_s28, %s62_s28 }
   0xe   :  { %p6980_p3 = scmp.ne.s32.totalorder %s62_s28, %s6979_s22  ;;  %p6985_p5 = scmp.lt.s32.totalorder %s6979_s22, %s6979_s22 }
  0x10   :  { %p6986_p6 = por %p6985_p5, %p6984_p4 }
  0x12   :  { %p6987_p7 = pnand %p6986_p6, %p6980_p3 }
  0x14   :  { %6990 = shalt.err (!%p6987_p7)
}
  0x15   :  { %s7064_s2 = smov 256   ;;  %s7065_s23 = smov 16  }
  0x16   :  { %67 = dma.hbm_to_vmem [thread:$0]  %s8627_s10, 32768, %s62_s28, [#allocation6], %s7064_s2, %s7064_s2, %s7065_s23  }
  0x17   :  { %s7066_s26 = smov [#allocation2]   ;;  %s6991_s0 = scalar_lea.hbm %s8624_s7, 8192 }
  0x18   :  { %s45_s27 = sshll.u32 %s7066_s26, 4  ;;  %p6992_p8 = scmp.ne.s32.totalorder %s8624_s7, %s6991_s0  ;;  %s46_s27 = int_to_ptr.vmem [resolvable:$true] %s45_s27 }
  0x19   :  { %p6995_p9 = scmp.lt.u32.totalorder %s6991_s0, %s8624_s7 }
  0x1b   :  { %p6997_p10 = pnand %p6995_p9, %p6992_p8 }
  0x1d   :  { %7000 = shalt.err (!%p6997_p10)
}
  0x1e   :  { %s7001_s22 = scalar_lea.vmem %s46_s27, 8192  ;;  %p7006_p12 = scmp.lt.s32.totalorder %s46_s27, %s46_s27 }
  0x1f   :  { %p7002_p11 = scmp.ne.s32.totalorder %s46_s27, %s7001_s22  ;;  %p7007_p13 = scmp.lt.s32.totalorder %s7001_s22, %s7001_s22 }
  0x21   :  { %p7008_p0 = por %p7007_p13, %p7006_p12 }
  0x23   :  { %p7009_p1 = pnand %p7008_p0, %p7002_p11 }
  0x25   :  { %7012 = shalt.err (!%p7009_p1)
}
  0x26   :  { %s7067_s10 = smov 512   ;;  %s7068_s28 = smov 32  }
  0x27   :  { %51 = dma.hbm_to_vmem [thread:$0]  %s8624_s7, 8192, %s46_s27, [#allocation3], %s7067_s10, %s7067_s10, %s7068_s28  }
  0x28   :  { %s7069_s24 = smov [#allocation7]   ;;  %s7013_s30 = scalar_lea.hbm %s8630_s13, 8192 }
  0x29   :  { %s77_s25 = sshll.u32 %s7069_s24, 4  ;;  %p7014_p2 = scmp.ne.s32.totalorder %s8630_s13, %s7013_s30  ;;  %s78_s25 = int_to_ptr.vmem [resolvable:$true] %s77_s25 }
  0x2a   :  { %p7017_p3 = scmp.lt.u32.totalorder %s7013_s30, %s8630_s13 }
  0x2c   :  { %p7019_p4 = pnand %p7017_p3, %p7014_p2 }
  0x2e   :  { %7022 = shalt.err (!%p7019_p4)
}
  0x2f   :  { %s7023_s21 = scalar_lea.vmem %s78_s25, 8192  ;;  %p7028_p6 = scmp.lt.s32.totalorder %s78_s25, %s78_s25 }
  0x30   :  { %p7024_p5 = scmp.ne.s32.totalorder %s78_s25, %s7023_s21  ;;  %p7029_p7 = scmp.lt.s32.totalorder %s7023_s21, %s7023_s21 }
  0x32   :  { %p7030_p8 = por %p7029_p7, %p7028_p6 }
  0x34   :  { %p7031_p9 = pnand %p7030_p8, %p7024_p5 }
  0x36   :  { %7034 = shalt.err (!%p7031_p9)
}
  0x37   :  { %s7070_s7 = smov 128   ;;  %s7071_s27 = smov 8  }
  0x38   :  { %83 = dma.hbm_to_vmem [thread:$0]  %s8630_s13, 8192, %s78_s25, [#allocation6], %s7070_s7, %s7070_s7, %s7071_s27  }
  0x39   :  { %7057 = dma.done.wait [#allocation3], 8192  }
  0x3a   :  { %7058 = vsyncadd [#allocation3], 4294959104 }
  0x3b   :  { %7059 = dma.done.wait [#allocation6], 40960  }
  0x3c   :  { %7060 = vsyncadd [#allocation6], 4294926336  ;;  %vm200_vm0 = vcmask 1040384   ;;  %vm201_vm1 = vcmask 1041408   ;;  %v7072_v0 = vmov 65535   ;;  %s8640_s23 = sld [smem:[#allocation13_spill]] }
  0x3d   :  { %v202_v1 = vsel %vm200_vm0, 4294967295, %v7072_v0  ;;  %s8641_s29 = sld [smem:[#allocation12_spill]]  ;;  %vm151_vm2 = vcmask 23552   ;;  %v6467_v19 = vld [vmem:[%s8621_s4] sm:$0xff]   ;;  %v6468_v54 = vld [vmem:[%s8621_s4 + $0x8] sm:$0xff]   ;;  %v6469_v55 = vld [vmem:[%s8621_s4 + $0x10] sm:$0xff]  }
  0x3e   :  { %v203_v2 = vsel %vm201_vm1, %v202_v1, 0  ;;  %6371 = vmatprep.subr.bf16.mxu1 %v6467_v19  ;;  %v6470_v56 = vld [vmem:[%s8621_s4 + $0x18] sm:$0xff]   ;;  %v862_v57 = vld [vmem:[#allocation2] sm:$0xff]  ;;  %s8642_s25 = sld [smem:[#allocation14_spill]]  ;;  %vm526_vm3 = vcmask 523264   ;;  %vm5819_vm4 = vcmask 66560  }
  0x3f   :  { %6372 = vmatpush3.bf16.msra.mxu1 %v6467_v19  ;;  %v866_v58 = vld [vmem:[#allocation2 + $0x20] sm:$0xff] }
  0x40   :  { %6373 = vmatprep.subr.bf16.mxu1 %v6468_v54  ;;  %v870_v59 = vld [vmem:[#allocation2 + $0x40] sm:$0xff]  ;;  %v7334_v60 = vcombine.low %v862_v57, %v866_v58  ;;  %v5878_v61 = vcombine.high %v862_v57, %v866_v58 }
  0x41   :  { %v874_v62 = vld [vmem:[#allocation2 + $0x60] sm:$0xff] }
  0x42   :  { %v150_v3 = vld [vmem:[%s8640_s23] sm:$0x3]  ;;  %v5886_v63 = vcombine.high %v870_v59, %v874_v62 }
  0x43   :  { %v102_v4 = vld [vmem:[%s8641_s29] sm:$0xff]  ;;  %v103_v5 = vld [vmem:[%s8641_s29 + $0x8] sm:$0xff]  ;;  %v205_v6 = vand.u32 %v203_v2, %v150_v3  ;;  %v104_v8 = vld [vmem:[%s8641_s29 + $0x10] sm:$0xff]  ;;  %6374 = vmatpush3.bf16.msra.mxu1 %v6468_v54  ;;  %v7337_v2 = vcombine.low %v870_v59, %v874_v62 }
  0x44   :  { %v134_v7 = vpack.c.bf16 %v103_v5, %v102_v4  ;;  %v105_v9 = vld [vmem:[%s8641_s29 + $0x18] sm:$0xff]  ;;  %v106_v10 = vld [vmem:[%s8641_s29 + $0x20] sm:$0xff]  ;;  %v107_v11 = vld [vmem:[%s8641_s29 + $0x28] sm:$0xff]  ;;  %6375 = vmatprep.subr.bf16.mxu1 %v6469_v55 }
  0x45   :  { %6337 = vmatprep.subr.bf16.mxu0 %v205_v6  ;;  %v135_v12 = vpack.c.bf16 %v105_v9, %v104_v8  ;;  %v136_v13 = vpack.c.bf16 %v107_v11, %v106_v10  ;;  %v108_v14 = vld [vmem:[%s8641_s29 + $0x30] sm:$0xff]  ;;  %v109_v15 = vld [vmem:[%s8641_s29 + $0x38] sm:$0xff]  ;;  %v110_v16 = vld [vmem:[%s8641_s29 + $0x40] sm:$0xff] }
  0x46   :  { %6339 = vmatprep.mubr.msk.bf16.mxu0 %vm151_vm2, %v134_v7  ;;  %6338 = vmatpush3.bf16.msra.mxu0 %v205_v6  ;;  %v111_v17 = vld [vmem:[%s8641_s29 + $0x48] sm:$0xff]  ;;  %v137_v18 = vpack.c.bf16 %v109_v15, %v108_v14  ;;  %v112_v21 = vld [vmem:[%s8641_s29 + $0x50] sm:$0xff]  ;;  %v113_v22 = vld [vmem:[%s8641_s29 + $0x58] sm:$0xff] }
  0x47   :  { %v138_v20 = vpack.c.bf16 %v111_v17, %v110_v16  ;;  %v114_v23 = vld [vmem:[%s8641_s29 + $0x60] sm:$0xff]  ;;  %v115_v24 = vld [vmem:[%s8641_s29 + $0x68] sm:$0xff]  ;;  %v139_v25 = vpack.c.bf16 %v113_v22, %v112_v21  ;;  %v116_v27 = vld [vmem:[%s8641_s29 + $0x70] sm:$0xff]  ;;  %6376 = vmatpush3.bf16.msra.mxu1 %v6469_v55  ;;  %1246 = vmatprep.subr.bf16.mxu0 %v5878_v61 }
  0x48   :  { %v140_v26 = vpack.c.bf16 %v115_v24, %v114_v23  ;;  %v117_v28 = vld [vmem:[%s8641_s29 + $0x78] sm:$0xff]  ;;  %v118_v29 = vld [vmem:[%s8641_s29 + $0x80] sm:$0xff]  ;;  %v119_v30 = vld [vmem:[%s8641_s29 + $0x88] sm:$0xff]  ;;  %6377 = vmatprep.subr.bf16.mxu1 %v6470_v56 }
  0x49   :  { %6340 = vmatmul.mubr.msk.bf16.vlgmr.msra.gmra.mrb[0].mxu0 %vm151_vm2, %v135_v12  ;;  %v141_v31 = vpack.c.bf16 %v117_v28, %v116_v27  ;;  %v142_v32 = vpack.c.bf16 %v119_v30, %v118_v29  ;;  %v120_v33 = vld [vmem:[%s8641_s29 + $0x90] sm:$0xff]  ;;  %v121_v34 = vld [vmem:[%s8641_s29 + $0x98] sm:$0xff]  ;;  %v122_v35 = vld [vmem:[%s8641_s29 + $0xa0] sm:$0xff] }
  0x4a   :  { %6343 = vmatprep.mubr.msk.bf16.mxu0 %vm151_vm2, %v136_v13  ;;  %v123_v36 = vld [vmem:[%s8641_s29 + $0xa8] sm:$0xff]  ;;  %v143_v37 = vpack.c.bf16 %v121_v34, %v120_v33  ;;  %v124_v39 = vld [vmem:[%s8641_s29 + $0xb0] sm:$0xff]  ;;  %v125_v40 = vld [vmem:[%s8641_s29 + $0xb8] sm:$0xff]  ;;  %1247 = vmatpush1.bf16.msra.mxu0 %v7334_v60 }
  0x4b   :  { %v144_v38 = vpack.c.bf16 %v123_v36, %v122_v35  ;;  %v126_v41 = vld [vmem:[%s8641_s29 + $0xc0] sm:$0xff]  ;;  %v127_v42 = vld [vmem:[%s8641_s29 + $0xc8] sm:$0xff]  ;;  %v145_v43 = vpack.c.bf16 %v125_v40, %v124_v39  ;;  %v128_v45 = vld [vmem:[%s8641_s29 + $0xd0] sm:$0xff]  ;;  %6378 = vmatpush3.bf16.msra.mxu1 %v6470_v56  ;;  %1248 = vmatprep.subr.bf16.mxu0 %v5886_v63 }
  0x4c   :  { %v146_v44 = vpack.c.bf16 %v127_v42, %v126_v41  ;;  %v129_v46 = vld [vmem:[%s8641_s29 + $0xd8] sm:$0xff]  ;;  %v130_v47 = vld [vmem:[%s8641_s29 + $0xe0] sm:$0xff]  ;;  %v131_v48 = vld [vmem:[%s8641_s29 + $0xe8] sm:$0xff]  ;;  %6411 = vmatprep.subr.bf16.mxu1 %v5878_v61 }
  0x4d   :  { %v147_v49 = vpack.c.bf16 %v129_v46, %v128_v45  ;;  %v148_v50 = vpack.c.bf16 %v131_v48, %v130_v47  ;;  %v132_v51 = vld [vmem:[%s8641_s29 + $0xf0] sm:$0xff]  ;;  %v133_v52 = vld [vmem:[%s8641_s29 + $0xf8] sm:$0xff]  ;;  %v878_v0 = vld [vmem:[#allocation2 + $0x80] sm:$0xff] }
  0x4e   :  { %v149_v53 = vpack.c.bf16 %v133_v52, %v132_v51  ;;  %v882_v1 = vld [vmem:[#allocation2 + $0xa0] sm:$0xff]  ;;  %1249 = vmatpush1.bf16.msra.mxu0 %v7337_v2 }
  0x4f   :  { %v7339_v3 = vcombine.high %v878_v0, %v882_v1  ;;  %v886_v4 = vld [vmem:[#allocation2 + $0xc0] sm:$0xff]  ;;  %v7342_v6 = vcombine.low %v878_v0, %v882_v1 }
  0x50   :  { %v890_v5 = vld [vmem:[#allocation2 + $0xe0] sm:$0xff] }
  0x51   :  { %6344 = vmatmul.mubr.msk.bf16.gmra.mrb[4].mxu0 %vm151_vm2, %v137_v18  ;;  %1250 = vmatprep.subr.bf16.mxu0 %v7339_v3  ;;  %v7345_v7 = vcombine.high %v886_v4, %v890_v5  ;;  %v894_v8 = vld [vmem:[#allocation2 + $0x100] sm:$0xff]  ;;  %v7348_v10 = vcombine.low %v886_v4, %v890_v5 }
  0x52   :  { %6347 = vmatprep.mubr.msk.bf16.mxu0 %vm151_vm2, %v138_v20  ;;  %v898_v9 = vld [vmem:[#allocation2 + $0x120] sm:$0xff]  ;;  %1251 = vmatpush1.bf16.msra.mxu0 %v7342_v6 }
  0x53   :  { %1252 = vmatprep.subr.bf16.mxu0 %v7345_v7  ;;  %v7351_v11 = vcombine.high %v894_v8, %v898_v9  ;;  %v7354_v12 = vcombine.low %v894_v8, %v898_v9  ;;  %v7361_v13 = vld [vmem:[%s8642_s25] ss:$0 sm:$0xff] }
  0x54   :  { %v7366_v15 = vld [vmem:[%s8620_s3] ss:$0 sm:$0xff] }
  0x56   :  { %1253 = vmatpush1.bf16.msra.mxu0 %v7348_v10 }
  0x57   :  { %1254 = vmatprep.subr.bf16.mxu0 %v7351_v11 }
  0x59   :  { %6348 = vmatmul.mubr.msk.bf16.gmra.mrb[8].mxu0 %vm151_vm2, %v139_v25 }
  0x5a   :  { %6351 = vmatprep.mubr.msk.bf16.mxu0 %vm151_vm2, %v140_v26  ;;  %1255 = vmatpush1.bf16.msra.mxu0 %v7354_v12 }
  0x61   :  { %6352 = vmatmul.mubr.msk.bf16.gmra.mrb[12].mxu0 %vm151_vm2, %v141_v31 }
  0x62   :  { %6355 = vmatprep.mubr.msk.bf16.mxu0 %vm151_vm2, %v142_v32 }
  0x69   :  { %6356 = vmatmul.mubr.msk.bf16.gmra.mrb[16].mxu0 %vm151_vm2, %v143_v37 }
  0x6a   :  { %6359 = vmatprep.mubr.msk.bf16.mxu0 %vm151_vm2, %v144_v38 }
  0x71   :  { %6360 = vmatmul.mubr.msk.bf16.gmra.mrb[20].mxu0 %vm151_vm2, %v145_v43 }
  0x72   :  { %6363 = vmatprep.mubr.msk.bf16.mxu0 %vm151_vm2, %v146_v44 }
  0x79   :  { %6364 = vmatmul.mubr.msk.bf16.gmra.mrb[24].mxu0 %vm151_vm2, %v147_v49 }
  0x7a   :  { %6367 = vmatprep.mubr.msk.bf16.mxu0 %vm151_vm2, %v148_v50 }
  0x81   :  { %6368 = vmatmul.mubr.msk.bf16.gmra.mrb[28].mxu0 %vm151_vm2, %v149_v53 }
 0x11c   :  { %v6341_v14 = vpop.f32.mrb[0].mxu0 }
 0x11d   :  { %v377_v16 = vmul.f32 %v6341_v14, %v7361_v13  ;;  %v241_v17 = vpop.f32.mrb[1].mxu0 }
 0x11e   :  { %v375_v18 = vmul.f32 %v7361_v13, %v241_v17  ;;  %v6342_v19 = vpop.f32.mrb[2].mxu0 }
 0x11f   :  { %v416_v20 = vadd.f32 %v7366_v15, %v377_v16  ;;  %v378_v21 = vmul.f32 %v6342_v19, %v7361_v13  ;;  %v244_v22 = vpop.f32.mrb[3].mxu0 }
 0x120   :  { %v414_v23 = vadd.f32 %v7366_v15, %v375_v18  ;;  %v376_v24 = vmul.f32 %v7361_v13, %v244_v22 }
 0x121   :  { %v417_v25 = vadd.f32 %v7366_v15, %v378_v21  ;;  %v448_v27 = vmax.f32 %v416_v20, 0.0 }
 0x122   :  { %v415_v26 = vadd.f32 %v7366_v15, %v376_v24  ;;  %v446_v29 = vmax.f32 %v414_v23, 0.0 }
 0x123   :  { %v449_v28 = vmax.f32 %v417_v25, 0.0 }
 0x124   :  { %v447_v30 = vmax.f32 %v415_v26, 0.0  ;;  %v6345_v31 = vpop.f32.mrb[4].mxu0 }
 0x125   :  { %v479_v32 = vpack.c.bf16 %v449_v28, %v448_v27  ;;  %v381_v33 = vmul.f32 %v6345_v31, %v7361_v13  ;;  %v257_v34 = vpop.f32.mrb[5].mxu0 }
 0x126   :  { %v379_v35 = vmul.f32 %v7361_v13, %v257_v34  ;;  %v6346_v36 = vpop.f32.mrb[6].mxu0  ;;  %v478_v37 = vpack.c.bf16 %v447_v30, %v446_v29 }
 0x127   :  { %v420_v38 = vadd.f32 %v7366_v15, %v381_v33  ;;  %v382_v39 = vmul.f32 %v6346_v36, %v7361_v13  ;;  %v260_v40 = vpop.f32.mrb[7].mxu0 }
 0x128   :  { %v418_v41 = vadd.f32 %v7366_v15, %v379_v35  ;;  %v380_v42 = vmul.f32 %v7361_v13, %v260_v40  ;;  %6379 = vmatprep.mubr.msk.bf16.mxu1 %vm526_vm3, %v478_v37 }
 0x129   :  { %v421_v43 = vadd.f32 %v7366_v15, %v382_v39  ;;  %6380 = vmatmul.mubr.msk.bf16.vlgmr.msra.gmra.mrb[0].mxu1 %vm526_vm3, %v479_v32  ;;  %v452_v45 = vmax.f32 %v420_v38, 0.0 }
 0x12a   :  { %v419_v44 = vadd.f32 %v7366_v15, %v380_v42  ;;  %6419 = vmatpush1.bf16.msra.mxu1 %v7334_v60  ;;  %v450_v47 = vmax.f32 %v418_v41, 0.0 }
 0x12b   :  { %v453_v46 = vmax.f32 %v421_v43, 0.0  ;;  %6412 = vmatprep.subr.bf16.mxu1 %v5886_v63 }
 0x12c   :  { %v451_v48 = vmax.f32 %v419_v44, 0.0  ;;  %v6349_v49 = vpop.f32.mrb[8].mxu0 }
 0x12d   :  { %v481_v50 = vpack.c.bf16 %v453_v46, %v452_v45  ;;  %v385_v51 = vmul.f32 %v6349_v49, %v7361_v13  ;;  %v273_v52 = vpop.f32.mrb[9].mxu0 }
 0x12e   :  { %v480_v53 = vpack.c.bf16 %v451_v48, %v450_v47  ;;  %v383_v54 = vmul.f32 %v7361_v13, %v273_v52  ;;  %v6350_v55 = vpop.f32.mrb[10].mxu0  ;;  %6420 = vmatpush1.bf16.msra.mxu1 %v7337_v2 }
 0x12f   :  { %v424_v56 = vadd.f32 %v7366_v15, %v385_v51  ;;  %v386_v57 = vmul.f32 %v6350_v55, %v7361_v13  ;;  %v276_v58 = vpop.f32.mrb[11].mxu0  ;;  %6413 = vmatprep.subr.bf16.mxu1 %v7339_v3 }
 0x130   :  { %v422_v59 = vadd.f32 %v7366_v15, %v383_v54  ;;  %v384_v60 = vmul.f32 %v7361_v13, %v276_v58  ;;  %6383 = vmatprep.mubr.msk.bf16.mxu1 %vm526_vm3, %v480_v53 }
 0x131   :  { %v425_v61 = vadd.f32 %v7366_v15, %v386_v57  ;;  %6384 = vmatmul.mubr.msk.bf16.gmra.mrb[4].mxu1 %vm526_vm3, %v481_v50  ;;  %v456_v63 = vmax.f32 %v424_v56, 0.0 }
 0x132   :  { %v423_v62 = vadd.f32 %v7366_v15, %v384_v60  ;;  %6421 = vmatpush1.bf16.msra.mxu1 %v7342_v6  ;;  %v454_v1 = vmax.f32 %v422_v59, 0.0 }
 0x133   :  { %v457_v0 = vmax.f32 %v425_v61, 0.0  ;;  %6414 = vmatprep.subr.bf16.mxu1 %v7345_v7 }
 0x134   :  { %v455_v2 = vmax.f32 %v423_v62, 0.0  ;;  %v6353_v3 = vpop.f32.mrb[12].mxu0 }
 0x135   :  { %v483_v4 = vpack.c.bf16 %v457_v0, %v456_v63  ;;  %v389_v5 = vmul.f32 %v6353_v3, %v7361_v13  ;;  %v289_v8 = vpop.f32.mrb[13].mxu0 }
 0x136   :  { %v482_v9 = vpack.c.bf16 %v455_v2, %v454_v1  ;;  %v387_v14 = vmul.f32 %v7361_v13, %v289_v8  ;;  %v6354_v16 = vpop.f32.mrb[14].mxu0  ;;  %6422 = vmatpush1.bf16.msra.mxu1 %v7348_v10 }
 0x137   :  { %v428_v17 = vadd.f32 %v7366_v15, %v389_v5  ;;  %v390_v6 = vmul.f32 %v6354_v16, %v7361_v13  ;;  %v292_v18 = vpop.f32.mrb[15].mxu0  ;;  %6415 = vmatprep.subr.bf16.mxu1 %v7351_v11 }
 0x138   :  { %v426_v7 = vadd.f32 %v7366_v15, %v387_v14  ;;  %v388_v19 = vmul.f32 %v7361_v13, %v292_v18  ;;  %6387 = vmatprep.mubr.msk.bf16.mxu1 %vm526_vm3, %v482_v9 }
 0x139   :  { %v429_v20 = vadd.f32 %v7366_v15, %v390_v6  ;;  %6388 = vmatmul.mubr.msk.bf16.gmra.mrb[8].mxu1 %vm526_vm3, %v483_v4  ;;  %v460_v10 = vmax.f32 %v428_v17, 0.0 }
 0x13a   :  { %v427_v21 = vadd.f32 %v7366_v15, %v388_v19  ;;  %6423 = vmatpush1.bf16.msra.mxu1 %v7354_v12  ;;  %v458_v23 = vmax.f32 %v426_v7, 0.0 }
 0x13b   :  { %v461_v22 = vmax.f32 %v429_v20, 0.0 }
 0x13c   :  { %v459_v24 = vmax.f32 %v427_v21, 0.0  ;;  %v6357_v25 = vpop.f32.mrb[16].mxu0 }
 0x13d   :  { %v485_v11 = vpack.c.bf16 %v461_v22, %v460_v10  ;;  %v393_v26 = vmul.f32 %v6357_v25, %v7361_v13  ;;  %v305_v27 = vpop.f32.mrb[17].mxu0 }
 0x13e   :  { %v484_v28 = vpack.c.bf16 %v459_v24, %v458_v23  ;;  %v391_v29 = vmul.f32 %v7361_v13, %v305_v27  ;;  %v6358_v30 = vpop.f32.mrb[18].mxu0 }
 0x13f   :  { %v432_v31 = vadd.f32 %v7366_v15, %v393_v26  ;;  %v394_v32 = vmul.f32 %v6358_v30, %v7361_v13  ;;  %v308_v33 = vpop.f32.mrb[19].mxu0 }
 0x140   :  { %v430_v12 = vadd.f32 %v7366_v15, %v391_v29  ;;  %v392_v34 = vmul.f32 %v7361_v13, %v308_v33  ;;  %6391 = vmatprep.mubr.msk.bf16.mxu1 %vm526_vm3, %v484_v28 }
 0x141   :  { %v433_v35 = vadd.f32 %v7366_v15, %v394_v32  ;;  %6392 = vmatmul.mubr.msk.bf16.gmra.mrb[12].mxu1 %vm526_vm3, %v485_v11  ;;  %v464_v37 = vmax.f32 %v432_v31, 0.0 }
 0x142   :  { %v431_v36 = vadd.f32 %v7366_v15, %v392_v34  ;;  %v462_v39 = vmax.f32 %v430_v12, 0.0 }
 0x143   :  { %v465_v38 = vmax.f32 %v433_v35, 0.0  ;;  %v902_v35 = vld [vmem:[#allocation2 + $0x140] sm:$0xff] }
 0x144   :  { %v463_v40 = vmax.f32 %v431_v36, 0.0  ;;  %v6361_v41 = vpop.f32.mrb[20].mxu0 }
 0x145   :  { %v487_v42 = vpack.c.bf16 %v465_v38, %v464_v37  ;;  %v397_v43 = vmul.f32 %v6361_v41, %v7361_v13  ;;  %v321_v44 = vpop.f32.mrb[21].mxu0  ;;  %v910_v38 = vld [vmem:[#allocation2 + $0x180] sm:$0xff] }
 0x146   :  { %v486_v45 = vpack.c.bf16 %v463_v40, %v462_v39  ;;  %v395_v46 = vmul.f32 %v7361_v13, %v321_v44  ;;  %v6362_v47 = vpop.f32.mrb[22].mxu0  ;;  %v914_v39 = vld [vmem:[#allocation2 + $0x1a0] sm:$0xff] }
 0x147   :  { %v436_v48 = vadd.f32 %v7366_v15, %v397_v43  ;;  %v398_v49 = vmul.f32 %v6362_v47, %v7361_v13  ;;  %v324_v50 = vpop.f32.mrb[23].mxu0  ;;  %v5926_v40 = vcombine.high %v910_v38, %v914_v39  ;;  %v918_v41 = vld [vmem:[#allocation2 + $0x1c0] sm:$0xff]  ;;  %v7460_v47 = vld [vmem:[#allocation2 + $0x28] sm:$0xff] }
 0x148   :  { %v434_v51 = vadd.f32 %v7366_v15, %v395_v46  ;;  %v396_v52 = vmul.f32 %v7361_v13, %v324_v50  ;;  %6395 = vmatprep.mubr.msk.bf16.mxu1 %vm526_vm3, %v486_v45  ;;  %v7073_v45 = vmov 0   ;;  %v7458_v46 = vld [vmem:[#allocation2 + $0x8] sm:$0xff]  ;;  %v864_v50 = vld [vmem:[#allocation2 + $0x10] sm:$0xff] }
 0x149   :  { %v437_v53 = vadd.f32 %v7366_v15, %v398_v49  ;;  %6396 = vmatmul.mubr.msk.bf16.gmra.mrb[16].mxu1 %vm526_vm3, %v487_v42  ;;  %v468_v55 = vmax.f32 %v436_v48, 0.0  ;;  %v922_v42 = vld [vmem:[#allocation2 + $0x1e0] sm:$0xff]  ;;  %1278 = vmatprep.mubr.bf16.mxu0 %v7073_v45  ;;  %v5879_v48 = vcombine.low %v7458_v46, %v7460_v47  ;;  %v5880_v49 = vcombine.high %v7458_v46, %v7460_v47 }
 0x14a   :  { %v435_v54 = vadd.f32 %v7366_v15, %v396_v52  ;;  %v466_v57 = vmax.f32 %v434_v51, 0.0  ;;  %v5934_v43 = vcombine.high %v918_v41, %v922_v42  ;;  %v5933_v44 = vcombine.low %v918_v41, %v922_v42  ;;  %v868_v51 = vld [vmem:[#allocation2 + $0x30] sm:$0xff] }
 0x14b   :  { %v469_v56 = vmax.f32 %v437_v53, 0.0  ;;  %v5881_v52 = vcombine.low %v864_v50, %v868_v51  ;;  %v5882_v53 = vcombine.high %v864_v50, %v868_v51  ;;  %v896_v51 = vld [vmem:[#allocation2 + $0x110] sm:$0xff] }
 0x14c   :  { %v467_v58 = vmax.f32 %v435_v54, 0.0  ;;  %v6365_v59 = vpop.f32.mrb[24].mxu0  ;;  %v7469_v54 = vld [vmem:[%s8622_s5] ss:$0 sm:$0xff] }
 0x14d   :  { %v489_v60 = vpack.c.bf16 %v469_v56, %v468_v55  ;;  %v401_v61 = vmul.f32 %v6365_v59, %v7361_v13  ;;  %v337_v62 = vpop.f32.mrb[25].mxu0  ;;  %v7474_v56 = vld [vmem:[%s8623_s6] ss:$0 sm:$0xff] }
 0x14e   :  { %v488_v63 = vpack.c.bf16 %v467_v58, %v466_v57  ;;  %v399_v0 = vmul.f32 %v7361_v13, %v337_v62  ;;  %v6366_v1 = vpop.f32.mrb[26].mxu0 }
 0x14f   :  { %v440_v2 = vadd.f32 %v7366_v15, %v401_v61  ;;  %v402_v3 = vmul.f32 %v6366_v1, %v7361_v13  ;;  %v340_v4 = vpop.f32.mrb[27].mxu0 }
 0x150   :  { %v438_v5 = vadd.f32 %v7366_v15, %v399_v0  ;;  %v400_v8 = vmul.f32 %v7361_v13, %v340_v4  ;;  %6399 = vmatprep.mubr.msk.bf16.mxu1 %vm526_vm3, %v488_v63 }
 0x151   :  { %v441_v9 = vadd.f32 %v7366_v15, %v402_v3  ;;  %6400 = vmatmul.mubr.msk.bf16.gmra.mrb[20].mxu1 %vm526_vm3, %v489_v60  ;;  %v472_v16 = vmax.f32 %v440_v2, 0.0 }
 0x152   :  { %v439_v14 = vadd.f32 %v7366_v15, %v400_v8  ;;  %v470_v6 = vmax.f32 %v438_v5, 0.0  ;;  %v872_v8 = vld [vmem:[#allocation2 + $0x50] sm:$0xff] }
 0x153   :  { %v473_v17 = vmax.f32 %v441_v9, 0.0  ;;  %v876_v9 = vld [vmem:[#allocation2 + $0x70] sm:$0xff] }
 0x154   :  { %v471_v18 = vmax.f32 %v439_v14, 0.0  ;;  %v6369_v7 = vpop.f32.mrb[28].mxu0 }
 0x155   :  { %v491_v19 = vpack.c.bf16 %v473_v17, %v472_v16  ;;  %v405_v20 = vmul.f32 %v6369_v7, %v7361_v13  ;;  %v353_v21 = vpop.f32.mrb[29].mxu0 }
 0x156   :  { %v490_v10 = vpack.c.bf16 %v471_v18, %v470_v6  ;;  %v403_v22 = vmul.f32 %v7361_v13, %v353_v21  ;;  %v6370_v23 = vpop.f32.mrb[30].mxu0 }
 0x157   :  { %v444_v24 = vadd.f32 %v7366_v15, %v405_v20  ;;  %v406_v25 = vmul.f32 %v6370_v23, %v7361_v13  ;;  %v356_v11 = vpop.f32.mrb[31].mxu0 }
 0x158   :  { %v442_v26 = vadd.f32 %v7366_v15, %v403_v22  ;;  %v404_v27 = vmul.f32 %v7361_v13, %v356_v11  ;;  %6403 = vmatprep.mubr.msk.bf16.mxu1 %vm526_vm3, %v490_v10  ;;  %v906_v13 = vld [vmem:[#allocation2 + $0x160] sm:$0xff]  ;;  %v5890_v10 = vcombine.high %v872_v8, %v876_v9  ;;  %v884_v11 = vld [vmem:[#allocation2 + $0xb0] sm:$0xff] }
 0x159   :  { %v476_v28 = vmax.f32 %v444_v24, 0.0  ;;  %v445_v29 = vadd.f32 %v7366_v15, %v406_v25  ;;  %6404 = vmatmul.mubr.msk.bf16.gmra.mrb[24].mxu1 %vm526_vm3, %v491_v19  ;;  %v5918_v36 = vcombine.high %v902_v35, %v906_v13  ;;  %v5917_v37 = vcombine.low %v902_v35, %v906_v13  ;;  %v880_v25 = vld [vmem:[#allocation2 + $0x90] sm:$0xff] }
 0x15a   :  { %v474_v30 = vmax.f32 %v442_v26, 0.0  ;;  %v443_v31 = vadd.f32 %v7366_v15, %v404_v27  ;;  %v5925_v15 = vcombine.low %v910_v38, %v914_v39 }
 0x15b   :  { %v477_v32 = vmax.f32 %v445_v29, 0.0  ;;  %1256 = vmatprep.subr.bf16.mxu0 %v5918_v36  ;;  %6416 = vmatprep.subr.bf16.mxu1 %v5918_v36  ;;  %v5889_v29 = vcombine.low %v872_v8, %v876_v9 }
 0x15c   :  { %v475_v33 = vmax.f32 %v443_v31, 0.0  ;;  %1257 = vmatpush1.bf16.msra.mxu0 %v5917_v37  ;;  %6424 = vmatpush1.bf16.msra.mxu1 %v5917_v37  ;;  %v5898_v31 = vcombine.high %v880_v25, %v884_v11 }
 0x15d   :  { %v493_v12 = vpack.c.bf16 %v477_v32, %v476_v28  ;;  %1258 = vmatprep.subr.bf16.mxu0 %v5926_v40  ;;  %6417 = vmatprep.subr.bf16.mxu1 %v5926_v40  ;;  %v5897_v40 = vcombine.low %v880_v25, %v884_v11 }
 0x15e   :  { %v492_v34 = vpack.c.bf16 %v475_v33, %v474_v30 }
 0x160   :  { %6407 = vmatprep.mubr.msk.bf16.mxu1 %vm526_vm3, %v492_v34  ;;  %1259 = vmatpush1.bf16.msra.mxu0 %v5925_v15  ;;  %v892_v34 = vld [vmem:[#allocation2 + $0xf0] sm:$0xff] }
 0x161   :  { %6408 = vmatmul.mubr.msk.bf16.gmra.mrb[28].mxu1 %vm526_vm3, %v493_v12  ;;  %1260 = vmatprep.subr.bf16.mxu0 %v5934_v43  ;;  %v888_v12 = vld [vmem:[#allocation2 + $0xd0] sm:$0xff] }
 0x162   :  { %6425 = vmatpush1.bf16.msra.mxu1 %v5925_v15  ;;  %1388 = vmatprep.mubr.bf16.mxu1 %v7073_v45 }
 0x163   :  { %6418 = vmatprep.subr.bf16.mxu1 %v5934_v43  ;;  %v5906_v43 = vcombine.high %v888_v12, %v892_v34 }
 0x164   :  { %1261 = vmatpush1.bf16.msra.mxu0 %v5933_v44 }
 0x165   :  { %1632 = vmatprep.subr.bf16.mxu0 %v5882_v53 }
 0x166   :  { %6426 = vmatpush1.bf16.msra.mxu1 %v5933_v44 }
 0x167   :  { %1439 = vmatprep.subr.bf16.mxu1 %v5880_v49 }
 0x1fc   :  { %v6381_v55 = vpop.f32.mrb[0].mxu1 }
 0x1fd   :  { %v745_v57 = vmul.f32 %v6381_v55, %v7469_v54  ;;  %v609_v58 = vpop.f32.mrb[1].mxu1 }
 0x1fe   :  { %v743_v59 = vmul.f32 %v7469_v54, %v609_v58  ;;  %v6382_v60 = vpop.f32.mrb[2].mxu1  ;;  %v5905_v58 = vcombine.low %v888_v12, %v892_v34 }
 0x1ff   :  { %v784_v61 = vadd.f32 %v7474_v56, %v745_v57  ;;  %v746_v62 = vmul.f32 %v6382_v60, %v7469_v54  ;;  %v612_v63 = vpop.f32.mrb[3].mxu1 }
 0x200   :  { %v782_v0 = vadd.f32 %v7474_v56, %v743_v59  ;;  %v744_v1 = vmul.f32 %v7469_v54, %v612_v63  ;;  %v904_v63 = vld [vmem:[#allocation2 + $0x150] sm:$0xff] }
 0x201   :  { %v785_v2 = vadd.f32 %v7474_v56, %v746_v62  ;;  %v816_v4 = vmax.f32 %v784_v61, 0.0 }
 0x202   :  { %v783_v3 = vadd.f32 %v7474_v56, %v744_v1  ;;  %v814_v14 = vmax.f32 %v782_v0, 0.0  ;;  %v908_v0 = vld [vmem:[#allocation2 + $0x170] sm:$0xff] }
 0x203   :  { %v817_v5 = vmax.f32 %v785_v2, 0.0  ;;  %v5921_v11 = vcombine.low %v904_v63, %v908_v0 }
 0x204   :  { %v815_v16 = vmax.f32 %v783_v3, 0.0  ;;  %v6385_v17 = vpop.f32.mrb[4].mxu1 }
 0x205   :  { %v7484_v6 = vpack.c.bf16 %v817_v5, %v816_v4  ;;  %v749_v18 = vmul.f32 %v6385_v17, %v7469_v54  ;;  %v625_v7 = vpop.f32.mrb[5].mxu1 }
 0x206   :  { %v7487_v19 = vpack.c.bf16 %v815_v16, %v814_v14  ;;  %v747_v20 = vmul.f32 %v7469_v54, %v625_v7  ;;  %v6386_v21 = vpop.f32.mrb[6].mxu1 }
 0x207   :  { %v788_v22 = vadd.f32 %v7474_v56, %v749_v18  ;;  %v750_v23 = vmul.f32 %v6386_v21, %v7469_v54  ;;  %v628_v24 = vpop.f32.mrb[7].mxu1  ;;  %v5922_v18 = vcombine.high %v904_v63, %v908_v0 }
 0x208   :  { %v786_v26 = vadd.f32 %v7474_v56, %v747_v20  ;;  %v748_v27 = vmul.f32 %v7469_v54, %v628_v24  ;;  %1279 = vmatmul.mubr.bf16.vlgmr.msra.gmra.mrb[32].mxu0 %v7487_v19 }
 0x209   :  { %v789_v28 = vadd.f32 %v7474_v56, %v750_v23  ;;  %1288 = vmatprep.mubr.bf16.mxu0 %v7073_v45  ;;  %1633 = vmatpush1.bf16.msra.mxu0 %v5881_v52  ;;  %v820_v32 = vmax.f32 %v788_v22, 0.0  ;;  %v900_v52 = vld [vmem:[#allocation2 + $0x130] sm:$0xff] }
 0x20a   :  { %v787_v30 = vadd.f32 %v7474_v56, %v748_v27  ;;  %1634 = vmatprep.subr.bf16.mxu0 %v5890_v10  ;;  %v818_v35 = vmax.f32 %v786_v26, 0.0  ;;  %v5914_v60 = vcombine.high %v896_v51, %v900_v52  ;;  %v5913_v9 = vcombine.low %v896_v51, %v900_v52  ;;  %v912_v10 = vld [vmem:[#allocation2 + $0x190] sm:$0xff] }
 0x20b   :  { %v821_v33 = vmax.f32 %v789_v28, 0.0  ;;  %v916_v22 = vld [vmem:[#allocation2 + $0x1b0] sm:$0xff] }
 0x20c   :  { %v819_v13 = vmax.f32 %v787_v30, 0.0  ;;  %v6389_v36 = vpop.f32.mrb[8].mxu1  ;;  %v5930_v27 = vcombine.high %v912_v10, %v916_v22  ;;  %v920_v30 = vld [vmem:[#allocation2 + $0x1d0] sm:$0xff] }
 0x20d   :  { %v7498_v37 = vpack.c.bf16 %v821_v33, %v820_v32  ;;  %v753_v38 = vmul.f32 %v6389_v36, %v7469_v54  ;;  %v641_v39 = vpop.f32.mrb[9].mxu1  ;;  %1635 = vmatpush1.bf16.msra.mxu0 %v5889_v29  ;;  %v5929_v36 = vcombine.low %v912_v10, %v916_v22 }
 0x20e   :  { %v7501_v15 = vpack.c.bf16 %v819_v13, %v818_v35  ;;  %v751_v41 = vmul.f32 %v7469_v54, %v641_v39  ;;  %v6390_v42 = vpop.f32.mrb[10].mxu1  ;;  %1636 = vmatprep.subr.bf16.mxu0 %v5898_v31  ;;  %v924_v31 = vld [vmem:[#allocation2 + $0x1f0] sm:$0xff] }
 0x20f   :  { %v792_v44 = vadd.f32 %v7474_v56, %v753_v38  ;;  %v754_v49 = vmul.f32 %v6390_v42, %v7469_v54  ;;  %v644_v50 = vpop.f32.mrb[11].mxu1  ;;  %v5937_v52 = vcombine.low %v920_v30, %v924_v31 }
 0x210   :  { %v790_v53 = vadd.f32 %v7474_v56, %v751_v41  ;;  %v752_v55 = vmul.f32 %v7469_v54, %v644_v50  ;;  %1289 = vmatmul.mubr.bf16.gmra.mrb[36].mxu0 %v7484_v6  ;;  %v5938_v41 = vcombine.high %v920_v30, %v924_v31  ;;  %v879_v31 = vld [vmem:[#allocation2 + $0x88] sm:$0xff] }
 0x211   :  { %v793_v57 = vadd.f32 %v7474_v56, %v754_v49  ;;  %1298 = vmatprep.mubr.bf16.mxu0 %v7073_v45  ;;  %1637 = vmatpush1.bf16.msra.mxu0 %v5897_v40  ;;  %v824_v61 = vmax.f32 %v792_v44, 0.0 }
 0x212   :  { %v791_v59 = vadd.f32 %v7474_v56, %v752_v55  ;;  %1638 = vmatprep.subr.bf16.mxu0 %v5906_v43  ;;  %v822_v1 = vmax.f32 %v790_v53, 0.0 }
 0x213   :  { %v825_v62 = vmax.f32 %v793_v57, 0.0 }
 0x214   :  { %v823_v2 = vmax.f32 %v791_v59, 0.0  ;;  %v6393_v3 = vpop.f32.mrb[12].mxu1 }
 0x215   :  { %v7512_v4 = vpack.c.bf16 %v825_v62, %v824_v61  ;;  %v757_v5 = vmul.f32 %v6393_v3, %v7469_v54  ;;  %v657_v8 = vpop.f32.mrb[13].mxu1  ;;  %1639 = vmatpush1.bf16.msra.mxu0 %v5905_v58 }
 0x216   :  { %v7515_v14 = vpack.c.bf16 %v823_v2, %v822_v1  ;;  %v755_v16 = vmul.f32 %v7469_v54, %v657_v8  ;;  %v6394_v17 = vpop.f32.mrb[14].mxu1  ;;  %1640 = vmatprep.subr.bf16.mxu0 %v5914_v60 }
 0x217   :  { %v796_v7 = vadd.f32 %v7474_v56, %v757_v5  ;;  %v758_v20 = vmul.f32 %v6394_v17, %v7469_v54  ;;  %v660_v21 = vpop.f32.mrb[15].mxu1 }
 0x218   :  { %v794_v23 = vadd.f32 %v7474_v56, %v755_v16  ;;  %v756_v24 = vmul.f32 %v7469_v54, %v660_v21  ;;  %1299 = vmatmul.mubr.bf16.gmra.mrb[40].mxu0 %v7501_v15 }
 0x219   :  { %v797_v25 = vadd.f32 %v7474_v56, %v758_v20  ;;  %1308 = vmatprep.mubr.bf16.mxu0 %v7073_v45  ;;  %1641 = vmatpush1.bf16.msra.mxu0 %v5913_v9  ;;  %v828_v28 = vmax.f32 %v796_v7, 0.0  ;;  %v871_v7 = vld [vmem:[#allocation2 + $0x48] sm:$0xff] }
 0x21a   :  { %v795_v26 = vadd.f32 %v7474_v56, %v756_v24  ;;  %1642 = vmatprep.subr.bf16.mxu0 %v5922_v18  ;;  %v826_v32 = vmax.f32 %v794_v23, 0.0  ;;  %v875_v20 = vld [vmem:[#allocation2 + $0x68] sm:$0xff] }
 0x21b   :  { %v829_v29 = vmax.f32 %v797_v25, 0.0 }
 0x21c   :  { %v827_v33 = vmax.f32 %v795_v26, 0.0  ;;  %v6397_v12 = vpop.f32.mrb[16].mxu1 }
 0x21d   :  { %v7526_v34 = vpack.c.bf16 %v829_v29, %v828_v28  ;;  %v761_v35 = vmul.f32 %v6397_v12, %v7469_v54  ;;  %v673_v13 = vpop.f32.mrb[17].mxu1  ;;  %1643 = vmatpush1.bf16.msra.mxu0 %v5921_v11 }
 0x21e   :  { %v7529_v38 = vpack.c.bf16 %v827_v33, %v826_v32  ;;  %v759_v39 = vmul.f32 %v7469_v54, %v673_v13  ;;  %v6398_v40 = vpop.f32.mrb[18].mxu1  ;;  %1644 = vmatprep.subr.bf16.mxu0 %v5930_v27  ;;  %v5888_v27 = vcombine.high %v871_v7, %v875_v20  ;;  %v883_v32 = vld [vmem:[#allocation2 + $0xa8] sm:$0xff] }
 0x21f   :  { %v800_v42 = vadd.f32 %v7474_v56, %v761_v35  ;;  %v762_v43 = vmul.f32 %v6398_v40, %v7469_v54  ;;  %v676_v44 = vpop.f32.mrb[19].mxu1 }
 0x220   :  { %v798_v49 = vadd.f32 %v7474_v56, %v759_v39  ;;  %v760_v50 = vmul.f32 %v7469_v54, %v676_v44  ;;  %1309 = vmatmul.mubr.bf16.gmra.mrb[44].mxu0 %v7498_v37  ;;  %v5887_v39 = vcombine.low %v871_v7, %v875_v20 }
 0x221   :  { %v801_v51 = vadd.f32 %v7474_v56, %v762_v43  ;;  %1318 = vmatprep.mubr.bf16.mxu0 %v7073_v45  ;;  %1645 = vmatpush1.bf16.msra.mxu0 %v5929_v36  ;;  %v832_v55 = vmax.f32 %v800_v42, 0.0 }
 0x222   :  { %v799_v53 = vadd.f32 %v7474_v56, %v760_v50  ;;  %1646 = vmatprep.subr.bf16.mxu0 %v5938_v41  ;;  %v830_v58 = vmax.f32 %v798_v49, 0.0  ;;  %v5896_v41 = vcombine.high %v879_v31, %v883_v32  ;;  %v887_v49 = vld [vmem:[#allocation2 + $0xc8] sm:$0xff] }
 0x223   :  { %v833_v57 = vmax.f32 %v801_v51, 0.0  ;;  %v891_v50 = vld [vmem:[#allocation2 + $0xe8] sm:$0xff] }
 0x224   :  { %v831_v59 = vmax.f32 %v799_v53, 0.0  ;;  %v6401_v60 = vpop.f32.mrb[20].mxu1 }
 0x225   :  { %v7540_v61 = vpack.c.bf16 %v833_v57, %v832_v55  ;;  %v765_v62 = vmul.f32 %v6401_v60, %v7469_v54  ;;  %v689_v63 = vpop.f32.mrb[21].mxu1  ;;  %1647 = vmatpush1.bf16.msra.mxu0 %v5937_v52  ;;  %v5895_v55 = vcombine.low %v879_v31, %v883_v32  ;;  %v5904_v60 = vcombine.high %v887_v49, %v891_v50  ;;  %v919_v31 = vld [vmem:[#allocation2 + $0x1c8] sm:$0xff] }
 0x226   :  { %v7543_v0 = vpack.c.bf16 %v831_v59, %v830_v58  ;;  %v763_v1 = vmul.f32 %v7469_v54, %v689_v63  ;;  %v6402_v2 = vpop.f32.mrb[22].mxu1  ;;  %v923_v32 = vld [vmem:[#allocation2 + $0x1e8] sm:$0xff] }
 0x227   :  { %v804_v3 = vadd.f32 %v7474_v56, %v765_v62  ;;  %v766_v5 = vmul.f32 %v6402_v2, %v7469_v54  ;;  %v692_v8 = vpop.f32.mrb[23].mxu1  ;;  %v895_v2 = vld [vmem:[#allocation2 + $0x108] sm:$0xff] }
 0x228   :  { %v802_v9 = vadd.f32 %v7474_v56, %v763_v1  ;;  %v764_v16 = vmul.f32 %v7469_v54, %v692_v8  ;;  %1319 = vmatmul.mubr.bf16.gmra.mrb[48].mxu0 %v7515_v14 }
 0x229   :  { %v805_v17 = vadd.f32 %v7474_v56, %v766_v5  ;;  %1328 = vmatprep.mubr.bf16.mxu0 %v7073_v45  ;;  %v836_v21 = vmax.f32 %v804_v3, 0.0  ;;  %v899_v3 = vld [vmem:[#allocation2 + $0x128] sm:$0xff] }
 0x22a   :  { %v803_v18 = vadd.f32 %v7474_v56, %v764_v16  ;;  %v834_v22 = vmax.f32 %v802_v9, 0.0  ;;  %v5912_v20 = vcombine.high %v895_v2, %v899_v3 }
 0x22b   :  { %v837_v10 = vmax.f32 %v805_v17, 0.0  ;;  %v5903_v17 = vcombine.low %v887_v49, %v891_v50  ;;  %v885_v49 = vld [vmem:[#allocation2 + $0xb8] sm:$0xff] }
 0x22c   :  { %v835_v23 = vmax.f32 %v803_v18, 0.0  ;;  %v6405_v24 = vpop.f32.mrb[24].mxu1 }
 0x22d   :  { %v7554_v25 = vpack.c.bf16 %v837_v10, %v836_v21  ;;  %v769_v11 = vmul.f32 %v6405_v24, %v7469_v54  ;;  %v705_v26 = vpop.f32.mrb[25].mxu1  ;;  %v907_v10 = vld [vmem:[#allocation2 + $0x168] sm:$0xff]  ;;  %v5911_v24 = vcombine.low %v895_v2, %v899_v3  ;;  %v913_v3 = vld [vmem:[#allocation2 + $0x198] sm:$0xff] }
 0x22e   :  { %v7557_v28 = vpack.c.bf16 %v835_v23, %v834_v22  ;;  %v767_v29 = vmul.f32 %v7469_v54, %v705_v26  ;;  %v6406_v30 = vpop.f32.mrb[26].mxu1 }
 0x22f   :  { %v808_v33 = vadd.f32 %v7474_v56, %v769_v11  ;;  %v770_v12 = vmul.f32 %v6406_v30, %v7469_v54  ;;  %v708_v35 = vpop.f32.mrb[27].mxu1  ;;  %1389 = vmatmul.mubr.bf16.vlgmr.msra.gmra.mrb[32].mxu1 %v7554_v25 }
 0x230   :  { %v806_v13 = vadd.f32 %v7474_v56, %v767_v29  ;;  %v768_v36 = vmul.f32 %v7469_v54, %v708_v35  ;;  %1329 = vmatmul.mubr.bf16.gmra.mrb[52].mxu0 %v7512_v4  ;;  %1440 = vmatpush1.bf16.msra.mxu1 %v5879_v48  ;;  %v915_v29 = vld [vmem:[#allocation2 + $0x1a8] sm:$0xff]  ;;  %v865_v35 = vld [vmem:[#allocation2 + $0x18] sm:$0xff] }
 0x231   :  { %v809_v40 = vadd.f32 %v7474_v56, %v770_v12  ;;  %1441 = vmatprep.subr.bf16.mxu1 %v5888_v27  ;;  %1338 = vmatprep.mubr.bf16.mxu0 %v7073_v45  ;;  %v840_v43 = vmax.f32 %v808_v33, 0.0  ;;  %v911_v27 = vld [vmem:[#allocation2 + $0x188] sm:$0xff]  ;;  %v5936_v12 = vcombine.high %v919_v31, %v923_v32 }
 0x232   :  { %v807_v42 = vadd.f32 %v7474_v56, %v768_v36  ;;  %1398 = vmatprep.mubr.bf16.mxu1 %v7073_v45  ;;  %v838_v51 = vmax.f32 %v806_v13, 0.0  ;;  %v5928_v30 = vcombine.high %v911_v27, %v915_v29  ;;  %v5927_v33 = vcombine.low %v911_v27, %v915_v29  ;;  %v869_v13 = vld [vmem:[#allocation2 + $0x38] sm:$0xff]  ;;  %v6482_v27 = vld [vmem:[#allocation5 + $0x64] ss:$16 sps:$4 sm:$0xff]   ;;  %v6480_v29 = vld [vmem:[#allocation5 + $0x60] ss:$16 sps:$4 sm:$0xff]  }
 0x233   :  { %v841_v44 = vmax.f32 %v809_v40, 0.0  ;;  %v5935_v36 = vcombine.low %v919_v31, %v923_v32  ;;  %v873_v40 = vld [vmem:[#allocation2 + $0x58] sm:$0xff]  ;;  %v6486_v31 = vld [vmem:[#allocation5 + $0x80] ss:$16 sps:$4 sm:$0xff]   ;;  %v6497_v32 = vld [vmem:[#allocation5 + $0xa4] ss:$16 sps:$4 sm:$0xff]  }
 0x234   :  { %v839_v52 = vmax.f32 %v807_v42, 0.0  ;;  %v6409_v53 = vpop.f32.mrb[28].mxu1  ;;  %1442 = vmatpush1.bf16.msra.mxu1 %v5887_v39  ;;  %v5884_v39 = vcombine.high %v865_v35, %v869_v13  ;;  %v5883_v42 = vcombine.low %v865_v35, %v869_v13  ;;  %v6504_v35 = vld [vmem:[#allocation5 + $0xc0] ss:$16 sps:$4 sm:$0xff]   ;;  %v6515_v13 = vld [vmem:[#allocation5 + $0xe4] ss:$16 sps:$4 sm:$0xff]  }
 0x235   :  { %v7573_v46 = vpack.c.bf16 %v841_v44, %v840_v43  ;;  %v773_v47 = vmul.f32 %v6409_v53, %v7469_v54  ;;  %v721_v48 = vpop.f32.mrb[29].mxu1  ;;  %1443 = vmatprep.subr.bf16.mxu1 %v5896_v41  ;;  %v877_v41 = vld [vmem:[#allocation2 + $0x78] sm:$0xff] }
 0x236   :  { %v7576_v57 = vpack.c.bf16 %v839_v52, %v838_v51  ;;  %v771_v58 = vmul.f32 %v7469_v54, %v721_v48  ;;  %v6410_v59 = vpop.f32.mrb[30].mxu1  ;;  %v5892_v43 = vcombine.high %v873_v40, %v877_v41  ;;  %v881_v44 = vld [vmem:[#allocation2 + $0x98] sm:$0xff]  ;;  %v5891_v50 = vcombine.low %v873_v40, %v877_v41  ;;  %v6519_v40 = vld [vmem:[#allocation5 + $0x100] ss:$16 sps:$4 sm:$0xff]   ;;  %v6527_v41 = vld [vmem:[#allocation5 + $0x124] ss:$16 sps:$4 sm:$0xff]  }
 0x237   :  { %v812_v62 = vadd.f32 %v7474_v56, %v773_v47  ;;  %v774_v63 = vmul.f32 %v6410_v59, %v7469_v54  ;;  %v724_v1 = vpop.f32.mrb[31].mxu1  ;;  %v5900_v51 = vcombine.high %v881_v44, %v885_v49  ;;  %v889_v52 = vld [vmem:[#allocation2 + $0xd8] sm:$0xff]  ;;  %v5899_v47 = vcombine.low %v881_v44, %v885_v49  ;;  %v6531_v44 = vld [vmem:[#allocation5 + $0x140] ss:$16 sps:$4 sm:$0xff]   ;;  %v6539_v49 = vld [vmem:[#allocation5 + $0x164] ss:$16 sps:$4 sm:$0xff]  }
 0x238   :  { %v810_v5 = vadd.f32 %v7474_v56, %v771_v58  ;;  %v772_v8 = vmul.f32 %v7469_v54, %v724_v1  ;;  %1339 = vmatmul.mubr.bf16.gmra.mrb[56].mxu0 %v7529_v38  ;;  %1399 = vmatmul.mubr.bf16.gmra.mrb[36].mxu1 %v7576_v57  ;;  %v903_v54 = vld [vmem:[#allocation2 + $0x148] sm:$0xff]  ;;  %v893_v53 = vld [vmem:[#allocation2 + $0xf8] sm:$0xff] }
 0x239   :  { %v844_v9 = vmax.f32 %v812_v62, 0.0  ;;  %v813_v16 = vadd.f32 %v7474_v56, %v774_v63  ;;  %1444 = vmatpush1.bf16.msra.mxu1 %v5895_v55  ;;  %1348 = vmatprep.mubr.bf16.mxu0 %v7073_v45  ;;  %v5920_v26 = vcombine.high %v903_v54, %v907_v10  ;;  %v5908_v48 = vcombine.high %v889_v52, %v893_v53  ;;  %v897_v55 = vld [vmem:[#allocation2 + $0x118] sm:$0xff] }
 0x23a   :  { %v842_v18 = vmax.f32 %v810_v5, 0.0  ;;  %v811_v7 = vadd.f32 %v7474_v56, %v772_v8  ;;  %1445 = vmatprep.subr.bf16.mxu1 %v5904_v60  ;;  %1408 = vmatprep.mubr.bf16.mxu1 %v7073_v45  ;;  %v5919_v56 = vcombine.low %v903_v54, %v907_v10  ;;  %v901_v58 = vld [vmem:[#allocation2 + $0x138] sm:$0xff]  ;;  %v5907_v59 = vcombine.low %v889_v52, %v893_v53  ;;  %v6471_v54 = vld [vmem:[#allocation5] ss:$16 sps:$4 sm:$0xff]   ;;  %v6476_v10 = vld [vmem:[#allocation5 + $0x24] ss:$16 sps:$4 sm:$0xff]  }
 0x23b   :  { %v845_v21 = vmax.f32 %v813_v16, 0.0  ;;  %v5916_v60 = vcombine.high %v897_v55, %v901_v58  ;;  %v905_v62 = vld [vmem:[#allocation2 + $0x158] sm:$0xff]  ;;  %v5915_v1 = vcombine.low %v897_v55, %v901_v58  ;;  %v6543_v52 = vld [vmem:[#allocation5 + $0x180] ss:$16 sps:$4 sm:$0xff]   ;;  %v6551_v53 = vld [vmem:[#allocation5 + $0x1a4] ss:$16 sps:$4 sm:$0xff]  }
 0x23c   :  { %v843_v22 = vmax.f32 %v811_v7, 0.0  ;;  %v909_v63 = vld [vmem:[#allocation2 + $0x178] sm:$0xff]  ;;  %v6555_v55 = vld [vmem:[#allocation5 + $0x1c0] ss:$16 sps:$4 sm:$0xff]   ;;  %v6563_v58 = vld [vmem:[#allocation5 + $0x1e4] ss:$16 sps:$4 sm:$0xff]  }
 0x23d   :  { %v7589_v23 = vpack.c.bf16 %v845_v21, %v844_v9  ;;  %1446 = vmatpush1.bf16.msra.mxu1 %v5903_v17  ;;  %v5924_v2 = vcombine.high %v905_v62, %v909_v63  ;;  %v917_v5 = vld [vmem:[#allocation2 + $0x1b8] sm:$0xff]  ;;  %v5923_v8 = vcombine.low %v905_v62, %v909_v63  ;;  %v6473_v21 = vld [vmem:[#allocation5 + $0x4] ss:$16 sps:$4 sm:$0xff]  }
 0x23e   :  { %v7591_v11 = vpack.c.bf16 %v843_v22, %v842_v18  ;;  %1447 = vmatprep.subr.bf16.mxu1 %v5912_v20  ;;  %v5932_v9 = vcombine.high %v913_v3, %v917_v5  ;;  %v921_v16 = vld [vmem:[#allocation2 + $0x1d8] sm:$0xff]  ;;  %v5931_v18 = vcombine.low %v913_v3, %v917_v5  ;;  %4758 = vmatprep.subr.bf16.mxu0 %v6473_v21  ;;  %v6474_v22 = vld [vmem:[#allocation5 + $0x20] ss:$16 sps:$4 sm:$0xff]  }
 0x23f   :  { %v925_v17 = vld [vmem:[#allocation2 + $0x1f8] sm:$0xff] }
 0x240   :  { %1349 = vmatmul.mubr.bf16.gmra.mrb[60].mxu0 %v7526_v34  ;;  %1409 = vmatmul.mubr.bf16.gmra.mrb[40].mxu1 %v7573_v46  ;;  %v5940_v7 = vcombine.high %v921_v16, %v925_v17  ;;  %v5939_v20 = vcombine.low %v921_v16, %v925_v17  ;;  %v6483_v3 = vld [vmem:[#allocation5 + $0x8] ss:$16 sps:$4 sm:$0xff]   ;;  %v6491_v5 = vld [vmem:[#allocation5 + $0x2c] ss:$16 sps:$4 sm:$0xff]  }
 0x241   :  { %1448 = vmatpush1.bf16.msra.mxu1 %v5911_v24  ;;  %1358 = vmatprep.mubr.bf16.mxu0 %v7073_v45  ;;  %v6479_v24 = vld [vmem:[#allocation5 + $0x44] ss:$16 sps:$4 sm:$0xff]   ;;  %v6489_v17 = vld [vmem:[#allocation5 + $0x28] ss:$16 sps:$4 sm:$0xff]  }
 0x242   :  { %1418 = vmatprep.mubr.bf16.mxu1 %v7073_v45  ;;  %1449 = vmatprep.subr.bf16.mxu1 %v5920_v26  ;;  %v6477_v26 = vld [vmem:[#allocation5 + $0x40] ss:$16 sps:$4 sm:$0xff]  }
 0x245   :  { %1450 = vmatpush1.bf16.msra.mxu1 %v5919_v56  ;;  %v6485_v56 = vld [vmem:[#allocation5 + $0xc] ss:$16 sps:$4 sm:$0xff]  }
 0x246   :  { %1451 = vmatprep.subr.bf16.mxu1 %v5928_v30  ;;  %v6488_v30 = vld [vmem:[#allocation5 + $0x84] ss:$16 sps:$4 sm:$0xff]  }
 0x248   :  { %1359 = vmatmul.mubr.bf16.gmra.mrb[64].mxu0 %v7543_v0  ;;  %1419 = vmatmul.mubr.bf16.gmra.mrb[44].mxu1 %v7591_v11 }
 0x249   :  { %1452 = vmatpush1.bf16.msra.mxu1 %v5927_v33  ;;  %1368 = vmatprep.mubr.bf16.mxu0 %v7073_v45  ;;  %v6495_v33 = vld [vmem:[#allocation5 + $0xa0] ss:$16 sps:$4 sm:$0xff]  }
 0x24a   :  { %1428 = vmatprep.mubr.bf16.mxu1 %v7073_v45  ;;  %1453 = vmatprep.subr.bf16.mxu1 %v5936_v12  ;;  %v6506_v12 = vld [vmem:[#allocation5 + $0xc4] ss:$16 sps:$4 sm:$0xff]  }
 0x24d   :  { %1454 = vmatpush1.bf16.msra.mxu1 %v5935_v36  ;;  %v6513_v36 = vld [vmem:[#allocation5 + $0xe0] ss:$16 sps:$4 sm:$0xff]  }
 0x24e   :  { %1825 = vmatprep.subr.bf16.mxu1 %v5884_v39  ;;  %v6521_v39 = vld [vmem:[#allocation5 + $0x104] ss:$16 sps:$4 sm:$0xff]  }
 0x250   :  { %1369 = vmatmul.mubr.bf16.gmra.mrb[68].mxu0 %v7540_v61  ;;  %1429 = vmatmul.mubr.bf16.gmra.mrb[48].mxu1 %v7589_v23 }
 0x251   :  { %1378 = vmatprep.mubr.bf16.mxu0 %v7073_v45  ;;  %1471 = vmatprep.mubr.bf16.mxu1 %v7073_v45 }
 0x258   :  { %1379 = vmatmul.mubr.bf16.gmra.mrb[72].mxu0 %v7557_v28  ;;  %1472 = vmatmul.mubr.bf16.vlgmr.msra.gmra.mrb[52].mxu1 %v7487_v19 }
 0x259   :  { %1826 = vmatpush1.bf16.msra.mxu1 %v5883_v42  ;;  %1481 = vmatprep.mubr.bf16.mxu1 %v7073_v45  ;;  %v6525_v42 = vld [vmem:[#allocation5 + $0x120] ss:$16 sps:$4 sm:$0xff]  }
 0x25a   :  { %1664 = vmatprep.mubr.bf16.mxu0 %v7073_v45  ;;  %1827 = vmatprep.subr.bf16.mxu1 %v5892_v43  ;;  %v6533_v43 = vld [vmem:[#allocation5 + $0x144] ss:$16 sps:$4 sm:$0xff]  }
 0x25d   :  { %1828 = vmatpush1.bf16.msra.mxu1 %v5891_v50  ;;  %v6537_v50 = vld [vmem:[#allocation5 + $0x160] ss:$16 sps:$4 sm:$0xff]  }
 0x25e   :  { %1829 = vmatprep.subr.bf16.mxu1 %v5900_v51  ;;  %v6545_v51 = vld [vmem:[#allocation5 + $0x184] ss:$16 sps:$4 sm:$0xff]  }
 0x260   :  { %1482 = vmatmul.mubr.bf16.gmra.mrb[56].mxu1 %v7484_v6  ;;  %1665 = vmatmul.mubr.bf16.vlgmr.msra.gmra.mrb[76].mxu0 %v7487_v19 }
 0x261   :  { %1491 = vmatprep.mubr.bf16.mxu1 %v7073_v45  ;;  %1674 = vmatprep.mubr.bf16.mxu0 %v7073_v45 }
 0x262   :  { %1830 = vmatpush1.bf16.msra.mxu1 %v5899_v47  ;;  %4759 = vmatpush1.bf16.msra.mxu0 %v6471_v54  ;;  %v6549_v47 = vld [vmem:[#allocation5 + $0x1a0] ss:$16 sps:$4 sm:$0xff]  }
 0x263   :  { %1831 = vmatprep.subr.bf16.mxu1 %v5908_v48  ;;  %4760 = vmatprep.subr.bf16.mxu0 %v6476_v10  ;;  %v6557_v48 = vld [vmem:[#allocation5 + $0x1c4] ss:$16 sps:$4 sm:$0xff]  }
 0x266   :  { %1832 = vmatpush1.bf16.msra.mxu1 %v5907_v59  ;;  %4761 = vmatpush1.bf16.msra.mxu0 %v6474_v22  ;;  %v6561_v59 = vld [vmem:[#allocation5 + $0x1e0] ss:$16 sps:$4 sm:$0xff]  }
 0x267   :  { %1833 = vmatprep.subr.bf16.mxu1 %v5916_v60  ;;  %4762 = vmatprep.subr.bf16.mxu0 %v6479_v24  ;;  %v2020_v60 = vlaneseq  ;;  %v6492_v24 = vld [vmem:[#allocation5 + $0x48] ss:$16 sps:$4 sm:$0xff]  }
 0x268   :  { %1492 = vmatmul.mubr.bf16.gmra.mrb[60].mxu1 %v7501_v15  ;;  %1675 = vmatmul.mubr.bf16.gmra.mrb[80].mxu0 %v7484_v6 }
 0x269   :  { %1501 = vmatprep.mubr.bf16.mxu1 %v7073_v45  ;;  %1684 = vmatprep.mubr.bf16.mxu0 %v7073_v45  ;;  %v7667_v62 = vshrl.u32 %v2020_v60, 7 }
 0x26a   :  { %1834 = vmatpush1.bf16.msra.mxu1 %v5915_v1  ;;  %4763 = vmatpush1.bf16.msra.mxu0 %v6477_v26  ;;  %v7677_v1 = vld [vmem:[%s8625_s8] sm:$0xff] }
 0x26b   :  { %1835 = vmatprep.subr.bf16.mxu1 %v5924_v2  ;;  %4764 = vmatprep.subr.bf16.mxu0 %v6482_v27  ;;  %v7672_v63 = vsub.s32 0, %v7667_v62  ;;  %v7680_v2 = vsub.s32 1, %v7667_v62 }
 0x26d   :  { %v7695_v16 = vrot.slane %v7677_v1, %v7680_v2 }
 0x26e   :  { %1836 = vmatpush1.bf16.msra.mxu1 %v5923_v8  ;;  %4765 = vmatpush1.bf16.msra.mxu0 %v6480_v29  ;;  %v7685_v8 = vld [vmem:[%s8626_s9] sm:$0xff] }
 0x26f   :  { %1837 = vmatprep.subr.bf16.mxu1 %v5932_v9  ;;  %4766 = vmatprep.subr.bf16.mxu0 %v6488_v30  ;;  %v7691_v9 = vrot.slane %v7677_v1, %v7672_v63 }
 0x270   :  { %1502 = vmatmul.mubr.bf16.gmra.mrb[64].mxu1 %v7498_v37  ;;  %1685 = vmatmul.mubr.bf16.gmra.mrb[84].mxu0 %v7501_v15 }
 0x271   :  { %1511 = vmatprep.mubr.bf16.mxu1 %v7073_v45  ;;  %1694 = vmatprep.mubr.bf16.mxu0 %v7073_v45 }
 0x272   :  { %1838 = vmatpush1.bf16.msra.mxu1 %v5931_v18  ;;  %4767 = vmatpush1.bf16.msra.mxu0 %v6486_v31  ;;  %v7700_v18 = vrot.slane %v7685_v8, %v7672_v63 }
 0x273   :  { %1839 = vmatprep.subr.bf16.mxu1 %v5940_v7  ;;  %4768 = vmatprep.subr.bf16.mxu0 %v6497_v32  ;;  %v6494_v7 = vld [vmem:[#allocation5 + $0x4c] ss:$16 sps:$4 sm:$0xff]  }
 0x276   :  { %1840 = vmatpush1.bf16.msra.mxu1 %v5939_v20  ;;  %4769 = vmatpush1.bf16.msra.mxu0 %v6495_v33 }
 0x277   :  { %4922 = vmatprep.subr.bf16.mxu1 %v6485_v56  ;;  %4770 = vmatprep.subr.bf16.mxu0 %v6506_v12  ;;  %v6500_v56 = vld [vmem:[#allocation5 + $0x6c] ss:$16 sps:$4 sm:$0xff]   ;;  %v6498_v12 = vld [vmem:[#allocation5 + $0x68] ss:$16 sps:$4 sm:$0xff]  }
 0x278   :  { %1512 = vmatmul.mubr.bf16.gmra.mrb[68].mxu1 %v7515_v14  ;;  %1695 = vmatmul.mubr.bf16.gmra.mrb[88].mxu0 %v7498_v37 }
 0x279   :  { %1521 = vmatprep.mubr.bf16.mxu1 %v7073_v45  ;;  %1704 = vmatprep.mubr.bf16.mxu0 %v7073_v45 }
 0x27a   :  { %4771 = vmatpush1.bf16.msra.mxu0 %v6504_v35 }
 0x27b   :  { %4772 = vmatprep.subr.bf16.mxu0 %v6515_v13 }
 0x27e   :  { %4773 = vmatpush1.bf16.msra.mxu0 %v6513_v36  ;;  %v6503_v36 = vld [vmem:[#allocation5 + $0x8c] ss:$16 sps:$4 sm:$0xff]  }
 0x27f   :  { %4774 = vmatprep.subr.bf16.mxu0 %v6521_v39 }
 0x280   :  { %1522 = vmatmul.mubr.bf16.gmra.mrb[72].mxu1 %v7512_v4  ;;  %1705 = vmatmul.mubr.bf16.gmra.mrb[92].mxu0 %v7515_v14 }
 0x281   :  { %1531 = vmatprep.mubr.bf16.mxu1 %v7073_v45  ;;  %1714 = vmatprep.mubr.bf16.mxu0 %v7073_v45 }
 0x282   :  { %4775 = vmatpush1.bf16.msra.mxu0 %v6519_v40 }
 0x283   :  { %4776 = vmatprep.subr.bf16.mxu0 %v6527_v41 }
 0x286   :  { %4777 = vmatpush1.bf16.msra.mxu0 %v6525_v42 }
 0x287   :  { %4778 = vmatprep.subr.bf16.mxu0 %v6533_v43 }
 0x288   :  { %1532 = vmatmul.mubr.bf16.gmra.mrb[76].mxu1 %v7529_v38  ;;  %1715 = vmatmul.mubr.bf16.gmra.mrb[96].mxu0 %v7512_v4 }
 0x289   :  { %1541 = vmatprep.mubr.bf16.mxu1 %v7073_v45  ;;  %1724 = vmatprep.mubr.bf16.mxu0 %v7073_v45 }
 0x28a   :  { %4779 = vmatpush1.bf16.msra.mxu0 %v6531_v44 }
 0x28b   :  { %4780 = vmatprep.subr.bf16.mxu0 %v6539_v49 }
 0x28e   :  { %4781 = vmatpush1.bf16.msra.mxu0 %v6537_v50 }
 0x28f   :  { %4782 = vmatprep.subr.bf16.mxu0 %v6545_v51  ;;  %v6501_v51 = vld [vmem:[#allocation5 + $0x88] ss:$16 sps:$4 sm:$0xff]  }
 0x290   :  { %1542 = vmatmul.mubr.bf16.gmra.mrb[80].mxu1 %v7526_v34  ;;  %1725 = vmatmul.mubr.bf16.gmra.mrb[100].mxu0 %v7529_v38 }
 0x291   :  { %1551 = vmatprep.mubr.bf16.mxu1 %v7073_v45  ;;  %1734 = vmatprep.mubr.bf16.mxu0 %v7073_v45 }
 0x292   :  { %4783 = vmatpush1.bf16.msra.mxu0 %v6543_v52 }
 0x293   :  { %4784 = vmatprep.subr.bf16.mxu0 %v6551_v53 }
 0x296   :  { %4785 = vmatpush1.bf16.msra.mxu0 %v6549_v47 }
 0x297   :  { %4786 = vmatprep.subr.bf16.mxu0 %v6557_v48  ;;  %v6509_v48 = vld [vmem:[#allocation5 + $0xac] ss:$16 sps:$4 sm:$0xff]  }
 0x298   :  { %1552 = vmatmul.mubr.bf16.gmra.mrb[84].mxu1 %v7543_v0  ;;  %1735 = vmatmul.mubr.bf16.gmra.mrb[104].mxu0 %v7526_v34 }
 0x299   :  { %1561 = vmatprep.mubr.bf16.mxu1 %v7073_v45  ;;  %1744 = vmatprep.mubr.bf16.mxu0 %v7073_v45 }
 0x29a   :  { %4787 = vmatpush1.bf16.msra.mxu0 %v6555_v55 }
 0x29b   :  { %4788 = vmatprep.subr.bf16.mxu0 %v6563_v58 }
 0x29e   :  { %4789 = vmatpush1.bf16.msra.mxu0 %v6561_v59 }
 0x2a0   :  { %1562 = vmatmul.mubr.bf16.gmra.mrb[88].mxu1 %v7540_v61  ;;  %1745 = vmatmul.mubr.bf16.gmra.mrb[108].mxu0 %v7543_v0 }
 0x2a1   :  { %1571 = vmatprep.mubr.bf16.mxu1 %v7073_v45  ;;  %1754 = vmatprep.mubr.bf16.mxu0 %v7073_v45 }
 0x2a8   :  { %1572 = vmatmul.mubr.bf16.gmra.mrb[92].mxu1 %v7557_v28  ;;  %1755 = vmatmul.mubr.bf16.gmra.mrb[112].mxu0 %v7540_v61 }
 0x2a9   :  { %1581 = vmatprep.mubr.bf16.mxu1 %v7073_v45  ;;  %1764 = vmatprep.mubr.bf16.mxu0 %v7073_v45 }
 0x2b0   :  { %1582 = vmatmul.mubr.bf16.gmra.mrb[96].mxu1 %v7554_v25  ;;  %1765 = vmatmul.mubr.bf16.gmra.mrb[116].mxu0 %v7557_v28 }
 0x2b1   :  { %1591 = vmatprep.mubr.bf16.mxu1 %v7073_v45  ;;  %1774 = vmatprep.mubr.bf16.mxu0 %v7073_v45 }
 0x2b8   :  { %1592 = vmatmul.mubr.bf16.gmra.mrb[100].mxu1 %v7576_v57  ;;  %1775 = vmatmul.mubr.bf16.gmra.mrb[120].mxu0 %v7554_v25 }
 0x2b9   :  { %1601 = vmatprep.mubr.bf16.mxu1 %v7073_v45  ;;  %1784 = vmatprep.mubr.bf16.mxu0 %v7073_v45 }
 0x2c0   :  { %1602 = vmatmul.mubr.bf16.gmra.mrb[104].mxu1 %v7573_v46  ;;  %1785 = vmatmul.mubr.bf16.gmra.mrb[124].mxu0 %v7576_v57 }
 0x2c1   :  { %1611 = vmatprep.mubr.bf16.mxu1 %v7073_v45  ;;  %1794 = vmatprep.mubr.bf16.mxu0 %v7073_v45 }
 0x2c8   :  { %1612 = vmatmul.mubr.bf16.gmra.mrb[108].mxu1 %v7591_v11  ;;  %1795 = vmatmul.mubr.bf16.gmra.mrb[128].mxu0 %v7573_v46 }
 0x2c9   :  { %1621 = vmatprep.mubr.bf16.mxu1 %v7073_v45  ;;  %1804 = vmatprep.mubr.bf16.mxu0 %v7073_v45 }
 0x2d0   :  { %1622 = vmatmul.mubr.bf16.gmra.mrb[112].mxu1 %v7589_v23  ;;  %1805 = vmatmul.mubr.bf16.gmra.mrb[132].mxu0 %v7591_v11 }
 0x2d1   :  { %1814 = vmatprep.mubr.bf16.mxu0 %v7073_v45  ;;  %1857 = vmatprep.mubr.bf16.mxu1 %v7073_v45 }
 0x2d8   :  { %1815 = vmatmul.mubr.bf16.gmra.mrb[136].mxu0 %v7589_v23  ;;  %1858 = vmatmul.mubr.bf16.vlgmr.msra.gmra.mrb[116].mxu1 %v7487_v19  ;;  %v7704_v19 = vrot.slane %v7685_v8, %v7680_v2 }
 0x2d9   :  { %1867 = vmatprep.mubr.bf16.mxu1 %v7073_v45  ;;  %4923 = vmatpush1.bf16.msra.mxu1 %v6483_v3 }
 0x2da   :  { %4924 = vmatprep.subr.bf16.mxu1 %v6491_v5 }
 0x2db   :  { %v1280_v20 = vpop.f32.mrb[32].mxu0 }
 0x2dc   :  { %v2060_v21 = vmul.f32 %v7691_v9, %v1280_v20  ;;  %v1282_v54 = vpop.f32.mrb[33].mxu0 }
 0x2dd   :  { %v2061_v10 = vmul.f32 %v7695_v16, %v1282_v54  ;;  %v1284_v22 = vpop.f32.mrb[34].mxu0  ;;  %4925 = vmatpush1.bf16.msra.mxu1 %v6489_v17  ;;  %v6507_v17 = vld [vmem:[#allocation5 + $0xa8] ss:$16 sps:$4 sm:$0xff]  }
 0x2de   :  { %v2358_v26 = vadd.f32 %v7700_v18, %v2060_v21  ;;  %v2068_v27 = vmul.f32 %v7691_v9, %v1284_v22  ;;  %v1286_v29 = vpop.f32.mrb[35].mxu0  ;;  %4926 = vmatprep.subr.bf16.mxu1 %v6494_v7  ;;  %v6512_v21 = vld [vmem:[#allocation5 + $0xcc] ss:$16 sps:$4 sm:$0xff]  }
 0x2df   :  { %v2359_v30 = vadd.f32 %v7704_v19, %v2061_v10  ;;  %v2069_v31 = vmul.f32 %v7695_v16, %v1286_v29 }
 0x2e0   :  { %v2366_v32 = vadd.f32 %v7700_v18, %v2068_v27  ;;  %1868 = vmatmul.mubr.bf16.gmra.mrb[120].mxu1 %v7484_v6  ;;  %v2614_v35 = vmax.f32 %v2358_v26, 0.0 }
 0x2e1   :  { %v2367_v33 = vadd.f32 %v7704_v19, %v2069_v31  ;;  %1877 = vmatprep.mubr.bf16.mxu1 %v7073_v45  ;;  %4927 = vmatpush1.bf16.msra.mxu1 %v6492_v24  ;;  %v2615_v39 = vmax.f32 %v2359_v30, 0.0  ;;  %v6510_v30 = vld [vmem:[#allocation5 + $0xc8] ss:$16 sps:$4 sm:$0xff]  }
 0x2e2   :  { %v2622_v13 = vmax.f32 %v2366_v32, 0.0  ;;  %4928 = vmatprep.subr.bf16.mxu1 %v6500_v56 }
 0x2e3   :  { %v2623_v40 = vmax.f32 %v2367_v33, 0.0  ;;  %v1290_v41 = vpop.f32.mrb[36].mxu0 }
 0x2e4   :  { %v2870_v42 = vmax.f32 %v2614_v35, %v2622_v13  ;;  %v2076_v43 = vmul.f32 %v7691_v9, %v1290_v41  ;;  %v1292_v44 = vpop.f32.mrb[37].mxu0 }
 0x2e5   :  { %v2891_v49 = vmax.f32 %v2615_v39, %v2623_v40  ;;  %v2077_v6 = vmul.f32 %v7695_v16, %v1292_v44  ;;  %v1294_v50 = vpop.f32.mrb[38].mxu0  ;;  %4929 = vmatpush1.bf16.msra.mxu1 %v6498_v12  ;;  %v6518_v12 = vld [vmem:[#allocation5 + $0xec] ss:$16 sps:$4 sm:$0xff]  }
 0x2e6   :  { %v2374_v52 = vadd.f32 %v7700_v18, %v2076_v43  ;;  %v2084_v53 = vmul.f32 %v7691_v9, %v1294_v50  ;;  %v1296_v47 = vpop.f32.mrb[39].mxu0  ;;  %4930 = vmatprep.subr.bf16.mxu1 %v6503_v36 }
 0x2e7   :  { %v2375_v55 = vadd.f32 %v7704_v19, %v2077_v6  ;;  %v2085_v58 = vmul.f32 %v7695_v16, %v1296_v47 }
 0x2e8   :  { %v2630_v59 = vmax.f32 %v2374_v52, 0.0  ;;  %v2382_v60 = vadd.f32 %v7700_v18, %v2084_v53  ;;  %1878 = vmatmul.mubr.bf16.gmra.mrb[124].mxu1 %v7501_v15 }
 0x2e9   :  { %v2631_v3 = vmax.f32 %v2375_v55, 0.0  ;;  %v2383_v5 = vadd.f32 %v7704_v19, %v2085_v58  ;;  %1887 = vmatprep.mubr.bf16.mxu1 %v7073_v45  ;;  %4931 = vmatpush1.bf16.msra.mxu1 %v6501_v51  ;;  %v6522_v58 = vld [vmem:[#allocation5 + $0x108] ss:$16 sps:$4 sm:$0xff]  }
 0x2ea   :  { %v2871_v7 = vmax.f32 %v2870_v42, %v2630_v59  ;;  %v2638_v20 = vmax.f32 %v2382_v60, 0.0  ;;  %4932 = vmatprep.subr.bf16.mxu1 %v6509_v48  ;;  %v6516_v42 = vld [vmem:[#allocation5 + $0xe8] ss:$16 sps:$4 sm:$0xff]  }
 0x2eb   :  { %v2892_v54 = vmax.f32 %v2891_v49, %v2631_v3  ;;  %v2639_v10 = vmax.f32 %v2383_v5, 0.0  ;;  %v1300_v22 = vpop.f32.mrb[40].mxu0  ;;  %v6524_v49 = vld [vmem:[#allocation5 + $0x10c] ss:$16 sps:$4 sm:$0xff]  }
 0x2ec   :  { %v2872_v24 = vmax.f32 %v2871_v7, %v2638_v20  ;;  %v2092_v26 = vmul.f32 %v7691_v9, %v1300_v22  ;;  %v1302_v27 = vpop.f32.mrb[41].mxu0  ;;  %v6530_v5 = vld [vmem:[#allocation5 + $0x12c] ss:$16 sps:$4 sm:$0xff]   ;;  %v6528_v22 = vld [vmem:[#allocation5 + $0x128] ss:$16 sps:$4 sm:$0xff]  }
 0x2ed   :  { %v2893_v29 = vmax.f32 %v2892_v54, %v2639_v10  ;;  %v2093_v15 = vmul.f32 %v7695_v16, %v1302_v27  ;;  %v1304_v56 = vpop.f32.mrb[42].mxu0  ;;  %4933 = vmatpush1.bf16.msra.mxu1 %v6507_v17  ;;  %v6536_v27 = vld [vmem:[#allocation5 + $0x14c] ss:$16 sps:$4 sm:$0xff]  }
 0x2ee   :  { %v2390_v31 = vadd.f32 %v7700_v18, %v2092_v26  ;;  %v2100_v32 = vmul.f32 %v7691_v9, %v1304_v56  ;;  %v1306_v33 = vpop.f32.mrb[43].mxu0  ;;  %4934 = vmatprep.subr.bf16.mxu1 %v6512_v21 }
 0x2ef   :  { %v2391_v35 = vadd.f32 %v7704_v19, %v2093_v15  ;;  %v2101_v13 = vmul.f32 %v7695_v16, %v1306_v33 }
 0x2f0   :  { %v2646_v36 = vmax.f32 %v2390_v31, 0.0  ;;  %v2398_v39 = vadd.f32 %v7700_v18, %v2100_v32  ;;  %1888 = vmatmul.mubr.bf16.gmra.mrb[128].mxu1 %v7498_v37 }
 0x2f1   :  { %v2647_v40 = vmax.f32 %v2391_v35, 0.0  ;;  %v2399_v41 = vadd.f32 %v7704_v19, %v2101_v13  ;;  %1897 = vmatprep.mubr.bf16.mxu1 %v7073_v45  ;;  %4935 = vmatpush1.bf16.msra.mxu1 %v6510_v30  ;;  %v7749_v35 = vsub.s32 2, %v7667_v62  ;;  %v7752_v13 = vsub.s32 3, %v7667_v62 }
 0x2f2   :  { %v2873_v43 = vmax.f32 %v2872_v24, %v2646_v36  ;;  %v2654_v44 = vmax.f32 %v2398_v39, 0.0  ;;  %4936 = vmatprep.subr.bf16.mxu1 %v6518_v12  ;;  %v6534_v36 = vld [vmem:[#allocation5 + $0x148] ss:$16 sps:$4 sm:$0xff]  }
 0x2f3   :  { %v2894_v6 = vmax.f32 %v2893_v29, %v2647_v40  ;;  %v2655_v50 = vmax.f32 %v2399_v41, 0.0  ;;  %v1310_v51 = vpop.f32.mrb[44].mxu0 }
 0x2f4   :  { %v2874_v52 = vmax.f32 %v2873_v43, %v2654_v44  ;;  %v2108_v53 = vmul.f32 %v7691_v9, %v1310_v51  ;;  %v1312_v47 = vpop.f32.mrb[45].mxu0 }
 0x2f5   :  { %v2895_v48 = vmax.f32 %v2894_v6, %v2655_v50  ;;  %v2109_v37 = vmul.f32 %v7695_v16, %v1312_v47  ;;  %v1314_v55 = vpop.f32.mrb[46].mxu0  ;;  %4937 = vmatpush1.bf16.msra.mxu1 %v6516_v42  ;;  %v6542_v42 = vld [vmem:[#allocation5 + $0x16c] ss:$16 sps:$4 sm:$0xff]   ;;  %v6540_v47 = vld [vmem:[#allocation5 + $0x168] ss:$16 sps:$4 sm:$0xff]  }
 0x2f6   :  { %v2406_v59 = vadd.f32 %v7700_v18, %v2108_v53  ;;  %v2116_v60 = vmul.f32 %v7691_v9, %v1314_v55  ;;  %v1316_v3 = vpop.f32.mrb[47].mxu0  ;;  %4938 = vmatprep.subr.bf16.mxu1 %v6524_v49  ;;  %v7768_v53 = vrot.slane %v7677_v1, %v7752_v13 }
 0x2f7   :  { %v2407_v17 = vadd.f32 %v7704_v19, %v2109_v37  ;;  %v2117_v7 = vmul.f32 %v7695_v16, %v1316_v3 }
 0x2f8   :  { %v2662_v20 = vmax.f32 %v2406_v59, 0.0  ;;  %v2414_v21 = vadd.f32 %v7700_v18, %v2116_v60  ;;  %1898 = vmatmul.mubr.bf16.gmra.mrb[132].mxu1 %v7515_v14  ;;  %v6548_v59 = vld [vmem:[#allocation5 + $0x18c] ss:$16 sps:$4 sm:$0xff]  }
 0x2f9   :  { %v2663_v54 = vmax.f32 %v2407_v17, 0.0  ;;  %v2415_v10 = vadd.f32 %v7704_v19, %v2117_v7  ;;  %1907 = vmatprep.mubr.bf16.mxu1 %v7073_v45  ;;  %4939 = vmatpush1.bf16.msra.mxu1 %v6522_v58  ;;  %v7776_v58 = vrot.slane %v7685_v8, %v7752_v13 }
 0x2fa   :  { %v2875_v24 = vmax.f32 %v2874_v52, %v2662_v20  ;;  %v2670_v26 = vmax.f32 %v2414_v21, 0.0  ;;  %4940 = vmatprep.subr.bf16.mxu1 %v6530_v5  ;;  %v7764_v52 = vrot.slane %v7677_v1, %v7749_v35  ;;  %v2038_v20 = vsub.s32 4, %v7667_v62 }
 0x2fb   :  { %v2896_v29 = vmax.f32 %v2895_v48, %v2663_v54  ;;  %v2671_v15 = vmax.f32 %v2415_v10, 0.0  ;;  %v1320_v56 = vpop.f32.mrb[48].mxu0 }
 0x2fc   :  { %v2876_v30 = vmax.f32 %v2875_v24, %v2670_v26  ;;  %v2124_v31 = vmul.f32 %v7691_v9, %v1320_v56  ;;  %v1322_v32 = vpop.f32.mrb[49].mxu0  ;;  %v2042_v26 = vsub.s32 5, %v7667_v62 }
 0x2fd   :  { %v2897_v33 = vmax.f32 %v2896_v29, %v2671_v15  ;;  %v2125_v14 = vmul.f32 %v7695_v16, %v1322_v32  ;;  %v1324_v12 = vpop.f32.mrb[50].mxu0  ;;  %4941 = vmatpush1.bf16.msra.mxu1 %v6528_v22  ;;  %v6546_v32 = vld [vmem:[#allocation5 + $0x188] ss:$16 sps:$4 sm:$0xff]  }
 0x2fe   :  { %v2422_v39 = vadd.f32 %v7700_v18, %v2124_v31  ;;  %v2132_v40 = vmul.f32 %v7691_v9, %v1324_v12  ;;  %v1326_v41 = vpop.f32.mrb[51].mxu0  ;;  %4942 = vmatprep.subr.bf16.mxu1 %v6536_v27 }
 0x2ff   :  { %v2423_v43 = vadd.f32 %v7704_v19, %v2125_v14  ;;  %v2133_v44 = vmul.f32 %v7695_v16, %v1326_v41 }
 0x300   :  { %v2678_v49 = vmax.f32 %v2422_v39, 0.0  ;;  %v2430_v6 = vadd.f32 %v7700_v18, %v2132_v40  ;;  %1908 = vmatmul.mubr.bf16.gmra.mrb[136].mxu1 %v7512_v4  ;;  %v7772_v4 = vrot.slane %v7685_v8, %v7749_v35  ;;  %v6554_v40 = vld [vmem:[#allocation5 + $0x1ac] ss:$16 sps:$4 sm:$0xff]  }
 0x301   :  { %v2679_v50 = vmax.f32 %v2423_v43, 0.0  ;;  %v2431_v51 = vadd.f32 %v7704_v19, %v2133_v44  ;;  %1917 = vmatprep.mubr.bf16.mxu1 %v7073_v45  ;;  %4943 = vmatpush1.bf16.msra.mxu1 %v6534_v36  ;;  %v7794_v44 = vrot.slane %v7677_v1, %v2038_v20 }
 0x302   :  { %v2877_v48 = vmax.f32 %v2876_v30, %v2678_v49  ;;  %v2686_v37 = vmax.f32 %v2430_v6, 0.0  ;;  %v1390_v55 = vpop.f32.mrb[32].mxu1  ;;  %4944 = vmatprep.subr.bf16.mxu1 %v6542_v42 }
 0x303   :  { %v2898_v60 = vmax.f32 %v2897_v33, %v2679_v50  ;;  %v2687_v3 = vmax.f32 %v2431_v51, 0.0  ;;  %v2236_v5 = vmul.f32 %v7691_v9, %v1390_v55  ;;  %v1330_v17 = vpop.f32.mrb[52].mxu0  ;;  %v1392_v7 = vpop.f32.mrb[33].mxu1  ;;  %v7800_v51 = vrot.slane %v7677_v1, %v2042_v26 }
 0x304   :  { %v2878_v21 = vmax.f32 %v2877_v48, %v2686_v37  ;;  %v2140_v54 = vmul.f32 %v7691_v9, %v1330_v17  ;;  %v2237_v10 = vmul.f32 %v7695_v16, %v1392_v7  ;;  %v1332_v22 = vpop.f32.mrb[53].mxu0  ;;  %v1394_v24 = vpop.f32.mrb[34].mxu1  ;;  %v6560_v7 = vld [vmem:[#allocation5 + $0x1cc] ss:$16 sps:$4 sm:$0xff]  }
 0x305   :  { %v2899_v27 = vmax.f32 %v2898_v60, %v2687_v3  ;;  %v2534_v29 = vadd.f32 %v7700_v18, %v2236_v5  ;;  %v2141_v15 = vmul.f32 %v7695_v16, %v1332_v22  ;;  %v2244_v56 = vmul.f32 %v7691_v9, %v1394_v24  ;;  %v1334_v30 = vpop.f32.mrb[54].mxu0  ;;  %v1396_v31 = vpop.f32.mrb[35].mxu1  ;;  %4945 = vmatpush1.bf16.msra.mxu1 %v6540_v47 }
 0x306   :  { %v2438_v33 = vadd.f32 %v7700_v18, %v2140_v54  ;;  %v2535_v14 = vadd.f32 %v7704_v19, %v2237_v10  ;;  %v2148_v12 = vmul.f32 %v7691_v9, %v1334_v30  ;;  %v2245_v36 = vmul.f32 %v7695_v16, %v1396_v31  ;;  %v1336_v39 = vpop.f32.mrb[55].mxu0  ;;  %4946 = vmatprep.subr.bf16.mxu1 %v6548_v59  ;;  %v6552_v59 = vld [vmem:[#allocation5 + $0x1a8] ss:$16 sps:$4 sm:$0xff]  }
 0x307   :  { %v2439_v41 = vadd.f32 %v7704_v19, %v2141_v15  ;;  %v2542_v42 = vadd.f32 %v7700_v18, %v2244_v56  ;;  %v2149_v43 = vmul.f32 %v7695_v16, %v1336_v39  ;;  %v2790_v47 = vmax.f32 %v2534_v29, 0.0 }
 0x308   :  { %v2694_v49 = vmax.f32 %v2438_v33, 0.0  ;;  %v2446_v6 = vadd.f32 %v7700_v18, %v2148_v12  ;;  %v2543_v50 = vadd.f32 %v7704_v19, %v2245_v36  ;;  %1918 = vmatmul.mubr.bf16.gmra.mrb[140].mxu1 %v7529_v38  ;;  %v2791_v3 = vmax.f32 %v2535_v14, 0.0 }
 0x309   :  { %v2695_v48 = vmax.f32 %v2439_v41, 0.0  ;;  %v2798_v37 = vmax.f32 %v2542_v42, 0.0  ;;  %v2447_v55 = vadd.f32 %v7704_v19, %v2149_v43  ;;  %1927 = vmatprep.mubr.bf16.mxu1 %v7073_v45  ;;  %4947 = vmatpush1.bf16.msra.mxu1 %v6546_v32  ;;  %v7805_v24 = vrot.slane %v7685_v8, %v2038_v20  ;;  %v6558_v20 = vld [vmem:[#allocation5 + $0x1c8] ss:$16 sps:$4 sm:$0xff]  }
 0x30a   :  { %v2879_v60 = vmax.f32 %v2878_v21, %v2694_v49  ;;  %v2702_v5 = vmax.f32 %v2446_v6, 0.0  ;;  %v2799_v17 = vmax.f32 %v2543_v50, 0.0  ;;  %4948 = vmatprep.subr.bf16.mxu1 %v6554_v40  ;;  %v7812_v36 = vrot.slane %v7685_v8, %v2042_v26  ;;  %v6566_v6 = vld [vmem:[#allocation5 + $0x1ec] ss:$16 sps:$4 sm:$0xff]  }
 0x30b   :  { %v2900_v54 = vmax.f32 %v2899_v27, %v2695_v48  ;;  %v3043_v38 = vmax.f32 %v2798_v37, %v2790_v47  ;;  %v2703_v10 = vmax.f32 %v2447_v55, 0.0  ;;  %v1340_v1 = vpop.f32.mrb[56].mxu0  ;;  %v1400_v22 = vpop.f32.mrb[36].mxu1 }
 0x30c   :  { %v2880_v29 = vmax.f32 %v2879_v60, %v2702_v5  ;;  %v3064_v15 = vmax.f32 %v2799_v17, %v2791_v3  ;;  %v2156_v56 = vmul.f32 %v7691_v9, %v1340_v1  ;;  %v2252_v30 = vmul.f32 %v7691_v9, %v1400_v22  ;;  %v1342_v21 = vpop.f32.mrb[57].mxu0  ;;  %v1402_v31 = vpop.f32.mrb[37].mxu1 }
 0x30d   :  { %v2901_v32 = vmax.f32 %v2900_v54, %v2703_v10  ;;  %v2157_v33 = vmul.f32 %v7695_v16, %v1342_v21  ;;  %v2253_v27 = vmul.f32 %v7695_v16, %v1402_v31  ;;  %v1344_v14 = vpop.f32.mrb[58].mxu0  ;;  %v1404_v12 = vpop.f32.mrb[38].mxu1  ;;  %4949 = vmatpush1.bf16.msra.mxu1 %v6552_v59  ;;  %v6569_v54 = vld [vmem:[#allocation5 + $0x204] ss:$16 sps:$4 sm:$0xff]  }
 0x30e   :  { %v2454_v39 = vadd.f32 %v7700_v18, %v2156_v56  ;;  %v2550_v40 = vadd.f32 %v7700_v18, %v2252_v30  ;;  %v2164_v41 = vmul.f32 %v7691_v9, %v1344_v14  ;;  %v2260_v42 = vmul.f32 %v7691_v9, %v1404_v12  ;;  %v1346_v43 = vpop.f32.mrb[59].mxu0  ;;  %v1406_v49 = vpop.f32.mrb[39].mxu1  ;;  %4950 = vmatprep.subr.bf16.mxu1 %v6560_v7  ;;  %v6564_v7 = vld [vmem:[#allocation5 + $0x1e8] ss:$16 sps:$4 sm:$0xff]   ;;  %v6572_v30 = vld [vmem:[#allocation5 + $0x20c] ss:$16 sps:$4 sm:$0xff]  }
 0x30f   :  { %v2455_v50 = vadd.f32 %v7704_v19, %v2157_v33  ;;  %v2551_v47 = vadd.f32 %v7704_v19, %v2253_v27  ;;  %v2165_v8 = vmul.f32 %v7695_v16, %v1346_v43  ;;  %v2261_v26 = vmul.f32 %v7695_v16, %v1406_v49  ;;  %4799 = vmatprep.subr.bf16.mxu0 %v6569_v54 }
 0x310   :  { %v2710_v48 = vmax.f32 %v2454_v39, 0.0  ;;  %v2806_v37 = vmax.f32 %v2550_v40, 0.0  ;;  %v2462_v55 = vadd.f32 %v7700_v18, %v2164_v41  ;;  %v2558_v59 = vadd.f32 %v7700_v18, %v2260_v42  ;;  %1928 = vmatmul.mubr.bf16.gmra.mrb[144].mxu1 %v7526_v34 }
 0x311   :  { %v2711_v60 = vmax.f32 %v2455_v50, 0.0  ;;  %v2807_v3 = vmax.f32 %v2551_v47, 0.0  ;;  %v2463_v5 = vadd.f32 %v7704_v19, %v2165_v8  ;;  %v2559_v17 = vadd.f32 %v7704_v19, %v2261_v26  ;;  %1937 = vmatprep.mubr.bf16.mxu1 %v7073_v45  ;;  %4951 = vmatpush1.bf16.msra.mxu1 %v6558_v20 }
 0x312   :  { %v2881_v10 = vmax.f32 %v2880_v29, %v2710_v48  ;;  %v3044_v1 = vmax.f32 %v3043_v38, %v2806_v37  ;;  %v2718_v22 = vmax.f32 %v2462_v55, 0.0  ;;  %v2814_v56 = vmax.f32 %v2558_v59, 0.0  ;;  %4952 = vmatprep.subr.bf16.mxu1 %v6566_v6 }
 0x313   :  { %v2902_v21 = vmax.f32 %v2901_v32, %v2711_v60  ;;  %v3065_v31 = vmax.f32 %v3064_v15, %v2807_v3  ;;  %v2719_v34 = vmax.f32 %v2463_v5, 0.0  ;;  %v2815_v33 = vmax.f32 %v2559_v17, 0.0  ;;  %v1350_v27 = vpop.f32.mrb[60].mxu0  ;;  %v1410_v14 = vpop.f32.mrb[40].mxu1 }
 0x314   :  { %v2882_v12 = vmax.f32 %v2881_v10, %v2718_v22  ;;  %v3045_v39 = vmax.f32 %v3044_v1, %v2814_v56  ;;  %v2172_v40 = vmul.f32 %v7691_v9, %v1350_v27  ;;  %v2268_v20 = vmul.f32 %v7691_v9, %v1410_v14  ;;  %v1352_v41 = vpop.f32.mrb[61].mxu0  ;;  %v1412_v29 = vpop.f32.mrb[41].mxu1 }
 0x315   :  { %v2903_v38 = vmax.f32 %v2902_v21, %v2719_v34  ;;  %v3066_v42 = vmax.f32 %v3065_v31, %v2815_v33  ;;  %v2173_v43 = vmul.f32 %v7695_v16, %v1352_v41  ;;  %v2269_v32 = vmul.f32 %v7695_v16, %v1412_v29  ;;  %v1354_v15 = vpop.f32.mrb[62].mxu0  ;;  %v1414_v49 = vpop.f32.mrb[42].mxu1  ;;  %4953 = vmatpush1.bf16.msra.mxu1 %v6564_v7 }
 0x316   :  { %v2470_v6 = vadd.f32 %v7700_v18, %v2172_v40  ;;  %v2566_v50 = vadd.f32 %v7700_v18, %v2268_v20  ;;  %v2180_v47 = vmul.f32 %v7691_v9, %v1354_v15  ;;  %v2276_v8 = vmul.f32 %v7691_v9, %v1414_v49  ;;  %v1356_v26 = vpop.f32.mrb[63].mxu0  ;;  %v1416_v48 = vpop.f32.mrb[43].mxu1  ;;  %4963 = vmatprep.subr.bf16.mxu1 %v6572_v30 }
 0x317   :  { %v2471_v37 = vadd.f32 %v7704_v19, %v2173_v43  ;;  %v2567_v55 = vadd.f32 %v7704_v19, %v2269_v32  ;;  %v2181_v59 = vmul.f32 %v7695_v16, %v1356_v26  ;;  %v2277_v60 = vmul.f32 %v7695_v16, %v1416_v48 }
 0x318   :  { %v2726_v3 = vmax.f32 %v2470_v6, 0.0  ;;  %v2822_v5 = vmax.f32 %v2566_v50, 0.0  ;;  %v2478_v17 = vadd.f32 %v7700_v18, %v2180_v47  ;;  %v2574_v7 = vadd.f32 %v7700_v18, %v2276_v8  ;;  %1938 = vmatmul.mubr.bf16.gmra.mrb[148].mxu1 %v7543_v0 }
 0x319   :  { %v2727_v54 = vmax.f32 %v2471_v37, 0.0  ;;  %v2823_v10 = vmax.f32 %v2567_v55, 0.0  ;;  %v2479_v1 = vadd.f32 %v7704_v19, %v2181_v59  ;;  %v2575_v22 = vadd.f32 %v7704_v19, %v2277_v60  ;;  %1947 = vmatprep.mubr.bf16.mxu1 %v7073_v45 }
 0x31a   :  { %v2883_v56 = vmax.f32 %v2882_v12, %v2726_v3  ;;  %v3046_v30 = vmax.f32 %v3045_v39, %v2822_v5  ;;  %v2734_v21 = vmax.f32 %v2478_v17, 0.0  ;;  %v2830_v31 = vmax.f32 %v2574_v7, 0.0 }
 0x31b   :  { %v2904_v34 = vmax.f32 %v2903_v38, %v2727_v54  ;;  %v3067_v33 = vmax.f32 %v3066_v42, %v2823_v10  ;;  %v2735_v27 = vmax.f32 %v2479_v1, 0.0  ;;  %v2831_v14 = vmax.f32 %v2575_v22, 0.0  ;;  %v1360_v40 = vpop.f32.mrb[64].mxu0  ;;  %v1420_v20 = vpop.f32.mrb[44].mxu1 }
 0x31c   :  { %v2884_v41 = vmax.f32 %v2883_v56, %v2734_v21  ;;  %v3047_v0 = vmax.f32 %v3046_v30, %v2830_v31  ;;  %v2188_v29 = vmul.f32 %v7691_v9, %v1360_v40  ;;  %v2284_v43 = vmul.f32 %v7691_v9, %v1420_v20  ;;  %v1362_v32 = vpop.f32.mrb[65].mxu0  ;;  %v1422_v15 = vpop.f32.mrb[45].mxu1 }
 0x31d   :  { %v2905_v49 = vmax.f32 %v2904_v34, %v2735_v27  ;;  %v3068_v6 = vmax.f32 %v3067_v33, %v2831_v14  ;;  %v2189_v12 = vmul.f32 %v7695_v16, %v1362_v32  ;;  %v2285_v39 = vmul.f32 %v7695_v16, %v1422_v15  ;;  %v1364_v38 = vpop.f32.mrb[66].mxu0  ;;  %v1424_v42 = vpop.f32.mrb[46].mxu1 }
 0x31e   :  { %v2885_v50 = vrot.slane %v2884_v41, 4  ;;  %v2486_v47 = vadd.f32 %v7700_v18, %v2188_v29  ;;  %v2582_v8 = vadd.f32 %v7700_v18, %v2284_v43  ;;  %v2196_v26 = vmul.f32 %v7691_v9, %v1364_v38  ;;  %v1366_v48 = vpop.f32.mrb[67].mxu0  ;;  %v1426_v37 = vpop.f32.mrb[47].mxu1 }
 0x31f   :  { %v2906_v55 = vrot.slane %v2905_v49, 4  ;;  %v2487_v59 = vadd.f32 %v7704_v19, %v2189_v12  ;;  %v2583_v60 = vadd.f32 %v7704_v19, %v2285_v39  ;;  %v2292_v3 = vmul.f32 %v7691_v9, %v1424_v42 }
 0x320   :  { %v2886_v5 = vmax.f32 %v2884_v41, %v2885_v50  ;;  %v2742_v17 = vmax.f32 %v2486_v47, 0.0  ;;  %v2838_v7 = vmax.f32 %v2582_v8, 0.0  ;;  %v2494_v54 = vadd.f32 %v7700_v18, %v2196_v26  ;;  %1948 = vmatmul.mubr.bf16.gmra.mrb[152].mxu1 %v7540_v61 }
 0x321   :  { %v2907_v10 = vmax.f32 %v2905_v49, %v2906_v55  ;;  %v2743_v1 = vmax.f32 %v2487_v59, 0.0  ;;  %v2839_v22 = vmax.f32 %v2583_v60, 0.0  ;;  %v2590_v56 = vadd.f32 %v7700_v18, %v2292_v3  ;;  %1957 = vmatprep.mubr.bf16.mxu1 %v7073_v45 }
 0x322   :  { %v2887_v30 = vrot.slane %v2886_v5, 2  ;;  %v3048_v21 = vmax.f32 %v3047_v0, %v2838_v7  ;;  %v2750_v31 = vmax.f32 %v2494_v54, 0.0  ;;  %v2197_v34 = vmul.f32 %v7695_v16, %v1366_v48 }
 0x323   :  { %v2908_v33 = vrot.slane %v2907_v10, 2  ;;  %v3069_v27 = vmax.f32 %v3068_v6, %v2839_v22  ;;  %v2846_v14 = vmax.f32 %v2590_v56, 0.0  ;;  %v2293_v40 = vmul.f32 %v7695_v16, %v1426_v37  ;;  %v1370_v20 = vpop.f32.mrb[68].mxu0  ;;  %v1430_v41 = vpop.f32.mrb[48].mxu1 }
 0x324   :  { %v2888_v61 = vmax.f32 %v2886_v5, %v2887_v30  ;;  %v3038_v29 = vmax.f32 %v2742_v17, %v2750_v31  ;;  %v2495_v43 = vadd.f32 %v7704_v19, %v2197_v34  ;;  %v2204_v32 = vmul.f32 %v7691_v9, %v1370_v20  ;;  %v1372_v15 = vpop.f32.mrb[69].mxu0  ;;  %v1432_v49 = vpop.f32.mrb[49].mxu1 }
 0x325   :  { %v7864_v12 = vmax.f32 %v2907_v10, %v2908_v33  ;;  %v3049_v0 = vmax.f32 %v3048_v21, %v2846_v14  ;;  %v2591_v39 = vadd.f32 %v7704_v19, %v2293_v40  ;;  %v2300_v6 = vmul.f32 %v7691_v9, %v1430_v41  ;;  %v1374_v38 = vpop.f32.mrb[70].mxu0  ;;  %v1434_v42 = vpop.f32.mrb[50].mxu1 }
 0x326   :  { %v2889_v50 = vrot.slane %v2888_v61, 1  ;;  %v2751_v47 = vmax.f32 %v2495_v43, 0.0  ;;  %v2502_v8 = vadd.f32 %v7700_v18, %v2204_v32  ;;  %v2205_v26 = vmul.f32 %v7695_v16, %v1372_v15  ;;  %v1376_v48 = vpop.f32.mrb[71].mxu0  ;;  %v1436_v37 = vpop.f32.mrb[51].mxu1 }
 0x327   :  { %v2847_v55 = vmax.f32 %v2591_v39, 0.0  ;;  %v2598_v59 = vadd.f32 %v7700_v18, %v2300_v6  ;;  %v2301_v60 = vmul.f32 %v7695_v16, %v1432_v49  ;;  %v2212_v3 = vmul.f32 %v7691_v9, %v1374_v38 }
 0x328   :  { %v7873_v5 = vmax.f32 %v2888_v61, %v2889_v50  ;;  %v3059_v17 = vmax.f32 %v2743_v1, %v2751_v47  ;;  %v2758_v7 = vmax.f32 %v2502_v8, 0.0  ;;  %v2503_v54 = vadd.f32 %v7704_v19, %v2205_v26  ;;  %1958 = vmatmul.mubr.bf16.gmra.mrb[156].mxu1 %v7557_v28 }
 0x329   :  { %v3070_v10 = vmax.f32 %v3069_v27, %v2847_v55  ;;  %v2854_v22 = vmax.f32 %v2598_v59, 0.0  ;;  %v2599_v56 = vadd.f32 %v7704_v19, %v2301_v60  ;;  %v2510_v30 = vadd.f32 %v7700_v18, %v2212_v3  ;;  %1967 = vmatprep.mubr.bf16.mxu1 %v7073_v45 }
 0x32a   :  { %v3039_v21 = vmax.f32 %v3038_v29, %v2758_v7  ;;  %v2759_v31 = vmax.f32 %v2503_v54, 0.0  ;;  %v2308_v34 = vmul.f32 %v7691_v9, %v1434_v42  ;;  %v2213_v33 = vmul.f32 %v7695_v16, %v1376_v48 }
 0x32b   :  { %v3050_v1 = vmax.f32 %v3049_v0, %v2854_v22  ;;  %v2855_v14 = vmax.f32 %v2599_v56, 0.0  ;;  %v2766_v40 = vmax.f32 %v2510_v30, 0.0  ;;  %v2309_v20 = vmul.f32 %v7695_v16, %v1436_v37  ;;  %v1380_v28 = vpop.f32.mrb[72].mxu0  ;;  %v1473_v27 = vpop.f32.mrb[52].mxu1 }
 0x32c   :  { %v3060_v41 = vmax.f32 %v3059_v17, %v2759_v31  ;;  %v2606_v61 = vadd.f32 %v7700_v18, %v2308_v34  ;;  %v2511_v43 = vadd.f32 %v7704_v19, %v2213_v33  ;;  %v2220_v32 = vmul.f32 %v7691_v9, %v1380_v28  ;;  %v1382_v29 = vpop.f32.mrb[73].mxu0  ;;  %v1475_v15 = vpop.f32.mrb[53].mxu1 }
 0x32d   :  { %v3071_v49 = vmax.f32 %v3070_v10, %v2855_v14  ;;  %v3040_v39 = vmax.f32 %v3039_v21, %v2766_v40  ;;  %v2607_v6 = vadd.f32 %v7704_v19, %v2309_v20  ;;  %v2062_v0 = vmul.f32 %v7764_v52, %v1473_v27  ;;  %v1384_v38 = vpop.f32.mrb[74].mxu0  ;;  %v1477_v42 = vpop.f32.mrb[54].mxu1 }
 0x32e   :  { %v2862_v50 = vmax.f32 %v2606_v61, 0.0  ;;  %v2767_v47 = vmax.f32 %v2511_v43, 0.0  ;;  %v2518_v8 = vadd.f32 %v7700_v18, %v2220_v32  ;;  %v2221_v26 = vmul.f32 %v7695_v16, %v1382_v29  ;;  %v1386_v48 = vpop.f32.mrb[75].mxu0  ;;  %v1479_v37 = vpop.f32.mrb[55].mxu1 }
 0x32f   :  { %v2863_v55 = vmax.f32 %v2607_v6, 0.0  ;;  %v2360_v59 = vadd.f32 %v7772_v4, %v2062_v0  ;;  %v2063_v60 = vmul.f32 %v7768_v53, %v1475_v15  ;;  %v2228_v3 = vmul.f32 %v7691_v9, %v1384_v38 }
 0x330   :  { %v3051_v17 = vmax.f32 %v3050_v1, %v2862_v50  ;;  %v3061_v7 = vmax.f32 %v3060_v41, %v2767_v47  ;;  %v2774_v54 = vmax.f32 %v2518_v8, 0.0  ;;  %v2519_v10 = vadd.f32 %v7704_v19, %v2221_v26  ;;  %1968 = vmatmul.mubr.bf16.gmra.mrb[160].mxu1 %v7554_v25 }
 0x331   :  { %v3072_v22 = vmax.f32 %v3071_v49, %v2863_v55  ;;  %v2616_v56 = vmax.f32 %v2360_v59, 0.0  ;;  %v2361_v30 = vadd.f32 %v7776_v58, %v2063_v60  ;;  %v2526_v21 = vadd.f32 %v7700_v18, %v2228_v3  ;;  %1977 = vmatprep.mubr.bf16.mxu1 %v7073_v45 }
 0x332   :  { %v3041_v31 = vmax.f32 %v3040_v39, %v2774_v54  ;;  %v2775_v34 = vmax.f32 %v2519_v10, 0.0  ;;  %v2070_v33 = vmul.f32 %v7764_v52, %v1477_v42  ;;  %v2229_v9 = vmul.f32 %v7695_v16, %v1386_v48 }
 0x333   :  { %v2617_v1 = vmax.f32 %v2361_v30, 0.0  ;;  %v2782_v14 = vmax.f32 %v2526_v21, 0.0  ;;  %v2071_v40 = vmul.f32 %v7768_v53, %v1479_v37  ;;  %v1483_v20 = vpop.f32.mrb[56].mxu1  ;;  %v1666_v25 = vpop.f32.mrb[76].mxu0  ;;  %v2910_v28 = vrot.slane %v7864_v12, 1 }
 0x334   :  { %v3062_v27 = vmax.f32 %v3061_v7, %v2775_v34  ;;  %v2368_v41 = vadd.f32 %v7772_v4, %v2070_v33  ;;  %v2527_v18 = vadd.f32 %v7704_v19, %v2229_v9  ;;  %v2078_v61 = vmul.f32 %v7764_v52, %v1483_v20  ;;  %v1485_v43 = vpop.f32.mrb[57].mxu1  ;;  %v1668_v32 = vpop.f32.mrb[77].mxu0 }
 0x335   :  { %v3042_v29 = vmax.f32 %v3041_v31, %v2782_v14  ;;  %v2369_v16 = vadd.f32 %v7776_v58, %v2071_v40  ;;  %v2064_v15 = vmul.f32 %v7794_v44, %v1666_v25  ;;  %v2079_v49 = vmul.f32 %v7768_v53, %v1485_v43  ;;  %v1487_v39 = vpop.f32.mrb[58].mxu1  ;;  %v1670_v6 = vpop.f32.mrb[78].mxu0 }
 0x336   :  { %v2624_v0 = vmax.f32 %v2368_v41, 0.0  ;;  %v2783_v38 = vmax.f32 %v2527_v18, 0.0  ;;  %v2376_v42 = vadd.f32 %v7772_v4, %v2078_v61  ;;  %v2065_v50 = vmul.f32 %v7800_v51, %v1668_v32  ;;  %v1489_v19 = vpop.f32.mrb[59].mxu1  ;;  %v1672_v47 = vpop.f32.mrb[79].mxu0 }
 0x337   :  { %v7910_v8 = vmax.f32 %v3051_v17, %v3042_v29  ;;  %v2625_v26 = vmax.f32 %v2369_v16, 0.0  ;;  %v2362_v48 = vadd.f32 %v7805_v24, %v2064_v15  ;;  %v2377_v37 = vadd.f32 %v7776_v58, %v2079_v49 }
 0x338   :  { %v2912_v55 = vmax.f32 %v2616_v56, %v2624_v0  ;;  %v3063_v59 = vmax.f32 %v3062_v27, %v2783_v38  ;;  %v2632_v60 = vmax.f32 %v2376_v42, 0.0  ;;  %v2363_v3 = vadd.f32 %v7812_v36, %v2065_v50  ;;  %1978 = vmatmul.mubr.bf16.gmra.mrb[164].mxu1 %v7576_v57 }
 0x339   :  { %v2933_v7 = vmax.f32 %v2617_v1, %v2625_v26  ;;  %v2618_v54 = vmax.f32 %v2362_v48, 0.0  ;;  %v2633_v10 = vmax.f32 %v2377_v37, 0.0  ;;  %v2086_v30 = vmul.f32 %v7764_v52, %v1487_v39  ;;  %1987 = vmatprep.mubr.bf16.mxu1 %v7073_v45 }
 0x33a   :  { %v7918_v17 = vmax.f32 %v3072_v22, %v3063_v59  ;;  %v2913_v21 = vmax.f32 %v2912_v55, %v2632_v60  ;;  %v2619_v31 = vmax.f32 %v2363_v3, 0.0  ;;  %v2072_v34 = vmul.f32 %v7794_v44, %v1670_v6 }
 0x33b   :  { %v2934_v56 = vmax.f32 %v2933_v7, %v2633_v10  ;;  %v2384_v33 = vadd.f32 %v7772_v4, %v2086_v30  ;;  %v2087_v9 = vmul.f32 %v7768_v53, %v1489_v19  ;;  %v2073_v57 = vmul.f32 %v7800_v51, %v1672_v47  ;;  %v1493_v1 = vpop.f32.mrb[60].mxu1  ;;  %v1676_v14 = vpop.f32.mrb[80].mxu0 }
 0x33c   :  { %v2370_v40 = vadd.f32 %v7805_v24, %v2072_v34  ;;  %v2094_v20 = vmul.f32 %v7764_v52, %v1493_v1  ;;  %v2080_v22 = vmul.f32 %v7794_v44, %v1676_v14  ;;  %v1495_v25 = vpop.f32.mrb[61].mxu1  ;;  %v1678_v27 = vpop.f32.mrb[81].mxu0  ;;  %v7928_v41 = vmax.f32 %v7864_v12, %v2910_v28 }
 0x33d   :  { %v2640_v18 = vmax.f32 %v2384_v33, 0.0  ;;  %v2385_v61 = vadd.f32 %v7776_v58, %v2087_v9  ;;  %v2371_v43 = vadd.f32 %v7812_v36, %v2073_v57  ;;  %v2095_v32 = vmul.f32 %v7768_v53, %v1495_v25  ;;  %v1497_v29 = vpop.f32.mrb[62].mxu1  ;;  %v1680_v16 = vpop.f32.mrb[82].mxu0 }
 0x33e   :  { %v2626_v15 = vmax.f32 %v2370_v40, 0.0  ;;  %v2392_v49 = vadd.f32 %v7772_v4, %v2094_v20  ;;  %v2378_v39 = vadd.f32 %v7805_v24, %v2080_v22  ;;  %v2081_v6 = vmul.f32 %v7800_v51, %v1678_v27  ;;  %v1499_v0 = vpop.f32.mrb[63].mxu1  ;;  %v1682_v38 = vpop.f32.mrb[83].mxu0 }
 0x33f   :  { %v2914_v12 = vmax.f32 %v2913_v21, %v2640_v18  ;;  %v2641_v28 = vmax.f32 %v2385_v61, 0.0  ;;  %v2627_v42 = vmax.f32 %v2371_v43, 0.0  ;;  %v2393_v50 = vadd.f32 %v7776_v58, %v2095_v32 }
 0x340   :  { %v2954_v19 = vmax.f32 %v2618_v54, %v2626_v15  ;;  %v2648_v47 = vmax.f32 %v2392_v49, 0.0  ;;  %v2634_v26 = vmax.f32 %v2378_v39, 0.0  ;;  %v2379_v48 = vadd.f32 %v7812_v36, %v2081_v6  ;;  %1988 = vmatmul.mubr.bf16.gmra.mrb[168].mxu1 %v7573_v46 }
 0x341   :  { %v2935_v37 = vmax.f32 %v2934_v56, %v2641_v28  ;;  %v2975_v55 = vmax.f32 %v2619_v31, %v2627_v42  ;;  %v2649_v59 = vmax.f32 %v2393_v50, 0.0  ;;  %v2102_v60 = vmul.f32 %v7764_v52, %v1497_v29  ;;  %1997 = vmatprep.mubr.bf16.mxu1 %v7073_v45 }
 0x342   :  { %v2915_v3 = vmax.f32 %v2914_v12, %v2648_v47  ;;  %v2955_v7 = vmax.f32 %v2954_v19, %v2634_v26  ;;  %v2635_v10 = vmax.f32 %v2379_v48, 0.0  ;;  %v2088_v30 = vmul.f32 %v7794_v44, %v1680_v16 }
 0x343   :  { %v2936_v21 = vmax.f32 %v2935_v37, %v2649_v59  ;;  %v2400_v54 = vadd.f32 %v7772_v4, %v2102_v60  ;;  %v2103_v34 = vmul.f32 %v7768_v53, %v1499_v0  ;;  %v2089_v33 = vmul.f32 %v7800_v51, %v1682_v38  ;;  %v1503_v46 = vpop.f32.mrb[64].mxu1  ;;  %v1686_v56 = vpop.f32.mrb[84].mxu0 }
 0x344   :  { %v2976_v31 = vmax.f32 %v2975_v55, %v2635_v10  ;;  %v2386_v9 = vadd.f32 %v7805_v24, %v2088_v30  ;;  %v2110_v57 = vmul.f32 %v7764_v52, %v1503_v46  ;;  %v2096_v1 = vmul.f32 %v7794_v44, %v1686_v56  ;;  %v1505_v14 = vpop.f32.mrb[65].mxu1  ;;  %v1688_v40 = vpop.f32.mrb[85].mxu0 }
 0x345   :  { %v2656_v20 = vmax.f32 %v2400_v54, 0.0  ;;  %v2401_v22 = vadd.f32 %v7776_v58, %v2103_v34  ;;  %v2387_v25 = vadd.f32 %v7812_v36, %v2089_v33  ;;  %v2111_v27 = vmul.f32 %v7768_v53, %v1505_v14  ;;  %v1507_v18 = vpop.f32.mrb[66].mxu1  ;;  %v1690_v61 = vpop.f32.mrb[86].mxu0 }
 0x346   :  { %v2642_v43 = vmax.f32 %v2386_v9, 0.0  ;;  %v2408_v32 = vadd.f32 %v7772_v4, %v2110_v57  ;;  %v2394_v29 = vadd.f32 %v7805_v24, %v2096_v1  ;;  %v2097_v16 = vmul.f32 %v7800_v51, %v1688_v40  ;;  %v1509_v15 = vpop.f32.mrb[67].mxu1  ;;  %v1692_v49 = vpop.f32.mrb[87].mxu0 }
 0x347   :  { %v2916_v39 = vmax.f32 %v2915_v3, %v2656_v20  ;;  %v2657_v6 = vmax.f32 %v2401_v22, 0.0  ;;  %v2643_v0 = vmax.f32 %v2387_v25, 0.0  ;;  %v2409_v38 = vadd.f32 %v7776_v58, %v2111_v27 }
 0x348   :  { %v2956_v12 = vmax.f32 %v2955_v7, %v2642_v43  ;;  %v2664_v28 = vmax.f32 %v2408_v32, 0.0  ;;  %v2650_v42 = vmax.f32 %v2394_v29, 0.0  ;;  %v2395_v50 = vadd.f32 %v7812_v36, %v2097_v16  ;;  %1998 = vmatmul.mubr.bf16.gmra.mrb[172].mxu1 %v7591_v11 }
 0x349   :  { %v2937_v19 = vmax.f32 %v2936_v21, %v2657_v6  ;;  %v2977_v47 = vmax.f32 %v2976_v31, %v2643_v0  ;;  %v2665_v26 = vmax.f32 %v2409_v38, 0.0  ;;  %v2118_v48 = vmul.f32 %v7764_v52, %v1507_v18  ;;  %2007 = vmatprep.mubr.bf16.mxu1 %v7073_v45 }
 0x34a   :  { %v2917_v37 = vmax.f32 %v2916_v39, %v2664_v28  ;;  %v2957_v55 = vmax.f32 %v2956_v12, %v2650_v42  ;;  %v2651_v59 = vmax.f32 %v2395_v50, 0.0  ;;  %v2104_v60 = vmul.f32 %v7794_v44, %v1690_v61 }
 0x34b   :  { %v2938_v3 = vmax.f32 %v2937_v19, %v2665_v26  ;;  %v2416_v7 = vadd.f32 %v7772_v4, %v2118_v48  ;;  %v2119_v10 = vmul.f32 %v7768_v53, %v1509_v15  ;;  %v2105_v30 = vmul.f32 %v7800_v51, %v1692_v49  ;;  %v1513_v11 = vpop.f32.mrb[68].mxu1  ;;  %v1696_v21 = vpop.f32.mrb[88].mxu0 }
 0x34c   :  { %v2978_v54 = vmax.f32 %v2977_v47, %v2651_v59  ;;  %v2402_v34 = vadd.f32 %v7805_v24, %v2104_v60  ;;  %v2126_v33 = vmul.f32 %v7764_v52, %v1513_v11  ;;  %v2112_v45 = vmul.f32 %v7794_v44, %v1696_v21  ;;  %v1515_v46 = vpop.f32.mrb[69].mxu1  ;;  %v1698_v56 = vpop.f32.mrb[89].mxu0 }
 0x34d   :  { %v2672_v31 = vmax.f32 %v2416_v7, 0.0  ;;  %v2417_v9 = vadd.f32 %v7776_v58, %v2119_v10  ;;  %v2403_v57 = vadd.f32 %v7812_v36, %v2105_v30  ;;  %v2127_v1 = vmul.f32 %v7768_v53, %v1515_v46  ;;  %v1517_v14 = vpop.f32.mrb[70].mxu1  ;;  %v1700_v40 = vpop.f32.mrb[90].mxu0 }
 0x34e   :  { %v2658_v20 = vmax.f32 %v2402_v34, 0.0  ;;  %v2424_v22 = vadd.f32 %v7772_v4, %v2126_v33  ;;  %v2410_v25 = vadd.f32 %v7805_v24, %v2112_v45  ;;  %v2113_v27 = vmul.f32 %v7800_v51, %v1698_v56  ;;  %v1519_v18 = vpop.f32.mrb[71].mxu1  ;;  %v1702_v61 = vpop.f32.mrb[91].mxu0 }
 0x34f   :  { %v2918_v43 = vmax.f32 %v2917_v37, %v2672_v31  ;;  %v2673_v32 = vmax.f32 %v2417_v9, 0.0  ;;  %v2659_v29 = vmax.f32 %v2403_v57, 0.0  ;;  %v2425_v16 = vadd.f32 %v7776_v58, %v2127_v1 }
 0x350   :  { %v2958_v15 = vmax.f32 %v2957_v55, %v2658_v20  ;;  %v2680_v49 = vmax.f32 %v2424_v22, 0.0  ;;  %v2666_v39 = vmax.f32 %v2410_v25, 0.0  ;;  %v2411_v6 = vadd.f32 %v7812_v36, %v2113_v27  ;;  %2008 = vmatmul.mubr.bf16.gmra.mrb[176].mxu1 %v7589_v23 }
 0x351   :  { %v2939_v0 = vmax.f32 %v2938_v3, %v2673_v32  ;;  %v2979_v38 = vmax.f32 %v2978_v54, %v2659_v29  ;;  %v2681_v12 = vmax.f32 %v2425_v16, 0.0  ;;  %v2134_v28 = vmul.f32 %v7764_v52, %v1517_v14 }
 0x352   :  { %v2919_v42 = vmax.f32 %v2918_v43, %v2680_v49  ;;  %v2959_v50 = vmax.f32 %v2958_v15, %v2666_v39  ;;  %v2667_v19 = vmax.f32 %v2411_v6, 0.0  ;;  %v2120_v47 = vmul.f32 %v7794_v44, %v1700_v40 }
 0x353   :  { %v2940_v26 = vmax.f32 %v2939_v0, %v2681_v12  ;;  %v2432_v48 = vadd.f32 %v7772_v4, %v2134_v28  ;;  %v2135_v37 = vmul.f32 %v7768_v53, %v1519_v18  ;;  %v2121_v55 = vmul.f32 %v7800_v51, %v1702_v61  ;;  %v1523_v59 = vpop.f32.mrb[72].mxu1  ;;  %v1706_v60 = vpop.f32.mrb[92].mxu0 }
 0x354   :  { %v2980_v23 = vmax.f32 %v2979_v38, %v2667_v19  ;;  %v2418_v3 = vadd.f32 %v7805_v24, %v2120_v47  ;;  %v2142_v7 = vmul.f32 %v7764_v52, %v1523_v59  ;;  %v2128_v10 = vmul.f32 %v7794_v44, %v1706_v60  ;;  %v1525_v30 = vpop.f32.mrb[73].mxu1  ;;  %v1708_v11 = vpop.f32.mrb[93].mxu0 }
 0x355   :  { %v2688_v21 = vmax.f32 %v2432_v48, 0.0  ;;  %v2433_v54 = vadd.f32 %v7776_v58, %v2135_v37  ;;  %v2419_v34 = vadd.f32 %v7812_v36, %v2121_v55  ;;  %v2143_v33 = vmul.f32 %v7768_v53, %v1525_v30  ;;  %v1527_v45 = vpop.f32.mrb[74].mxu1  ;;  %v1710_v46 = vpop.f32.mrb[94].mxu0 }
 0x356   :  { %v2674_v56 = vmax.f32 %v2418_v3, 0.0  ;;  %v2440_v31 = vadd.f32 %v7772_v4, %v2142_v7  ;;  %v2426_v9 = vadd.f32 %v7805_v24, %v2128_v10  ;;  %v2129_v57 = vmul.f32 %v7800_v51, %v1708_v11  ;;  %v1529_v1 = vpop.f32.mrb[75].mxu1  ;;  %v1712_v14 = vpop.f32.mrb[95].mxu0 }
 0x357   :  { %v2920_v40 = vmax.f32 %v2919_v42, %v2688_v21  ;;  %v2689_v20 = vmax.f32 %v2433_v54, 0.0  ;;  %v2675_v22 = vmax.f32 %v2419_v34, 0.0  ;;  %v2441_v25 = vadd.f32 %v7776_v58, %v2143_v33 }
 0x358   :  { %v2960_v27 = vmax.f32 %v2959_v50, %v2674_v56  ;;  %v2696_v18 = vmax.f32 %v2440_v31, 0.0  ;;  %v2682_v61 = vmax.f32 %v2426_v9, 0.0  ;;  %v2427_v43 = vadd.f32 %v7812_v36, %v2129_v57 }
 0x359   :  { %v2941_v32 = vmax.f32 %v2940_v26, %v2689_v20  ;;  %v2981_v29 = vmax.f32 %v2980_v23, %v2675_v22  ;;  %v2697_v16 = vmax.f32 %v2441_v25, 0.0  ;;  %v2150_v15 = vmul.f32 %v7764_v52, %v1527_v45 }
 0x35a   :  { %v2921_v49 = vmax.f32 %v2920_v40, %v2696_v18  ;;  %v2961_v39 = vmax.f32 %v2960_v27, %v2682_v61  ;;  %v2683_v6 = vmax.f32 %v2427_v43, 0.0  ;;  %v2136_v0 = vmul.f32 %v7794_v44, %v1710_v46 }
 0x35b   :  { %v2942_v38 = vmax.f32 %v2941_v32, %v2697_v16  ;;  %v2448_v12 = vadd.f32 %v7772_v4, %v2150_v15  ;;  %v2151_v28 = vmul.f32 %v7768_v53, %v1529_v1  ;;  %v2137_v42 = vmul.f32 %v7800_v51, %v1712_v14  ;;  %v1533_v50 = vpop.f32.mrb[76].mxu1  ;;  %v1716_v19 = vpop.f32.mrb[96].mxu0 }
 0x35c   :  { %v2982_v47 = vmax.f32 %v2981_v29, %v2683_v6  ;;  %v2434_v26 = vadd.f32 %v7805_v24, %v2136_v0  ;;  %v3074_v48 = vrot.slane %v7918_v17, 4  ;;  %v2158_v37 = vmul.f32 %v7764_v52, %v1533_v50  ;;  %v1535_v55 = vpop.f32.mrb[77].mxu1  ;;  %v1718_v59 = vpop.f32.mrb[97].mxu0 }
 0x35d   :  { %v2704_v60 = vmax.f32 %v2448_v12, 0.0  ;;  %v2449_v23 = vadd.f32 %v7776_v58, %v2151_v28  ;;  %v2435_v3 = vadd.f32 %v7812_v36, %v2137_v42  ;;  %v2144_v7 = vmul.f32 %v7794_v44, %v1716_v19  ;;  %v1537_v10 = vpop.f32.mrb[78].mxu1  ;;  %v1720_v30 = vpop.f32.mrb[98].mxu0 }
 0x35e   :  { %v2690_v11 = vmax.f32 %v2434_v26, 0.0  ;;  %v3075_v21 = vmax.f32 %v7918_v17, %v3074_v48  ;;  %v2456_v54 = vadd.f32 %v7772_v4, %v2158_v37  ;;  %v3053_v34 = vrot.slane %v7910_v8, 4  ;;  %v1539_v33 = vpop.f32.mrb[79].mxu1  ;;  %v1722_v45 = vpop.f32.mrb[99].mxu0 }
 0x35f   :  { %v2922_v46 = vmax.f32 %v2921_v49, %v2704_v60  ;;  %v2705_v56 = vmax.f32 %v2449_v23, 0.0  ;;  %v2691_v31 = vmax.f32 %v2435_v3, 0.0  ;;  %v2442_v9 = vadd.f32 %v7805_v24, %v2144_v7 }
 0x360   :  { %v2962_v57 = vmax.f32 %v2961_v39, %v2690_v11  ;;  %v3076_v1 = vrot.slane %v3075_v21, 2  ;;  %v2712_v14 = vmax.f32 %v2456_v54, 0.0  ;;  %v3054_v40 = vmax.f32 %v7910_v8, %v3053_v34 }
 0x361   :  { %v2943_v20 = vmax.f32 %v2942_v38, %v2705_v56  ;;  %v2983_v22 = vmax.f32 %v2982_v47, %v2691_v31  ;;  %v2698_v25 = vmax.f32 %v2442_v9, 0.0  ;;  %v2159_v17 = vmul.f32 %v7768_v53, %v1535_v55 }
 0x362   :  { %v3077_v27 = vmax.f32 %v3075_v21, %v3076_v1  ;;  %v2923_v18 = vmax.f32 %v2922_v46, %v2712_v14  ;;  %v3055_v61 = vrot.slane %v3054_v40, 2  ;;  %v2145_v43 = vmul.f32 %v7800_v51, %v1718_v59 }
 0x363   :  { %v2963_v32 = vmax.f32 %v2962_v57, %v2698_v25  ;;  %v2457_v29 = vadd.f32 %v7776_v58, %v2159_v17  ;;  %v2166_v16 = vmul.f32 %v7764_v52, %v1537_v10  ;;  %v2152_v15 = vmul.f32 %v7794_v44, %v1720_v30  ;;  %v1543_v49 = vpop.f32.mrb[80].mxu1  ;;  %v1726_v39 = vpop.f32.mrb[100].mxu0  ;;  %v6575_v25 = vld [vmem:[#allocation5 + $0x224] ss:$16 sps:$4 sm:$0xff]  }
 0x364   :  { %v3078_v8 = vrot.slane %v3077_v27, 1  ;;  %v3056_v6 = vmax.f32 %v3054_v40, %v3055_v61  ;;  %v2443_v0 = vadd.f32 %v7812_v36, %v2145_v43  ;;  %v2167_v38 = vmul.f32 %v7768_v53, %v1539_v33  ;;  %v1545_v12 = vpop.f32.mrb[81].mxu1  ;;  %v1728_v28 = vpop.f32.mrb[101].mxu0  ;;  %v6567_v40 = vld [vmem:[#allocation5 + $0x200] ss:$16 sps:$4 sm:$0xff]  }
 0x365   :  { %v2713_v42 = vmax.f32 %v2457_v29, 0.0  ;;  %v2464_v50 = vadd.f32 %v7772_v4, %v2166_v16  ;;  %v2450_v19 = vadd.f32 %v7805_v24, %v2152_v15  ;;  %v2153_v47 = vmul.f32 %v7800_v51, %v1722_v45  ;;  %v1547_v26 = vpop.f32.mrb[82].mxu1  ;;  %v1730_v48 = vpop.f32.mrb[102].mxu0  ;;  %v6578_v61 = vld [vmem:[#allocation5 + $0x22c] ss:$16 sps:$4 sm:$0xff]  }
 0x366   :  { %v3079_v37 = vmax.f32 %v3077_v27, %v3078_v8  ;;  %v3057_v55 = vrot.slane %v3056_v6, 1  ;;  %v2699_v59 = vmax.f32 %v2443_v0, 0.0  ;;  %v2465_v60 = vadd.f32 %v7776_v58, %v2167_v38  ;;  %v1549_v23 = vpop.f32.mrb[83].mxu1  ;;  %v1732_v3 = vpop.f32.mrb[103].mxu0 }
 0x367   :  { %v2944_v7 = vmax.f32 %v2943_v20, %v2713_v42  ;;  %v2720_v10 = vmax.f32 %v2464_v50, 0.0  ;;  %v2706_v30 = vmax.f32 %v2450_v19, 0.0  ;;  %v2451_v11 = vadd.f32 %v7812_v36, %v2153_v47  ;;  %v6570_v20 = vld [vmem:[#allocation5 + $0x208] ss:$16 sps:$4 sm:$0xff]  }
 0x368   :  { %v3207_v21 = vsel %vm200_vm0, %v7928_v41, %v3079_v37  ;;  %v3058_v54 = vmax.f32 %v3056_v6, %v3057_v55  ;;  %v2984_v34 = vmax.f32 %v2983_v22, %v2699_v59  ;;  %v2721_v33 = vmax.f32 %v2465_v60, 0.0 }
 0x369   :  { %v3215_v45 = vpack.c.bf16 %v3207_v21, %v3207_v21  ;;  %v2924_v46 = vmax.f32 %v2923_v18, %v2720_v10  ;;  %v2964_v56 = vmax.f32 %v2963_v32, %v2706_v30  ;;  %v2707_v31 = vmax.f32 %v2451_v11, 0.0 }
 0x36a   :  { %v3206_v9 = vsel %vm200_vm0, %v7873_v5, %v3058_v54  ;;  %v2945_v57 = vmax.f32 %v2944_v7, %v2721_v33  ;;  %v2174_v1 = vmul.f32 %v7764_v52, %v1543_v49  ;;  %v2160_v14 = vmul.f32 %v7794_v44, %v1726_v39  ;;  %v6581_v7 = vld [vmem:[#allocation5 + $0x244] ss:$16 sps:$4 sm:$0xff]   ;;  %v6584_v54 = vld [vmem:[#allocation5 + $0x24c] ss:$16 sps:$4 sm:$0xff]  }
 0x36b   :  { %4790 = vmatprep.mubr.bf16.mxu0 %v3215_v45  ;;  %4954 = vmatprep.mubr.bf16.mxu1 %v3215_v45  ;;  %v3214_v41 = vpack.c.bf16 %v3206_v9, %v3206_v9  ;;  %v2985_v22 = vmax.f32 %v2984_v34, %v2707_v31  ;;  %v2175_v17 = vmul.f32 %v7768_v53, %v1545_v12  ;;  %v1553_v27 = vpop.f32.mrb[84].mxu1  ;;  %v1736_v18 = vpop.f32.mrb[104].mxu0  ;;  %v2046_v43 = vsub.s32 6, %v7667_v62 }
 0x36c   :  { %v2472_v5 = vadd.f32 %v7772_v4, %v2174_v1  ;;  %v2458_v32 = vadd.f32 %v7805_v24, %v2160_v14  ;;  %v2161_v29 = vmul.f32 %v7800_v51, %v1728_v28  ;;  %v2182_v16 = vmul.f32 %v7764_v52, %v1547_v26  ;;  %v1555_v15 = vpop.f32.mrb[85].mxu1  ;;  %v1738_v49 = vpop.f32.mrb[105].mxu0 }
 0x36d   :  { %4791 = vmatmul.mubr.bf16.vlgmr.msra.gmra.mrb[140].mxu0 %v3214_v41  ;;  %4955 = vmatmul.mubr.bf16.vlgmr.msra.gmra.mrb[180].mxu1 %v3214_v41  ;;  %v2473_v39 = vadd.f32 %v7776_v58, %v2175_v17  ;;  %v2168_v8 = vmul.f32 %v7794_v44, %v1730_v48  ;;  %v2183_v6 = vmul.f32 %v7768_v53, %v1549_v23  ;;  %v1557_v0 = vpop.f32.mrb[86].mxu1  ;;  %v8034_v38 = vpop.f32.mrb[106].mxu0  ;;  %v2050_v12 = vsub.s32 7, %v7667_v62  ;;  %v6573_v48 = vld [vmem:[#allocation5 + $0x220] ss:$16 sps:$4 sm:$0xff]  }
 0x36e   :  { %v2728_v42 = vmax.f32 %v2472_v5, 0.0  ;;  %v2714_v50 = vmax.f32 %v2458_v32, 0.0  ;;  %v2459_v28 = vadd.f32 %v7812_v36, %v2161_v29  ;;  %v2480_v19 = vadd.f32 %v7772_v4, %v2182_v16  ;;  %v8039_v47 = vpop.f32.mrb[87].mxu1  ;;  %v8041_v26 = vpop.f32.mrb[107].mxu0  ;;  %4800 = vmatpush1.bf16.msra.mxu0 %v6567_v40  ;;  %4964 = vmatpush1.bf16.msra.mxu1 %v6570_v20  ;;  %v6576_v23 = vld [vmem:[#allocation5 + $0x228] ss:$16 sps:$4 sm:$0xff]  }
 0x36f   :  { %v2729_v37 = vmax.f32 %v2473_v39, 0.0  ;;  %v2466_v55 = vadd.f32 %v7805_v24, %v2168_v8  ;;  %v2481_v59 = vadd.f32 %v7776_v58, %v2183_v6  ;;  %v2169_v60 = vmul.f32 %v7800_v51, %v1732_v3  ;;  %4801 = vmatprep.subr.bf16.mxu0 %v6575_v25  ;;  %4965 = vmatprep.subr.bf16.mxu1 %v6578_v61  ;;  %v6579_v40 = vld [vmem:[#allocation5 + $0x240] ss:$16 sps:$4 sm:$0xff]   ;;  %v6582_v20 = vld [vmem:[#allocation5 + $0x248] ss:$16 sps:$4 sm:$0xff]  }
 0x370   :  { %v2925_v10 = vmax.f32 %v2924_v46, %v2728_v42  ;;  %v2965_v30 = vmax.f32 %v2964_v56, %v2714_v50  ;;  %v2715_v11 = vmax.f32 %v2459_v28, 0.0  ;;  %v2736_v21 = vmax.f32 %v2480_v19, 0.0  ;;  %v6587_v61 = vld [vmem:[#allocation5 + $0x264] ss:$16 sps:$4 sm:$0xff]   ;;  %v6590_v16 = vld [vmem:[#allocation5 + $0x26c] ss:$16 sps:$4 sm:$0xff]  }
 0x371   :  { %v2946_v34 = vmax.f32 %v2945_v57, %v2729_v37  ;;  %v2722_v33 = vmax.f32 %v2466_v55, 0.0  ;;  %v2737_v45 = vmax.f32 %v2481_v59, 0.0  ;;  %v2467_v31 = vadd.f32 %v7812_v36, %v2169_v60  ;;  %v6585_v59 = vld [vmem:[#allocation5 + $0x260] ss:$16 sps:$4 sm:$0xff]  }
 0x372   :  { %v2986_v9 = vmax.f32 %v2985_v22, %v2715_v11  ;;  %v2926_v1 = vmax.f32 %v2925_v10, %v2736_v21  ;;  %v2190_v14 = vmul.f32 %v7764_v52, %v1553_v27  ;;  %v2176_v3 = vmul.f32 %v7794_v44, %v1736_v18  ;;  %4802 = vmatpush1.bf16.msra.mxu0 %v6573_v48  ;;  %v6588_v10 = vld [vmem:[#allocation5 + $0x268] ss:$16 sps:$4 sm:$0xff]  }
 0x373   :  { %v2966_v25 = vmax.f32 %v2965_v30, %v2722_v33  ;;  %v2947_v46 = vmax.f32 %v2946_v34, %v2737_v45  ;;  %v2723_v56 = vmax.f32 %v2467_v31, 0.0  ;;  %v2191_v41 = vmul.f32 %v7768_v53, %v1555_v15  ;;  %v1563_v17 = vpop.f32.mrb[88].mxu1  ;;  %v8050_v57 = vpop.f32.mrb[108].mxu0  ;;  %4966 = vmatpush1.bf16.msra.mxu1 %v6576_v23  ;;  %4803 = vmatprep.subr.bf16.mxu0 %v6581_v7  ;;  %v6593_v30 = vld [vmem:[#allocation5 + $0x284] ss:$16 sps:$4 sm:$0xff]  }
 0x374   :  { %v2927_v22 = vrot.slane %v2926_v1, 4  ;;  %v2488_v5 = vadd.f32 %v7772_v4, %v2190_v14  ;;  %v2474_v27 = vadd.f32 %v7805_v24, %v2176_v3  ;;  %v2177_v18 = vmul.f32 %v7800_v51, %v1738_v49  ;;  %v1565_v32 = vpop.f32.mrb[89].mxu1  ;;  %v1748_v29 = vpop.f32.mrb[109].mxu0  ;;  %4967 = vmatprep.subr.bf16.mxu1 %v6584_v54  ;;  %v6596_v33 = vld [vmem:[#allocation5 + $0x28c] ss:$16 sps:$4 sm:$0xff]  }
 0x375   :  { %v2948_v39 = vrot.slane %v2947_v46, 4  ;;  %v2987_v8 = vmax.f32 %v2986_v9, %v2723_v56  ;;  %v2489_v15 = vadd.f32 %v7776_v58, %v2191_v41  ;;  %v2198_v6 = vmul.f32 %v7764_v52, %v1557_v0  ;;  %v8057_v42 = vpop.f32.mrb[90].mxu1  ;;  %v8059_v50 = vpop.f32.mrb[110].mxu0 }
 0x376   :  { %v2928_v28 = vmax.f32 %v2926_v1, %v2927_v22  ;;  %v2744_v19 = vmax.f32 %v2488_v5, 0.0  ;;  %v2730_v48 = vmax.f32 %v2474_v27, 0.0  ;;  %v2475_v37 = vadd.f32 %v7812_v36, %v2177_v18  ;;  %v8062_v49 = vpop.f32.mrb[91].mxu1  ;;  %v8064_v55 = vpop.f32.mrb[111].mxu0  ;;  %4804 = vmatpush1.bf16.msra.mxu0 %v6579_v40 }
 0x377   :  { %v2949_v60 = vmax.f32 %v2947_v46, %v2948_v39  ;;  %v2745_v23 = vmax.f32 %v2489_v15, 0.0  ;;  %v2496_v7 = vadd.f32 %v7772_v4, %v2198_v6  ;;  %v2184_v0 = vmul.f32 %v7794_v44, %v8034_v38  ;;  %4968 = vmatpush1.bf16.msra.mxu1 %v6582_v20  ;;  %4805 = vmatprep.subr.bf16.mxu0 %v6587_v61  ;;  %v6591_v20 = vld [vmem:[#allocation5 + $0x280] ss:$16 sps:$4 sm:$0xff]  }
 0x378   :  { %v2929_v11 = vrot.slane %v2928_v28, 2  ;;  %v2967_v21 = vmax.f32 %v2966_v25, %v2730_v48  ;;  %v2731_v54 = vmax.f32 %v2475_v37, 0.0  ;;  %v2199_v34 = vmul.f32 %v7768_v53, %v8039_v47  ;;  %4969 = vmatprep.subr.bf16.mxu1 %v6590_v16  ;;  %v6594_v25 = vld [vmem:[#allocation5 + $0x288] ss:$16 sps:$4 sm:$0xff]  }
 0x379   :  { %v2950_v45 = vrot.slane %v2949_v60, 2  ;;  %v2752_v31 = vmax.f32 %v2496_v7, 0.0  ;;  %v2482_v9 = vadd.f32 %v7805_v24, %v2184_v0  ;;  %v2185_v1 = vmul.f32 %v7800_v51, %v8041_v26  ;;  %v6599_v26 = vld [vmem:[#allocation5 + $0x2a4] ss:$16 sps:$4 sm:$0xff]  }
 0x37a   :  { %v2930_v38 = vmax.f32 %v2928_v28, %v2929_v11  ;;  %v2988_v14 = vmax.f32 %v2987_v8, %v2731_v54  ;;  %v2497_v3 = vadd.f32 %v7776_v58, %v2199_v34  ;;  %v2206_v40 = vmul.f32 %v7764_v52, %v1563_v17  ;;  %4806 = vmatpush1.bf16.msra.mxu0 %v6585_v59  ;;  %v6602_v8 = vld [vmem:[#allocation5 + $0x2ac] ss:$16 sps:$4 sm:$0xff]   ;;  %v6600_v54 = vld [vmem:[#allocation5 + $0x2a8] ss:$16 sps:$4 sm:$0xff]   ;;  %v6605_v34 = vld [vmem:[#allocation5 + $0x2c4] ss:$16 sps:$4 sm:$0xff]  }
 0x37b   :  { %v8076_v46 = vmax.f32 %v2949_v60, %v2950_v45  ;;  %v3080_v47 = vmax.f32 %v2744_v19, %v2752_v31  ;;  %v2738_v56 = vmax.f32 %v2482_v9, 0.0  ;;  %v2483_v41 = vadd.f32 %v7812_v36, %v2185_v1  ;;  %v1573_v61 = vpop.f32.mrb[92].mxu1  ;;  %v8079_v22 = vpop.f32.mrb[112].mxu0  ;;  %4970 = vmatpush1.bf16.msra.mxu1 %v6588_v10  ;;  %4807 = vmatprep.subr.bf16.mxu0 %v6593_v30  ;;  %v6597_v30 = vld [vmem:[#allocation5 + $0x2a0] ss:$16 sps:$4 sm:$0xff]  }
 0x37c   :  { %v2931_v5 = vrot.slane %v2930_v38, 1  ;;  %v2753_v27 = vmax.f32 %v2497_v3, 0.0  ;;  %v2504_v18 = vadd.f32 %v7772_v4, %v2206_v40  ;;  %v2192_v17 = vmul.f32 %v7794_v44, %v8050_v57  ;;  %v8084_v16 = vpop.f32.mrb[93].mxu1  ;;  %v8086_v39 = vpop.f32.mrb[113].mxu0  ;;  %4971 = vmatprep.subr.bf16.mxu1 %v6596_v33  ;;  %v6608_v9 = vld [vmem:[#allocation5 + $0x2cc] ss:$16 sps:$4 sm:$0xff]  }
 0x37d   :  { %v2968_v15 = vmax.f32 %v2967_v21, %v2738_v56  ;;  %v2739_v6 = vmax.f32 %v2483_v41, 0.0  ;;  %v2207_v28 = vmul.f32 %v7768_v53, %v1565_v32  ;;  %v2193_v19 = vmul.f32 %v7800_v51, %v1748_v29  ;;  %v8090_v48 = vpop.f32.mrb[94].mxu1  ;;  %v8092_v37 = vpop.f32.mrb[114].mxu0  ;;  %v6606_v56 = vld [vmem:[#allocation5 + $0x2c8] ss:$16 sps:$4 sm:$0xff]  }
 0x37e   :  { %v8094_v59 = vmax.f32 %v2930_v38, %v2931_v5  ;;  %v3101_v60 = vmax.f32 %v2745_v23, %v2753_v27  ;;  %v2760_v57 = vmax.f32 %v2504_v18, 0.0  ;;  %v2490_v7 = vadd.f32 %v7805_v24, %v2192_v17  ;;  %v8097_v0 = vpop.f32.mrb[95].mxu1  ;;  %v8099_v10 = vpop.f32.mrb[115].mxu0  ;;  %4808 = vmatpush1.bf16.msra.mxu0 %v6591_v20  ;;  %v6611_v17 = vld [vmem:[#allocation5 + $0x2e4] ss:$16 sps:$4 sm:$0xff]  }
 0x37f   :  { %v2969_v11 = vrot.slane %v2968_v15, 4  ;;  %v2989_v32 = vmax.f32 %v2988_v14, %v2739_v6  ;;  %v2505_v29 = vadd.f32 %v7776_v58, %v2207_v28  ;;  %v2491_v21 = vadd.f32 %v7812_v36, %v2193_v19  ;;  %4972 = vmatpush1.bf16.msra.mxu1 %v6594_v25  ;;  %4809 = vmatprep.subr.bf16.mxu0 %v6599_v26  ;;  %v6614_v19 = vld [vmem:[#allocation5 + $0x2ec] ss:$16 sps:$4 sm:$0xff]  }
 0x380   :  { %v3081_v23 = vmax.f32 %v3080_v47, %v2760_v57  ;;  %v2746_v33 = vmax.f32 %v2490_v7, 0.0  ;;  %v2214_v45 = vmul.f32 %v7764_v52, %v8057_v42  ;;  %v2200_v31 = vmul.f32 %v7794_v44, %v8059_v50  ;;  %4973 = vmatprep.subr.bf16.mxu1 %v6602_v8  ;;  %v6603_v42 = vld [vmem:[#allocation5 + $0x2c0] ss:$16 sps:$4 sm:$0xff]  }
 0x381   :  { %v2970_v1 = vmax.f32 %v2968_v15, %v2969_v11  ;;  %v2990_v38 = vrot.slane %v2989_v32, 4  ;;  %v2761_v14 = vmax.f32 %v2505_v29, 0.0  ;;  %v2747_v3 = vmax.f32 %v2491_v21, 0.0 }
 0x382   :  { %v2512_v40 = vadd.f32 %v7772_v4, %v2214_v45  ;;  %v2498_v20 = vadd.f32 %v7805_v24, %v2200_v31  ;;  %v2215_v25 = vmul.f32 %v7768_v53, %v8062_v49  ;;  %v2201_v47 = vmul.f32 %v7800_v51, %v8064_v55  ;;  %4810 = vmatpush1.bf16.msra.mxu0 %v6597_v30  ;;  %v6609_v31 = vld [vmem:[#allocation5 + $0x2e0] ss:$16 sps:$4 sm:$0xff]  }
 0x383   :  { %v2971_v50 = vrot.slane %v2970_v1, 2  ;;  %v2991_v41 = vmax.f32 %v2989_v32, %v2990_v38  ;;  %v3102_v26 = vmax.f32 %v3101_v60, %v2761_v14  ;;  %v2222_v5 = vmul.f32 %v7764_v52, %v1573_v61  ;;  %v1583_v27 = vpop.f32.mrb[96].mxu1  ;;  %v8114_v18 = vpop.f32.mrb[116].mxu0  ;;  %4974 = vmatpush1.bf16.msra.mxu1 %v6600_v54  ;;  %4811 = vmatprep.subr.bf16.mxu0 %v6605_v34  ;;  %v6612_v14 = vld [vmem:[#allocation5 + $0x2e8] ss:$16 sps:$4 sm:$0xff]  }
 0x384   :  { %v2768_v8 = vmax.f32 %v2512_v40, 0.0  ;;  %v2754_v15 = vmax.f32 %v2498_v20, 0.0  ;;  %v2513_v49 = vadd.f32 %v7776_v58, %v2215_v25  ;;  %v2499_v55 = vadd.f32 %v7812_v36, %v2201_v47  ;;  %v8118_v6 = vpop.f32.mrb[97].mxu1  ;;  %v8120_v28 = vpop.f32.mrb[117].mxu0  ;;  %4975 = vmatprep.subr.bf16.mxu1 %v6608_v9  ;;  %v6617_v25 = vld [vmem:[#allocation5 + $0x304] ss:$16 sps:$4 sm:$0xff]  }
 0x385   :  { %v2972_v60 = vmax.f32 %v2970_v1, %v2971_v50  ;;  %v2992_v61 = vrot.slane %v2991_v41, 2  ;;  %v2520_v57 = vadd.f32 %v7772_v4, %v2222_v5  ;;  %v2208_v7 = vmul.f32 %v7794_v44, %v8079_v22  ;;  %v8125_v30 = vpop.f32.mrb[98].mxu1  ;;  %v8127_v11 = vpop.f32.mrb[118].mxu0  ;;  %v6620_v47 = vld [vmem:[#allocation5 + $0x30c] ss:$16 sps:$4 sm:$0xff]  }
 0x386   :  { %v3082_v32 = vmax.f32 %v3081_v23, %v2768_v8  ;;  %v3122_v29 = vmax.f32 %v2746_v33, %v2754_v15  ;;  %v2769_v21 = vmax.f32 %v2513_v49, 0.0  ;;  %v2755_v54 = vmax.f32 %v2499_v55, 0.0  ;;  %v8129_v34 = vpop.f32.mrb[99].mxu1  ;;  %v8131_v45 = vpop.f32.mrb[119].mxu0  ;;  %4812 = vmatpush1.bf16.msra.mxu0 %v6603_v42 }
 0x387   :  { %v2973_v9 = vrot.slane %v2972_v60, 1  ;;  %v8133_v1 = vmax.f32 %v2991_v41, %v2992_v61  ;;  %v2776_v38 = vmax.f32 %v2520_v57, 0.0  ;;  %v2506_v22 = vadd.f32 %v7805_v24, %v2208_v7  ;;  %4976 = vmatpush1.bf16.msra.mxu1 %v6606_v56  ;;  %4813 = vmatprep.subr.bf16.mxu0 %v6611_v17 }
 0x388   :  { %v3103_v40 = vmax.f32 %v3102_v26, %v2769_v21  ;;  %v3143_v23 = vmax.f32 %v2747_v3, %v2755_v54  ;;  %v2223_v33 = vmul.f32 %v7768_v53, %v8084_v16  ;;  %v2209_v20 = vmul.f32 %v7800_v51, %v8086_v39  ;;  %4977 = vmatprep.subr.bf16.mxu1 %v6614_v19  ;;  %v6615_v26 = vld [vmem:[#allocation5 + $0x300] ss:$16 sps:$4 sm:$0xff]   ;;  %v6618_v19 = vld [vmem:[#allocation5 + $0x308] ss:$16 sps:$4 sm:$0xff]  }
 0x389   :  { %v8140_v42 = vmax.f32 %v2972_v60, %v2973_v9  ;;  %v3083_v50 = vmax.f32 %v3082_v32, %v2776_v38  ;;  %v2762_v41 = vmax.f32 %v2506_v22, 0.0  ;;  %v2230_v56 = vmul.f32 %v7764_v52, %v8090_v48  ;;  %v6623_v60 = vld [vmem:[#allocation5 + $0x324] ss:$16 sps:$4 sm:$0xff]  }
 0x38a   :  { %v2521_v5 = vadd.f32 %v7776_v58, %v2223_v33  ;;  %v2507_v3 = vadd.f32 %v7812_v36, %v2209_v20  ;;  %v2216_v16 = vmul.f32 %v7794_v44, %v8092_v37  ;;  %v2231_v39 = vmul.f32 %v7768_v53, %v8097_v0  ;;  %4814 = vmatpush1.bf16.msra.mxu0 %v6609_v31 }
 0x38b   :  { %v3123_v17 = vmax.f32 %v3122_v29, %v2762_v41  ;;  %v2528_v8 = vadd.f32 %v7772_v4, %v2230_v56  ;;  %v2217_v15 = vmul.f32 %v7800_v51, %v8099_v10  ;;  %v2238_v48 = vmul.f32 %v7764_v52, %v1583_v27  ;;  %v1593_v49 = vpop.f32.mrb[100].mxu1  ;;  %v8154_v55 = vpop.f32.mrb[120].mxu0  ;;  %4978 = vmatpush1.bf16.msra.mxu1 %v6612_v14  ;;  %v6626_v10 = vld [vmem:[#allocation5 + $0x32c] ss:$16 sps:$4 sm:$0xff]  }
 0x38c   :  { %v2777_v37 = vmax.f32 %v2521_v5, 0.0  ;;  %v2763_v61 = vmax.f32 %v2507_v3, 0.0  ;;  %v2514_v0 = vadd.f32 %v7805_v24, %v2216_v16  ;;  %v2529_v57 = vadd.f32 %v7776_v58, %v2231_v39  ;;  %v8158_v7 = vpop.f32.mrb[101].mxu1  ;;  %v8160_v32 = vpop.f32.mrb[121].mxu0  ;;  %4815 = vmatprep.subr.bf16.mxu0 %v6617_v25  ;;  %4979 = vmatprep.subr.bf16.mxu1 %v6620_v47  ;;  %v6621_v47 = vld [vmem:[#allocation5 + $0x320] ss:$16 sps:$4 sm:$0xff]  }
 0x38d   :  { %v2784_v27 = vmax.f32 %v2528_v8, 0.0  ;;  %v2515_v29 = vadd.f32 %v7812_v36, %v2217_v15  ;;  %v2536_v21 = vadd.f32 %v7772_v4, %v2238_v48  ;;  %v2224_v54 = vmul.f32 %v7794_v44, %v8114_v18  ;;  %v8166_v31 = vpop.f32.mrb[102].mxu1  ;;  %v8168_v9 = vpop.f32.mrb[122].mxu0  ;;  %v6624_v18 = vld [vmem:[#allocation5 + $0x328] ss:$16 sps:$4 sm:$0xff]  }
 0x38e   :  { %v3104_v38 = vmax.f32 %v3103_v40, %v2777_v37  ;;  %v3144_v22 = vmax.f32 %v3143_v23, %v2763_v61  ;;  %v2770_v14 = vmax.f32 %v2514_v0, 0.0  ;;  %v2785_v33 = vmax.f32 %v2529_v57, 0.0  ;;  %v8170_v20 = vpop.f32.mrb[103].mxu1  ;;  %v8172_v25 = vpop.f32.mrb[123].mxu0  ;;  %4816 = vmatpush1.bf16.msra.mxu0 %v6615_v26  ;;  %v6629_v8 = vld [vmem:[#allocation5 + $0x344] ss:$16 sps:$4 sm:$0xff]  }
 0x38f   :  { %v3084_v41 = vmax.f32 %v3083_v50, %v2784_v27  ;;  %v2771_v56 = vmax.f32 %v2515_v29, 0.0  ;;  %v2792_v5 = vmax.f32 %v2536_v21, 0.0  ;;  %v2522_v3 = vadd.f32 %v7805_v24, %v2224_v54  ;;  %4980 = vmatpush1.bf16.msra.mxu1 %v6618_v19  ;;  %4817 = vmatprep.subr.bf16.mxu0 %v6623_v60  ;;  %v6632_v26 = vld [vmem:[#allocation5 + $0x34c] ss:$16 sps:$4 sm:$0xff]   ;;  %v6630_v29 = vld [vmem:[#allocation5 + $0x348] ss:$16 sps:$4 sm:$0xff]  }
 0x390   :  { %v3124_v16 = vmax.f32 %v3123_v17, %v2770_v14  ;;  %v3105_v39 = vmax.f32 %v3104_v38, %v2785_v33  ;;  %v2239_v40 = vmul.f32 %v7768_v53, %v8118_v6  ;;  %v2225_v23 = vmul.f32 %v7800_v51, %v8120_v28  ;;  %4981 = vmatprep.subr.bf16.mxu1 %v6626_v10  ;;  %v6627_v28 = vld [vmem:[#allocation5 + $0x340] ss:$16 sps:$4 sm:$0xff]   ;;  %v6635_v21 = vld [vmem:[#allocation5 + $0x364] ss:$16 sps:$4 sm:$0xff]  }
 0x391   :  { %v3145_v15 = vmax.f32 %v3144_v22, %v2771_v56  ;;  %v3085_v50 = vmax.f32 %v3084_v41, %v2792_v5  ;;  %v2778_v48 = vmax.f32 %v2522_v3, 0.0  ;;  %v2246_v37 = vmul.f32 %v7764_v52, %v8125_v30 }
 0x392   :  { %v2537_v19 = vadd.f32 %v7776_v58, %v2239_v40  ;;  %v2523_v17 = vadd.f32 %v7812_v36, %v2225_v23  ;;  %v2232_v60 = vmul.f32 %v7794_v44, %v8127_v11  ;;  %v2247_v6 = vmul.f32 %v7768_v53, %v8129_v34  ;;  %4818 = vmatpush1.bf16.msra.mxu0 %v6621_v47 }
 0x393   :  { %v3125_v61 = vmax.f32 %v3124_v16, %v2778_v48  ;;  %v2544_v0 = vadd.f32 %v7772_v4, %v2246_v37  ;;  %v2233_v57 = vmul.f32 %v7800_v51, %v8131_v45  ;;  %v2254_v30 = vmul.f32 %v7764_v52, %v1593_v49  ;;  %v1603_v10 = vpop.f32.mrb[104].mxu1  ;;  %v8191_v27 = vpop.f32.mrb[124].mxu0  ;;  %4982 = vmatpush1.bf16.msra.mxu1 %v6624_v18  ;;  %v6638_v45 = vld [vmem:[#allocation5 + $0x36c] ss:$16 sps:$4 sm:$0xff]  }
 0x394   :  { %v2793_v11 = vmax.f32 %v2537_v19, 0.0  ;;  %v2779_v54 = vmax.f32 %v2523_v17, 0.0  ;;  %v2530_v34 = vadd.f32 %v7805_v24, %v2232_v60  ;;  %v2545_v38 = vadd.f32 %v7776_v58, %v2247_v6  ;;  %v8195_v22 = vpop.f32.mrb[105].mxu1  ;;  %v8197_v14 = vpop.f32.mrb[125].mxu0  ;;  %4819 = vmatprep.subr.bf16.mxu0 %v6629_v8  ;;  %4983 = vmatprep.subr.bf16.mxu1 %v6632_v26  ;;  %v6633_v26 = vld [vmem:[#allocation5 + $0x360] ss:$16 sps:$4 sm:$0xff]  }
 0x395   :  { %v2800_v49 = vmax.f32 %v2544_v0, 0.0  ;;  %v2531_v33 = vadd.f32 %v7812_v36, %v2233_v57  ;;  %v2552_v47 = vadd.f32 %v7772_v4, %v2254_v30  ;;  %v2240_v41 = vmul.f32 %v7794_v44, %v8154_v55  ;;  %v8203_v56 = vpop.f32.mrb[106].mxu1  ;;  %v8205_v5 = vpop.f32.mrb[126].mxu0  ;;  %v6636_v55 = vld [vmem:[#allocation5 + $0x368] ss:$16 sps:$4 sm:$0xff]  }
 0x396   :  { %v3106_v3 = vmax.f32 %v3105_v39, %v2793_v11  ;;  %v3146_v18 = vmax.f32 %v3145_v15, %v2779_v54  ;;  %v2786_v16 = vmax.f32 %v2530_v34, 0.0  ;;  %v2801_v40 = vmax.f32 %v2545_v38, 0.0  ;;  %v8207_v23 = vpop.f32.mrb[107].mxu1  ;;  %v8209_v8 = vpop.f32.mrb[127].mxu0  ;;  %4820 = vmatpush1.bf16.msra.mxu0 %v6627_v28  ;;  %v6641_v0 = vld [vmem:[#allocation5 + $0x384] ss:$16 sps:$4 sm:$0xff]  }
 0x397   :  { %v3086_v48 = vmax.f32 %v3085_v50, %v2800_v49  ;;  %v2787_v37 = vmax.f32 %v2531_v33, 0.0  ;;  %v2808_v19 = vmax.f32 %v2552_v47, 0.0  ;;  %v2538_v17 = vadd.f32 %v7805_v24, %v2240_v41  ;;  %4984 = vmatpush1.bf16.msra.mxu1 %v6630_v29  ;;  %4821 = vmatprep.subr.bf16.mxu0 %v6635_v21  ;;  %v6644_v28 = vld [vmem:[#allocation5 + $0x38c] ss:$16 sps:$4 sm:$0xff]   ;;  %v6642_v33 = vld [vmem:[#allocation5 + $0x388] ss:$16 sps:$4 sm:$0xff]  }
 0x398   :  { %v3126_v60 = vmax.f32 %v3125_v61, %v2786_v16  ;;  %v3107_v6 = vmax.f32 %v3106_v3, %v2801_v40  ;;  %v2255_v39 = vmul.f32 %v7768_v53, %v8158_v7  ;;  %v2241_v15 = vmul.f32 %v7800_v51, %v8160_v32  ;;  %4985 = vmatprep.subr.bf16.mxu1 %v6638_v45  ;;  %v6639_v32 = vld [vmem:[#allocation5 + $0x380] ss:$16 sps:$4 sm:$0xff]   ;;  %v6647_v47 = vld [vmem:[#allocation5 + $0x3a4] ss:$16 sps:$4 sm:$0xff]  }
 0x399   :  { %v3147_v57 = vmax.f32 %v3146_v18, %v2787_v37  ;;  %v3087_v50 = vmax.f32 %v3086_v48, %v2808_v19  ;;  %v2794_v30 = vmax.f32 %v2538_v17, 0.0  ;;  %v2262_v11 = vmul.f32 %v7764_v52, %v8166_v31 }
 0x39a   :  { %v2553_v29 = vadd.f32 %v7776_v58, %v2255_v39  ;;  %v2539_v61 = vadd.f32 %v7812_v36, %v2241_v15  ;;  %v2248_v21 = vmul.f32 %v7794_v44, %v8168_v9  ;;  %v2263_v7 = vmul.f32 %v7768_v53, %v8170_v20  ;;  %4822 = vmatpush1.bf16.msra.mxu0 %v6633_v26 }
 0x39b   :  { %v3127_v54 = vmax.f32 %v3126_v60, %v2794_v30  ;;  %v2560_v34 = vadd.f32 %v7772_v4, %v2262_v11  ;;  %v2249_v38 = vmul.f32 %v7800_v51, %v8172_v25  ;;  %v2270_v31 = vmul.f32 %v7764_v52, %v1603_v10  ;;  %v1613_v45 = vpop.f32.mrb[108].mxu1  ;;  %v8228_v49 = vpop.f32.mrb[128].mxu0  ;;  %4986 = vmatpush1.bf16.msra.mxu1 %v6636_v55  ;;  %v6650_v25 = vld [vmem:[#allocation5 + $0x3ac] ss:$16 sps:$4 sm:$0xff]  }
 0x39c   :  { %v2809_v9 = vmax.f32 %v2553_v29, 0.0  ;;  %v2795_v41 = vmax.f32 %v2539_v61, 0.0  ;;  %v2546_v20 = vadd.f32 %v7805_v24, %v2248_v21  ;;  %v2561_v3 = vadd.f32 %v7776_v58, %v2263_v7  ;;  %v8232_v18 = vpop.f32.mrb[109].mxu1  ;;  %v8234_v16 = vpop.f32.mrb[129].mxu0  ;;  %4823 = vmatprep.subr.bf16.mxu0 %v6641_v0  ;;  %4987 = vmatprep.subr.bf16.mxu1 %v6644_v28  ;;  %v6645_v28 = vld [vmem:[#allocation5 + $0x3a0] ss:$16 sps:$4 sm:$0xff]  }
 0x39d   :  { %v2816_v10 = vmax.f32 %v2560_v34, 0.0  ;;  %v2547_v40 = vadd.f32 %v7812_v36, %v2249_v38  ;;  %v2568_v26 = vadd.f32 %v7772_v4, %v2270_v31  ;;  %v2256_v48 = vmul.f32 %v7794_v44, %v8191_v27  ;;  %v8240_v37 = vpop.f32.mrb[110].mxu1  ;;  %v8242_v19 = vpop.f32.mrb[130].mxu0  ;;  %v6648_v27 = vld [vmem:[#allocation5 + $0x3a8] ss:$16 sps:$4 sm:$0xff]  }
 0x39e   :  { %v3108_v17 = vmax.f32 %v3107_v6, %v2809_v9  ;;  %v3148_v55 = vmax.f32 %v3147_v57, %v2795_v41  ;;  %v2802_v60 = vmax.f32 %v2546_v20, 0.0  ;;  %v2817_v39 = vmax.f32 %v2561_v3, 0.0  ;;  %v8244_v15 = vpop.f32.mrb[111].mxu1  ;;  %v8246_v0 = vpop.f32.mrb[131].mxu0  ;;  %4824 = vmatpush1.bf16.msra.mxu0 %v6639_v32  ;;  %v6653_v34 = vld [vmem:[#allocation5 + $0x3c4] ss:$16 sps:$4 sm:$0xff]  }
 0x39f   :  { %v3088_v30 = vmax.f32 %v3087_v50, %v2816_v10  ;;  %v2803_v11 = vmax.f32 %v2547_v40, 0.0  ;;  %v2824_v29 = vmax.f32 %v2568_v26, 0.0  ;;  %v2554_v61 = vadd.f32 %v7805_v24, %v2256_v48  ;;  %4988 = vmatpush1.bf16.msra.mxu1 %v6642_v33  ;;  %4825 = vmatprep.subr.bf16.mxu0 %v6647_v47  ;;  %v6656_v32 = vld [vmem:[#allocation5 + $0x3cc] ss:$16 sps:$4 sm:$0xff]   ;;  %v6654_v40 = vld [vmem:[#allocation5 + $0x3c8] ss:$16 sps:$4 sm:$0xff]  }
 0x3a0   :  { %v3128_v21 = vmax.f32 %v3127_v54, %v2802_v60  ;;  %v3109_v7 = vmax.f32 %v3108_v17, %v2817_v39  ;;  %v2271_v6 = vmul.f32 %v7768_v53, %v8195_v22  ;;  %v2257_v57 = vmul.f32 %v7800_v51, %v8197_v14  ;;  %4989 = vmatprep.subr.bf16.mxu1 %v6650_v25  ;;  %v6651_v14 = vld [vmem:[#allocation5 + $0x3c0] ss:$16 sps:$4 sm:$0xff]   ;;  %v6659_v26 = vld [vmem:[#allocation5 + $0x3e4] ss:$16 sps:$4 sm:$0xff]  }
 0x3a1   :  { %v3149_v38 = vmax.f32 %v3148_v55, %v2803_v11  ;;  %v3089_v50 = vmax.f32 %v3088_v30, %v2824_v29  ;;  %v2810_v31 = vmax.f32 %v2554_v61, 0.0  ;;  %v2278_v9 = vmul.f32 %v7764_v52, %v8203_v56 }
 0x3a2   :  { %v2569_v33 = vadd.f32 %v7776_v58, %v2271_v6  ;;  %v2555_v54 = vadd.f32 %v7812_v36, %v2257_v57  ;;  %v2264_v47 = vmul.f32 %v7794_v44, %v8205_v5  ;;  %v2279_v22 = vmul.f32 %v7768_v53, %v8207_v23  ;;  %4826 = vmatpush1.bf16.msra.mxu0 %v6645_v28 }
 0x3a3   :  { %v3129_v41 = vmax.f32 %v3128_v21, %v2810_v31  ;;  %v2576_v20 = vadd.f32 %v7772_v4, %v2278_v9  ;;  %v2265_v3 = vmul.f32 %v7800_v51, %v8209_v8  ;;  %v2286_v56 = vmul.f32 %v7764_v52, %v1613_v45  ;;  %v1623_v25 = vpop.f32.mrb[112].mxu1  ;;  %v8265_v10 = vpop.f32.mrb[132].mxu0  ;;  %4990 = vmatpush1.bf16.msra.mxu1 %v6648_v27  ;;  %v6662_v8 = vld [vmem:[#allocation5 + $0x3ec] ss:$16 sps:$4 sm:$0xff]  }
 0x3a4   :  { %v2825_v5 = vmax.f32 %v2569_v33, 0.0  ;;  %v2811_v48 = vmax.f32 %v2555_v54, 0.0  ;;  %v2562_v23 = vadd.f32 %v7805_v24, %v2264_v47  ;;  %v2577_v17 = vadd.f32 %v7776_v58, %v2279_v22  ;;  %v8269_v55 = vpop.f32.mrb[113].mxu1  ;;  %v8271_v60 = vpop.f32.mrb[133].mxu0  ;;  %4827 = vmatprep.subr.bf16.mxu0 %v6653_v34  ;;  %4991 = vmatprep.subr.bf16.mxu1 %v6656_v32  ;;  %v6657_v32 = vld [vmem:[#allocation5 + $0x3e0] ss:$16 sps:$4 sm:$0xff]  }
 0x3a5   :  { %v2832_v45 = vmax.f32 %v2576_v20, 0.0  ;;  %v2563_v39 = vadd.f32 %v7812_v36, %v2265_v3  ;;  %v2584_v28 = vadd.f32 %v7772_v4, %v2286_v56  ;;  %v2272_v30 = vmul.f32 %v7794_v44, %v8228_v49  ;;  %v8277_v11 = vpop.f32.mrb[114].mxu1  ;;  %v8279_v29 = vpop.f32.mrb[134].mxu0  ;;  %v6660_v49 = vld [vmem:[#allocation5 + $0x3e8] ss:$16 sps:$4 sm:$0xff]  }
 0x3a6   :  { %v3110_v61 = vmax.f32 %v3109_v7, %v2825_v5  ;;  %v3150_v27 = vmax.f32 %v3149_v38, %v2811_v48  ;;  %v2818_v21 = vmax.f32 %v2562_v23, 0.0  ;;  %v2833_v6 = vmax.f32 %v2577_v17, 0.0  ;;  %v8281_v57 = vpop.f32.mrb[115].mxu1  ;;  %v8283_v34 = vpop.f32.mrb[135].mxu0  ;;  %4828 = vmatpush1.bf16.msra.mxu0 %v6651_v14  ;;  %v6665_v20 = vld [vmem:[#allocation5 + $0x404] ss:$16 sps:$4 sm:$0xff]  }
 0x3a7   :  { %v3090_v31 = vmax.f32 %v3089_v50, %v2832_v45  ;;  %v2819_v9 = vmax.f32 %v2563_v39, 0.0  ;;  %v2840_v33 = vmax.f32 %v2584_v28, 0.0  ;;  %v2570_v54 = vadd.f32 %v7805_v24, %v2272_v30  ;;  %4992 = vmatpush1.bf16.msra.mxu1 %v6654_v40  ;;  %4829 = vmatprep.subr.bf16.mxu0 %v6659_v26  ;;  %v6668_v14 = vld [vmem:[#allocation5 + $0x40c] ss:$16 sps:$4 sm:$0xff]  }
 0x3a8   :  { %v3130_v47 = vmax.f32 %v3129_v41, %v2818_v21  ;;  %v3111_v22 = vmax.f32 %v3110_v61, %v2833_v6  ;;  %v2287_v7 = vmul.f32 %v7768_v53, %v8232_v18  ;;  %v2273_v38 = vmul.f32 %v7800_v51, %v8234_v16  ;;  %4993 = vmatprep.subr.bf16.mxu1 %v6662_v8 }
 0x3a9   :  { %v3151_v3 = vmax.f32 %v3150_v27, %v2819_v9  ;;  %v3091_v50 = vmax.f32 %v3090_v31, %v2840_v33  ;;  %v2826_v56 = vmax.f32 %v2570_v54, 0.0  ;;  %v2294_v5 = vmul.f32 %v7764_v52, %v8240_v37 }
 0x3aa   :  { %v2585_v40 = vadd.f32 %v7776_v58, %v2287_v7  ;;  %v2571_v41 = vadd.f32 %v7812_v36, %v2273_v38  ;;  %v2280_v26 = vmul.f32 %v7794_v44, %v8242_v19  ;;  %v2295_v18 = vmul.f32 %v7768_v53, %v8244_v15  ;;  %4830 = vmatpush1.bf16.msra.mxu0 %v6657_v32 }
 0x3ab   :  { %v3131_v16 = vmax.f32 %v3130_v47, %v2826_v56  ;;  %v2592_v48 = vadd.f32 %v7772_v4, %v2294_v5  ;;  %v2281_v23 = vmul.f32 %v7800_v51, %v8246_v0  ;;  %v2302_v17 = vmul.f32 %v7764_v52, %v1623_v25  ;;  %v1816_v37 = vpop.f32.mrb[136].mxu0  ;;  %v1859_v8 = vpop.f32.mrb[116].mxu1  ;;  %4994 = vmatpush1.bf16.msra.mxu1 %v6660_v49 }
 0x3ac   :  { %v2841_v45 = vmax.f32 %v2585_v40, 0.0  ;;  %v2827_v39 = vmax.f32 %v2571_v41, 0.0  ;;  %v2578_v28 = vadd.f32 %v7805_v24, %v2280_v26  ;;  %v2593_v19 = vadd.f32 %v7776_v58, %v2295_v18  ;;  %v1818_v30 = vpop.f32.mrb[137].mxu0  ;;  %v8304_v15 = vpop.f32.mrb[117].mxu1  ;;  %4840 = vmatprep.subr.bf16.mxu0 %v6665_v20  ;;  %5004 = vmatprep.subr.bf16.mxu1 %v6668_v14 }
 0x3ad   :  { %v2848_v61 = vmax.f32 %v2592_v48, 0.0  ;;  %v2579_v27 = vadd.f32 %v7812_v36, %v2281_v23  ;;  %v2600_v0 = vadd.f32 %v7772_v4, %v2302_v17  ;;  %v2288_v25 = vmul.f32 %v7794_v44, %v8265_v10  ;;  %v8310_v21 = vpop.f32.mrb[138].mxu0  ;;  %v8312_v6 = vpop.f32.mrb[118].mxu1 }
 0x3ae   :  { %v3112_v32 = vmax.f32 %v3111_v22, %v2841_v45  ;;  %v3152_v31 = vmax.f32 %v3151_v3, %v2827_v39  ;;  %v2834_v9 = vmax.f32 %v2578_v28, 0.0  ;;  %v2849_v33 = vmax.f32 %v2593_v19, 0.0  ;;  %v8314_v54 = vpop.f32.mrb[139].mxu0  ;;  %v8316_v49 = vpop.f32.mrb[119].mxu1 }
 0x3af   :  { %v3092_v47 = vmax.f32 %v3091_v50, %v2848_v61  ;;  %v2835_v7 = vmax.f32 %v2579_v27, 0.0  ;;  %v2856_v38 = vmax.f32 %v2600_v0, 0.0  ;;  %v2586_v20 = vadd.f32 %v7805_v24, %v2288_v25 }
 0x3b0   :  { %v3132_v14 = vmax.f32 %v3131_v16, %v2834_v9  ;;  %v3113_v56 = vmax.f32 %v3112_v32, %v2849_v33  ;;  %v2303_v10 = vmul.f32 %v7768_v53, %v8269_v55  ;;  %v2289_v22 = vmul.f32 %v7800_v51, %v8271_v60 }
 0x3b1   :  { %v3153_v3 = vmax.f32 %v3152_v31, %v2835_v7  ;;  %v3093_v5 = vmax.f32 %v3092_v47, %v2856_v38  ;;  %v2842_v40 = vmax.f32 %v2586_v20, 0.0  ;;  %v2310_v41 = vmul.f32 %v7764_v52, %v8277_v11  ;;  %v6968_v7 = vld [vmem:[%s8626_s9] sm:$0xff] }
 0x3b2   :  { %v2601_v50 = vadd.f32 %v7776_v58, %v2303_v10  ;;  %v2587_v26 = vadd.f32 %v7812_v36, %v2289_v22  ;;  %v2296_v18 = vmul.f32 %v7794_v44, %v8279_v29  ;;  %v2311_v16 = vmul.f32 %v7768_v53, %v8281_v57 }
 0x3b3   :  { %v3133_v55 = vmax.f32 %v3132_v14, %v2842_v40  ;;  %v2608_v48 = vadd.f32 %v7772_v4, %v2310_v41  ;;  %v2297_v60 = vmul.f32 %v7800_v51, %v8283_v34  ;;  %v2304_v23 = vmul.f32 %v7794_v44, %v1816_v37  ;;  %v1869_v17 = vpop.f32.mrb[120].mxu1  ;;  %v6967_v4 = vld [vmem:[%s8625_s8] sm:$0xff] }
 0x3b4   :  { %v2857_v52 = vmax.f32 %v2601_v50, 0.0  ;;  %v2843_v11 = vmax.f32 %v2587_v26, 0.0  ;;  %v2594_v45 = vadd.f32 %v7805_v24, %v2296_v18  ;;  %v2609_v39 = vadd.f32 %v7776_v58, %v2311_v16  ;;  %v1871_v28 = vpop.f32.mrb[121].mxu1 }
 0x3b5   :  { %v2864_v29 = vmax.f32 %v2608_v48, 0.0  ;;  %v2595_v19 = vadd.f32 %v7812_v36, %v2297_v60  ;;  %v2602_v53 = vadd.f32 %v7805_v24, %v2304_v23  ;;  %v8344_v57 = vrot.slane %v6967_v4, %v2046_v43  ;;  %v1873_v34 = vpop.f32.mrb[122].mxu1 }
 0x3b6   :  { %v3114_v37 = vmax.f32 %v3113_v56, %v2857_v52  ;;  %v3154_v61 = vmax.f32 %v3153_v3, %v2843_v11  ;;  %v2850_v27 = vmax.f32 %v2594_v45, 0.0  ;;  %v2865_v0 = vmax.f32 %v2609_v39, 0.0  ;;  %v1875_v58 = vpop.f32.mrb[123].mxu1 }
 0x3b7   :  { %v3094_v25 = vmax.f32 %v3093_v5, %v2864_v29  ;;  %v2851_v32 = vmax.f32 %v2595_v19, 0.0  ;;  %v2858_v31 = vmax.f32 %v2602_v53, 0.0  ;;  %v2066_v9 = vmul.f32 %v8344_v57, %v1859_v8 }
 0x3b8   :  { %v3134_v33 = vmax.f32 %v3133_v55, %v2850_v27  ;;  %v3115_v47 = vmax.f32 %v3114_v37, %v2865_v0  ;;  %v8352_v38 = vrot.slane %v6968_v7, %v2046_v43  ;;  %v2305_v20 = vmul.f32 %v7800_v51, %v1818_v30 }
 0x3b9   :  { %v3095_v14 = vrot.slane %v3094_v25, 4  ;;  %v3155_v56 = vmax.f32 %v3154_v61, %v2851_v32  ;;  %v8357_v10 = vrot.slane %v6967_v4, %v2050_v12  ;;  %v8361_v8 = vrot.slane %v6968_v7, %v2050_v12 }
 0x3ba   :  { %v3116_v22 = vrot.slane %v3115_v47, 4  ;;  %v3135_v3 = vmax.f32 %v3134_v33, %v2858_v31  ;;  %v2364_v5 = vadd.f32 %v8352_v38, %v2066_v9  ;;  %v2603_v40 = vadd.f32 %v7812_v36, %v2305_v20 }
 0x3bb   :  { %v3096_v43 = vmax.f32 %v3094_v25, %v3095_v14  ;;  %v2067_v30 = vmul.f32 %v8357_v10, %v8304_v15  ;;  %v2312_v41 = vmul.f32 %v7794_v44, %v8310_v21  ;;  %v2074_v50 = vmul.f32 %v8344_v57, %v8312_v6  ;;  %v1879_v26 = vpop.f32.mrb[124].mxu1 }
 0x3bc   :  { %v3117_v62 = vmax.f32 %v3115_v47, %v3116_v22  ;;  %v2620_v12 = vmax.f32 %v2364_v5, 0.0  ;;  %v2859_v18 = vmax.f32 %v2603_v40, 0.0  ;;  %v2313_v16 = vmul.f32 %v7800_v51, %v8314_v54  ;;  %v1881_v55 = vpop.f32.mrb[125].mxu1 }
 0x3bd   :  { %v3097_v48 = vrot.slane %v3096_v43, 2  ;;  %v2365_v60 = vadd.f32 %v8361_v8, %v2067_v30  ;;  %v2610_v23 = vadd.f32 %v7805_v24, %v2312_v41  ;;  %v2372_v15 = vadd.f32 %v8352_v38, %v2074_v50  ;;  %v1883_v52 = vpop.f32.mrb[126].mxu1 }
 0x3be   :  { %v3118_v44 = vrot.slane %v3117_v62, 2  ;;  %v3156_v21 = vmax.f32 %v3155_v56, %v2859_v18  ;;  %v2611_v6 = vadd.f32 %v7812_v36, %v2313_v16  ;;  %v2075_v11 = vmul.f32 %v8357_v10, %v8316_v49  ;;  %v1885_v45 = vpop.f32.mrb[127].mxu1 }
 0x3bf   :  { %v3098_v39 = vmax.f32 %v3096_v43, %v3097_v48  ;;  %v2621_v29 = vmax.f32 %v2365_v60, 0.0  ;;  %v2866_v51 = vmax.f32 %v2610_v23, 0.0  ;;  %v2628_v54 = vmax.f32 %v2372_v15, 0.0 }
 0x3c0   :  { %v3119_v19 = vmax.f32 %v3117_v62, %v3118_v44  ;;  %v2867_v53 = vmax.f32 %v2611_v6, 0.0  ;;  %v2373_v4 = vadd.f32 %v8361_v8, %v2075_v11  ;;  %v2082_v24 = vmul.f32 %v8344_v57, %v1869_v17 }
 0x3c1   :  { %v3099_v37 = vrot.slane %v3098_v39, 1  ;;  %v3136_v61 = vmax.f32 %v3135_v3, %v2866_v51  ;;  %v2996_v27 = vmax.f32 %v2620_v12, %v2628_v54  ;;  %v2083_v0 = vmul.f32 %v8357_v10, %v1871_v28 }
 0x3c2   :  { %v3157_v36 = vmax.f32 %v3156_v21, %v2867_v53  ;;  %v2629_v25 = vmax.f32 %v2373_v4, 0.0  ;;  %v2380_v49 = vadd.f32 %v8352_v38, %v2082_v24  ;;  %v2090_v32 = vmul.f32 %v8344_v57, %v1873_v34 }
 0x3c3   :  { %v3100_v31 = vmax.f32 %v3098_v39, %v3099_v37  ;;  %v3137_v9 = vrot.slane %v3136_v61, 4  ;;  %v2381_v33 = vadd.f32 %v8361_v8, %v2083_v0  ;;  %v2091_v47 = vmul.f32 %v8357_v10, %v1875_v58  ;;  %v1889_v7 = vpop.f32.mrb[128].mxu1 }
 0x3c4   :  { %v3158_v20 = vrot.slane %v3157_v36, 4  ;;  %v3017_v17 = vmax.f32 %v2621_v29, %v2629_v25  ;;  %v2636_v14 = vmax.f32 %v2380_v49, 0.0  ;;  %v2388_v56 = vadd.f32 %v8352_v38, %v2090_v32  ;;  %v1891_v22 = vpop.f32.mrb[129].mxu1 }
 0x3c5   :  { %v3138_v28 = vmax.f32 %v3136_v61, %v3137_v9  ;;  %v2637_v3 = vmax.f32 %v2381_v33, 0.0  ;;  %v2389_v5 = vadd.f32 %v8361_v8, %v2091_v47  ;;  %v2098_v40 = vmul.f32 %v8344_v57, %v1879_v26  ;;  %v1893_v34 = vpop.f32.mrb[130].mxu1 }
 0x3c6   :  { %v3159_v43 = vmax.f32 %v3157_v36, %v3158_v20  ;;  %v2997_v30 = vmax.f32 %v2996_v27, %v2636_v14  ;;  %v2644_v41 = vmax.f32 %v2388_v56, 0.0  ;;  %v2099_v50 = vmul.f32 %v8357_v10, %v1881_v55  ;;  %v1895_v58 = vpop.f32.mrb[131].mxu1 }
 0x3c7   :  { %v3139_v62 = vrot.slane %v3138_v28, 2  ;;  %v3018_v12 = vmax.f32 %v3017_v17, %v2637_v3  ;;  %v2645_v18 = vmax.f32 %v2389_v5, 0.0  ;;  %v2396_v16 = vadd.f32 %v8352_v38, %v2098_v40  ;;  %v6674_v40 = vld [vmem:[#allocation5 + $0x42c] ss:$16 sps:$4 sm:$0xff]  }
 0x3c8   :  { %v3160_v48 = vrot.slane %v3159_v43, 2  ;;  %v2998_v60 = vmax.f32 %v2997_v30, %v2644_v41  ;;  %v2397_v23 = vadd.f32 %v8361_v8, %v2099_v50  ;;  %v2106_v15 = vmul.f32 %v8344_v57, %v1883_v52 }
 0x3c9   :  { %v3140_v44 = vmax.f32 %v3138_v28, %v3139_v62  ;;  %v3019_v26 = vmax.f32 %v3018_v12, %v2645_v18  ;;  %v2652_v21 = vmax.f32 %v2396_v16, 0.0  ;;  %v2107_v6 = vmul.f32 %v8357_v10, %v1885_v45  ;;  %v6663_v28 = vld [vmem:[#allocation5 + $0x400] ss:$16 sps:$4 sm:$0xff]  }
 0x3ca   :  { %v3161_v11 = vmax.f32 %v3159_v43, %v3160_v48  ;;  %v2653_v39 = vmax.f32 %v2397_v23, 0.0  ;;  %v2404_v55 = vadd.f32 %v8352_v38, %v2106_v15  ;;  %v2952_v29 = vrot.slane %v8076_v46, 1  ;;  %v6672_v15 = vld [vmem:[#allocation5 + $0x428] ss:$16 sps:$4 sm:$0xff]  }
 0x3cb   :  { %v3141_v51 = vrot.slane %v3140_v44, 1  ;;  %v2999_v54 = vmax.f32 %v2998_v60, %v2652_v21  ;;  %v2405_v53 = vadd.f32 %v8361_v8, %v2107_v6  ;;  %v3120_v4 = vrot.slane %v3119_v19, 1  ;;  %v1899_v24 = vpop.f32.mrb[132].mxu1 }
 0x3cc   :  { %v3020_v37 = vmax.f32 %v3019_v26, %v2653_v39  ;;  %v2660_v61 = vmax.f32 %v2404_v55, 0.0  ;;  %v2953_v52 = vmax.f32 %v8076_v46, %v2952_v29  ;;  %v3208_v27 = vsel %vm200_vm0, %v8094_v59, %v3100_v31  ;;  %v1901_v45 = vpop.f32.mrb[133].mxu1  ;;  %v6677_v39 = vld [vmem:[#allocation5 + $0x444] ss:$16 sps:$4 sm:$0xff]  }
 0x3cd   :  { %v8400_v0 = vmax.f32 %v3140_v44, %v3141_v51  ;;  %v2661_v36 = vmax.f32 %v2405_v53, 0.0  ;;  %v3121_v25 = vmax.f32 %v3119_v19, %v3120_v4  ;;  %v3216_v49 = vpack.c.bf16 %v3208_v27, %v3208_v27  ;;  %v1903_v32 = vpop.f32.mrb[134].mxu1  ;;  %v6666_v19 = vld [vmem:[#allocation5 + $0x408] ss:$16 sps:$4 sm:$0xff]  }
 0x3ce   :  { %v3000_v9 = vmax.f32 %v2999_v54, %v2660_v61  ;;  %v2114_v33 = vmul.f32 %v8344_v57, %v1889_v7  ;;  %v2115_v47 = vmul.f32 %v8357_v10, %v1891_v22  ;;  %v2122_v20 = vmul.f32 %v8344_v57, %v1893_v34  ;;  %v1905_v17 = vpop.f32.mrb[135].mxu1  ;;  %v6671_v22 = vld [vmem:[#allocation5 + $0x424] ss:$16 sps:$4 sm:$0xff]  }
 0x3cf   :  { %v3021_v14 = vmax.f32 %v3020_v37, %v2661_v36  ;;  %v3209_v46 = vsel %vm200_vm0, %v2953_v52, %v3121_v25  ;;  %v2123_v59 = vmul.f32 %v8357_v10, %v1895_v58  ;;  %v2994_v31 = vrot.slane %v8133_v1, 1  ;;  %v6680_v37 = vld [vmem:[#allocation5 + $0x44c] ss:$16 sps:$4 sm:$0xff]  }
 0x3d0   :  { %v3217_v56 = vpack.c.bf16 %v3209_v46, %v3209_v46  ;;  %v2412_v3 = vadd.f32 %v8352_v38, %v2114_v33  ;;  %v2413_v5 = vadd.f32 %v8361_v8, %v2115_v47  ;;  %v2420_v7 = vadd.f32 %v8352_v38, %v2122_v20  ;;  %v6683_v20 = vld [vmem:[#allocation5 + $0x464] ss:$16 sps:$4 sm:$0xff]  }
 0x3d1   :  { %v2421_v34 = vadd.f32 %v8361_v8, %v2123_v59  ;;  %v2995_v43 = vmax.f32 %v8133_v1, %v2994_v31  ;;  %v3162_v30 = vrot.slane %v3161_v11, 1  ;;  %v2130_v41 = vmul.f32 %v8344_v57, %v1899_v24  ;;  %v6669_v1 = vld [vmem:[#allocation5 + $0x420] ss:$16 sps:$4 sm:$0xff]  }
 0x3d2   :  { %4831 = vmatprep.mubr.bf16.mxu0 %v3217_v56  ;;  %4995 = vmatprep.mubr.bf16.mxu1 %v3217_v56  ;;  %v2668_v50 = vmax.f32 %v2412_v3, 0.0  ;;  %v2669_v58 = vmax.f32 %v2413_v5, 0.0  ;;  %v2676_v62 = vmax.f32 %v2420_v7, 0.0  ;;  %v2131_v12 = vmul.f32 %v8357_v10, %v1901_v45 }
 0x3d3   :  { %4832 = vmatmul.mubr.bf16.vlgmr.msra.gmra.mrb[140].mxu0 %v3216_v49  ;;  %4996 = vmatmul.mubr.bf16.vlgmr.msra.gmra.mrb[180].mxu1 %v3216_v49  ;;  %v2677_v18 = vmax.f32 %v2421_v34, 0.0  ;;  %v3163_v16 = vmax.f32 %v3161_v11, %v3162_v30  ;;  %v2428_v48 = vadd.f32 %v8352_v38, %v2130_v41  ;;  %v2138_v60 = vmul.f32 %v8344_v57, %v1903_v32  ;;  %v1909_v23 = vpop.f32.mrb[136].mxu1  ;;  %v6675_v49 = vld [vmem:[#allocation5 + $0x440] ss:$16 sps:$4 sm:$0xff]   ;;  %v6678_v32 = vld [vmem:[#allocation5 + $0x448] ss:$16 sps:$4 sm:$0xff]  }
 0x3d4   :  { %4841 = vmatpush1.bf16.msra.mxu0 %v6663_v28  ;;  %5005 = vmatpush1.bf16.msra.mxu1 %v6666_v19  ;;  %v3001_v44 = vmax.f32 %v3000_v9, %v2668_v50  ;;  %v3022_v26 = vmax.f32 %v3021_v14, %v2669_v58  ;;  %v2429_v21 = vadd.f32 %v8361_v8, %v2131_v12  ;;  %v1911_v6 = vpop.f32.mrb[137].mxu1  ;;  %v6681_v34 = vld [vmem:[#allocation5 + $0x460] ss:$16 sps:$4 sm:$0xff]   ;;  %v6689_v58 = vld [vmem:[#allocation5 + $0x484] ss:$16 sps:$4 sm:$0xff]  }
 0x3d5   :  { %4842 = vmatprep.subr.bf16.mxu0 %v6671_v22  ;;  %5006 = vmatprep.subr.bf16.mxu1 %v6674_v40  ;;  %v3211_v55 = vsel %vm200_vm0, %v2995_v43, %v3163_v16  ;;  %v2684_v11 = vmax.f32 %v2428_v48, 0.0  ;;  %v2436_v29 = vadd.f32 %v8352_v38, %v2138_v60  ;;  %v2139_v51 = vmul.f32 %v8357_v10, %v1905_v17  ;;  %v1913_v54 = vpop.f32.mrb[138].mxu1  ;;  %v6686_v17 = vld [vmem:[#allocation5 + $0x46c] ss:$16 sps:$4 sm:$0xff]   ;;  %v6684_v43 = vld [vmem:[#allocation5 + $0x468] ss:$16 sps:$4 sm:$0xff]  }
 0x3d6   :  { %v3002_v53 = vmax.f32 %v3001_v44, %v2676_v62  ;;  %v3023_v4 = vmax.f32 %v3022_v26, %v2677_v18  ;;  %v3219_v24 = vpack.c.bf16 %v3211_v55, %v3211_v55  ;;  %v2685_v61 = vmax.f32 %v2429_v21, 0.0  ;;  %v1915_v52 = vpop.f32.mrb[139].mxu1  ;;  %v6692_v62 = vld [vmem:[#allocation5 + $0x48c] ss:$16 sps:$4 sm:$0xff]   ;;  %v6687_v21 = vld [vmem:[#allocation5 + $0x480] ss:$16 sps:$4 sm:$0xff]  }
 0x3d7   :  { %v2692_v27 = vmax.f32 %v2436_v29, 0.0  ;;  %v2437_v45 = vadd.f32 %v8361_v8, %v2139_v51  ;;  %v2146_v36 = vmul.f32 %v8344_v57, %v1909_v23  ;;  %v2147_v25 = vmul.f32 %v8357_v10, %v1911_v6  ;;  %v6690_v6 = vld [vmem:[#allocation5 + $0x488] ss:$16 sps:$4 sm:$0xff]   ;;  %v6698_v29 = vld [vmem:[#allocation5 + $0x4ac] ss:$16 sps:$4 sm:$0xff]  }
 0x3d8   :  { %4843 = vmatpush1.bf16.msra.mxu0 %v6669_v1  ;;  %5007 = vmatpush1.bf16.msra.mxu1 %v6672_v15  ;;  %v3003_v9 = vmax.f32 %v3002_v53, %v2684_v11  ;;  %v3024_v33 = vmax.f32 %v3023_v4, %v2685_v61  ;;  %v2154_v47 = vmul.f32 %v8344_v57, %v1913_v54  ;;  %v6695_v11 = vld [vmem:[#allocation5 + $0x4a4] ss:$16 sps:$4 sm:$0xff]  }
 0x3d9   :  { %4844 = vmatprep.subr.bf16.mxu0 %v6677_v39  ;;  %4872 = vmatprep.mubr.bf16.mxu0 %v3219_v24  ;;  %v2693_v14 = vmax.f32 %v2437_v45, 0.0  ;;  %v2444_v46 = vadd.f32 %v8352_v38, %v2146_v36  ;;  %v2445_v59 = vadd.f32 %v8361_v8, %v2147_v25  ;;  %v2155_v31 = vmul.f32 %v8357_v10, %v1915_v52  ;;  %v6693_v52 = vld [vmem:[#allocation5 + $0x4a0] ss:$16 sps:$4 sm:$0xff]  }
 0x3da   :  { %5008 = vmatprep.subr.bf16.mxu1 %v6680_v37  ;;  %5036 = vmatprep.mubr.bf16.mxu1 %v3219_v24  ;;  %v3004_v56 = vmax.f32 %v3003_v9, %v2692_v27  ;;  %v2452_v28 = vadd.f32 %v8352_v38, %v2154_v47  ;;  %v8432_v19 = vsel %vm200_vm0, %v8140_v42, %v8400_v0  ;;  %v6696_v27 = vld [vmem:[#allocation5 + $0x4a8] ss:$16 sps:$4 sm:$0xff]  }
 0x3db   :  { %v3025_v3 = vmax.f32 %v3024_v33, %v2693_v14  ;;  %v2700_v5 = vmax.f32 %v2444_v46, 0.0  ;;  %v2701_v7 = vmax.f32 %v2445_v59, 0.0  ;;  %v2453_v22 = vadd.f32 %v8361_v8, %v2155_v31  ;;  %v1919_v40 = vpop.f32.mrb[140].mxu1  ;;  %v6699_v31 = vld [vmem:[#allocation5 + $0x4c0] ss:$16 sps:$4 sm:$0xff]  }
 0x3dc   :  { %4845 = vmatpush1.bf16.msra.mxu0 %v6675_v49  ;;  %5009 = vmatpush1.bf16.msra.mxu1 %v6678_v32  ;;  %v2708_v30 = vmax.f32 %v2452_v28, 0.0  ;;  %v2162_v41 = vmul.f32 %v8344_v57, %v1919_v40  ;;  %v1921_v50 = vpop.f32.mrb[141].mxu1  ;;  %v6701_v49 = vld [vmem:[#allocation5 + $0x4c4] ss:$16 sps:$4 sm:$0xff]   ;;  %v6704_v32 = vld [vmem:[#allocation5 + $0x4cc] ss:$16 sps:$4 sm:$0xff]  }
 0x3dd   :  { %4846 = vmatprep.subr.bf16.mxu0 %v6683_v20  ;;  %5010 = vmatprep.subr.bf16.mxu1 %v6686_v17  ;;  %v3005_v42 = vmax.f32 %v3004_v56, %v2700_v5  ;;  %v3026_v0 = vmax.f32 %v3025_v3, %v2701_v7  ;;  %v2709_v12 = vmax.f32 %v2453_v22, 0.0  ;;  %v2163_v18 = vmul.f32 %v8357_v10, %v1921_v50  ;;  %v1923_v16 = vpop.f32.mrb[142].mxu1  ;;  %v6702_v56 = vld [vmem:[#allocation5 + $0x4c8] ss:$16 sps:$4 sm:$0xff]   ;;  %v6707_v5 = vld [vmem:[#allocation5 + $0x4e4] ss:$16 sps:$4 sm:$0xff]  }
 0x3de   :  { %v2460_v48 = vadd.f32 %v8352_v38, %v2162_v41  ;;  %v2170_v60 = vmul.f32 %v8344_v57, %v1923_v16  ;;  %v1925_v23 = vpop.f32.mrb[143].mxu1  ;;  %v6710_v7 = vld [vmem:[#allocation5 + $0x4ec] ss:$16 sps:$4 sm:$0xff]  }
 0x3df   :  { %v3006_v1 = vmax.f32 %v3005_v42, %v2708_v30  ;;  %v3027_v15 = vmax.f32 %v3026_v0, %v2709_v12  ;;  %v2461_v44 = vadd.f32 %v8361_v8, %v2163_v18  ;;  %v2171_v26 = vmul.f32 %v8357_v10, %v1925_v23  ;;  %v6713_v18 = vld [vmem:[#allocation5 + $0x504] ss:$16 sps:$4 sm:$0xff]   ;;  %v6716_v16 = vld [vmem:[#allocation5 + $0x50c] ss:$16 sps:$4 sm:$0xff]  }
 0x3e0   :  { %4847 = vmatpush1.bf16.msra.mxu0 %v6681_v34  ;;  %5011 = vmatpush1.bf16.msra.mxu1 %v6684_v43  ;;  %v2716_v39 = vmax.f32 %v2460_v48, 0.0  ;;  %v2468_v55 = vadd.f32 %v8352_v38, %v2170_v60 }
 0x3e1   :  { %4848 = vmatprep.subr.bf16.mxu0 %v6689_v58  ;;  %5012 = vmatprep.subr.bf16.mxu1 %v6692_v62  ;;  %v2717_v51 = vmax.f32 %v2461_v44, 0.0  ;;  %v2469_v54 = vadd.f32 %v8361_v8, %v2171_v26  ;;  %v6705_v58 = vld [vmem:[#allocation5 + $0x4e0] ss:$16 sps:$4 sm:$0xff]   ;;  %v6708_v62 = vld [vmem:[#allocation5 + $0x4e8] ss:$16 sps:$4 sm:$0xff]  }
 0x3e2   :  { %v3007_v53 = vmax.f32 %v3006_v1, %v2716_v39  ;;  %v2724_v4 = vmax.f32 %v2468_v55, 0.0  ;;  %v6714_v39 = vld [vmem:[#allocation5 + $0x508] ss:$16 sps:$4 sm:$0xff]  }
 0x3e3   :  { %v3028_v24 = vmax.f32 %v3027_v15, %v2717_v51  ;;  %v2725_v37 = vmax.f32 %v2469_v54, 0.0  ;;  %v1929_v61 = vpop.f32.mrb[144].mxu1 }
 0x3e4   :  { %4849 = vmatpush1.bf16.msra.mxu0 %v6687_v21  ;;  %5013 = vmatpush1.bf16.msra.mxu1 %v6690_v6  ;;  %v3008_v45 = vmax.f32 %v3007_v53, %v2724_v4  ;;  %v2178_v36 = vmul.f32 %v8344_v57, %v1929_v61  ;;  %v1931_v25 = vpop.f32.mrb[145].mxu1  ;;  %v6711_v6 = vld [vmem:[#allocation5 + $0x500] ss:$16 sps:$4 sm:$0xff]  }
 0x3e5   :  { %4850 = vmatprep.subr.bf16.mxu0 %v6695_v11  ;;  %5014 = vmatprep.subr.bf16.mxu1 %v6698_v29  ;;  %v3029_v9 = vmax.f32 %v3028_v24, %v2725_v37  ;;  %v2179_v33 = vmul.f32 %v8357_v10, %v1931_v25  ;;  %v1933_v47 = vpop.f32.mrb[146].mxu1  ;;  %v6719_v11 = vld [vmem:[#allocation5 + $0x524] ss:$16 sps:$4 sm:$0xff]   ;;  %v6722_v29 = vld [vmem:[#allocation5 + $0x52c] ss:$16 sps:$4 sm:$0xff]  }
 0x3e6   :  { %v2476_v20 = vadd.f32 %v8352_v38, %v2178_v36  ;;  %v2186_v17 = vmul.f32 %v8344_v57, %v1933_v47  ;;  %v1935_v14 = vpop.f32.mrb[147].mxu1  ;;  %v6717_v61 = vld [vmem:[#allocation5 + $0x520] ss:$16 sps:$4 sm:$0xff]   ;;  %v6725_v25 = vld [vmem:[#allocation5 + $0x544] ss:$16 sps:$4 sm:$0xff]  }
 0x3e7   :  { %v2477_v46 = vadd.f32 %v8361_v8, %v2179_v33  ;;  %v2187_v59 = vmul.f32 %v8357_v10, %v1935_v14 }
 0x3e8   :  { %4851 = vmatpush1.bf16.msra.mxu0 %v6693_v52  ;;  %5015 = vmatpush1.bf16.msra.mxu1 %v6696_v27  ;;  %v2732_v28 = vmax.f32 %v2476_v20, 0.0  ;;  %v2484_v3 = vadd.f32 %v8352_v38, %v2186_v17  ;;  %v6720_v52 = vld [vmem:[#allocation5 + $0x528] ss:$16 sps:$4 sm:$0xff]  }
 0x3e9   :  { %4852 = vmatprep.subr.bf16.mxu0 %v6701_v49  ;;  %5016 = vmatprep.subr.bf16.mxu1 %v6704_v32  ;;  %v2733_v22 = vmax.f32 %v2477_v46, 0.0  ;;  %v2485_v40 = vadd.f32 %v8361_v8, %v2187_v59  ;;  %v6728_v49 = vld [vmem:[#allocation5 + $0x54c] ss:$16 sps:$4 sm:$0xff]   ;;  %v6723_v59 = vld [vmem:[#allocation5 + $0x540] ss:$16 sps:$4 sm:$0xff]  }
 0x3ea   :  { %v3009_v34 = vmax.f32 %v3008_v45, %v2732_v28  ;;  %v2740_v43 = vmax.f32 %v2484_v3, 0.0  ;;  %v6731_v3 = vld [vmem:[#allocation5 + $0x564] ss:$16 sps:$4 sm:$0xff]  }
 0x3eb   :  { %v3030_v30 = vmax.f32 %v3029_v9, %v2733_v22  ;;  %v2741_v41 = vmax.f32 %v2485_v40, 0.0  ;;  %v1939_v50 = vpop.f32.mrb[148].mxu1 }
 0x3ec   :  { %4853 = vmatpush1.bf16.msra.mxu0 %v6699_v31  ;;  %5017 = vmatpush1.bf16.msra.mxu1 %v6702_v56  ;;  %v8451_v42 = vmax.f32 %v3009_v34, %v2740_v43  ;;  %v2194_v0 = vmul.f32 %v8344_v57, %v1939_v50  ;;  %v1941_v12 = vpop.f32.mrb[149].mxu1  ;;  %v6726_v31 = vld [vmem:[#allocation5 + $0x548] ss:$16 sps:$4 sm:$0xff]   ;;  %v6729_v50 = vld [vmem:[#allocation5 + $0x560] ss:$16 sps:$4 sm:$0xff]  }
 0x3ed   :  { %4854 = vmatprep.subr.bf16.mxu0 %v6707_v5  ;;  %5018 = vmatprep.subr.bf16.mxu1 %v6710_v7  ;;  %v8454_v48 = vmax.f32 %v3030_v30, %v2741_v41  ;;  %v2195_v60 = vmul.f32 %v8357_v10, %v1941_v12  ;;  %v1943_v23 = vpop.f32.mrb[150].mxu1  ;;  %v6734_v5 = vld [vmem:[#allocation5 + $0x56c] ss:$16 sps:$4 sm:$0xff]  }
 0x3ee   :  { %v2492_v1 = vadd.f32 %v8352_v38, %v2194_v0  ;;  %v2202_v15 = vmul.f32 %v8344_v57, %v1943_v23  ;;  %v1945_v44 = vpop.f32.mrb[151].mxu1 }
 0x3ef   :  { %v2493_v26 = vadd.f32 %v8361_v8, %v2195_v60  ;;  %v2203_v21 = vmul.f32 %v8357_v10, %v1945_v44 }
 0x3f0   :  { %4855 = vmatpush1.bf16.msra.mxu0 %v6705_v58  ;;  %5019 = vmatpush1.bf16.msra.mxu1 %v6708_v62  ;;  %v2500_v55 = vadd.f32 %v8352_v38, %v2202_v15  ;;  %v2748_v54 = vmax.f32 %v2492_v1, 0.0  ;;  %v6732_v58 = vld [vmem:[#allocation5 + $0x568] ss:$16 sps:$4 sm:$0xff]  }
 0x3f1   :  { %4856 = vmatprep.subr.bf16.mxu0 %v6713_v18  ;;  %5020 = vmatprep.subr.bf16.mxu1 %v6716_v16  ;;  %v2501_v51 = vadd.f32 %v8361_v8, %v2203_v21  ;;  %v2749_v4 = vmax.f32 %v2493_v26, 0.0  ;;  %v6737_v18 = vld [vmem:[#allocation5 + $0x584] ss:$16 sps:$4 sm:$0xff]   ;;  %v6740_v16 = vld [vmem:[#allocation5 + $0x58c] ss:$16 sps:$4 sm:$0xff]  }
 0x3f2   :  { %v2756_v53 = vmax.f32 %v2500_v55, 0.0  ;;  %v6738_v55 = vld [vmem:[#allocation5 + $0x588] ss:$16 sps:$4 sm:$0xff]  }
 0x3f3   :  { %v2757_v24 = vmax.f32 %v2501_v51, 0.0  ;;  %v1949_v37 = vpop.f32.mrb[152].mxu1  ;;  %v6743_v51 = vld [vmem:[#allocation5 + $0x5a4] ss:$16 sps:$4 sm:$0xff]  }
 0x3f4   :  { %4857 = vmatpush1.bf16.msra.mxu0 %v6711_v6  ;;  %5021 = vmatpush1.bf16.msra.mxu1 %v6714_v39  ;;  %v3164_v27 = vmax.f32 %v2748_v54, %v2756_v53  ;;  %v2210_v45 = vmul.f32 %v8344_v57, %v1949_v37  ;;  %v1951_v36 = vpop.f32.mrb[153].mxu1  ;;  %v6735_v39 = vld [vmem:[#allocation5 + $0x580] ss:$16 sps:$4 sm:$0xff]   ;;  %v6746_v54 = vld [vmem:[#allocation5 + $0x5ac] ss:$16 sps:$4 sm:$0xff]  }
 0x3f5   :  { %4858 = vmatprep.subr.bf16.mxu0 %v6719_v11  ;;  %5022 = vmatprep.subr.bf16.mxu1 %v6722_v29  ;;  %v3185_v32 = vmax.f32 %v2749_v4, %v2757_v24  ;;  %v2211_v9 = vmul.f32 %v8357_v10, %v1951_v36  ;;  %v1953_v33 = vpop.f32.mrb[154].mxu1  ;;  %v6744_v36 = vld [vmem:[#allocation5 + $0x5a8] ss:$16 sps:$4 sm:$0xff]  }
 0x3f6   :  { %v2508_v47 = vadd.f32 %v8352_v38, %v2210_v45  ;;  %v2218_v20 = vmul.f32 %v8344_v57, %v1953_v33  ;;  %v1955_v17 = vpop.f32.mrb[155].mxu1  ;;  %v6741_v45 = vld [vmem:[#allocation5 + $0x5a0] ss:$16 sps:$4 sm:$0xff]   ;;  %v6752_v33 = vld [vmem:[#allocation5 + $0x5cc] ss:$16 sps:$4 sm:$0xff]  }
 0x3f7   :  { %v2509_v14 = vadd.f32 %v8361_v8, %v2211_v9  ;;  %v2219_v46 = vmul.f32 %v8357_v10, %v1955_v17  ;;  %v6749_v9 = vld [vmem:[#allocation5 + $0x5c4] ss:$16 sps:$4 sm:$0xff]  }
 0x3f8   :  { %4859 = vmatpush1.bf16.msra.mxu0 %v6717_v61  ;;  %5023 = vmatpush1.bf16.msra.mxu1 %v6720_v52  ;;  %v2764_v56 = vmax.f32 %v2508_v47, 0.0  ;;  %v2516_v28 = vadd.f32 %v8352_v38, %v2218_v20 }
 0x3f9   :  { %4860 = vmatprep.subr.bf16.mxu0 %v6725_v25  ;;  %5024 = vmatprep.subr.bf16.mxu1 %v6728_v49  ;;  %v2765_v7 = vmax.f32 %v2509_v14, 0.0  ;;  %v2517_v22 = vadd.f32 %v8361_v8, %v2219_v46 }
 0x3fa   :  { %v3165_v40 = vmax.f32 %v3164_v27, %v2764_v56  ;;  %v2772_v34 = vmax.f32 %v2516_v28, 0.0  ;;  %v6747_v28 = vld [vmem:[#allocation5 + $0x5c0] ss:$16 sps:$4 sm:$0xff]  }
 0x3fb   :  { %v3186_v43 = vmax.f32 %v3185_v32, %v2765_v7  ;;  %v2773_v30 = vmax.f32 %v2517_v22, 0.0  ;;  %v1959_v41 = vpop.f32.mrb[156].mxu1  ;;  %v6755_v22 = vld [vmem:[#allocation5 + $0x5e4] ss:$16 sps:$4 sm:$0xff]  }
 0x3fc   :  { %4861 = vmatpush1.bf16.msra.mxu0 %v6723_v59  ;;  %5025 = vmatpush1.bf16.msra.mxu1 %v6726_v31  ;;  %v3166_v62 = vmax.f32 %v3165_v40, %v2772_v34  ;;  %v2226_v0 = vmul.f32 %v8344_v57, %v1959_v41  ;;  %v1961_v12 = vpop.f32.mrb[157].mxu1  ;;  %v6758_v40 = vld [vmem:[#allocation5 + $0x5ec] ss:$16 sps:$4 sm:$0xff]  }
 0x3fd   :  { %4862 = vmatprep.subr.bf16.mxu0 %v6731_v3  ;;  %5026 = vmatprep.subr.bf16.mxu1 %v6734_v5  ;;  %v3187_v60 = vmax.f32 %v3186_v43, %v2773_v30  ;;  %v2227_v23 = vmul.f32 %v8357_v10, %v1961_v12  ;;  %v1963_v1 = vpop.f32.mrb[158].mxu1  ;;  %v6750_v3 = vld [vmem:[#allocation5 + $0x5c8] ss:$16 sps:$4 sm:$0xff]  }
 0x3fe   :  { %v2524_v15 = vadd.f32 %v8352_v38, %v2226_v0  ;;  %v2234_v44 = vmul.f32 %v8344_v57, %v1963_v1  ;;  %v1965_v26 = vpop.f32.mrb[159].mxu1  ;;  %v6753_v0 = vld [vmem:[#allocation5 + $0x5e0] ss:$16 sps:$4 sm:$0xff]   ;;  %v6756_v12 = vld [vmem:[#allocation5 + $0x5e8] ss:$16 sps:$4 sm:$0xff]  }
 0x3ff   :  { %v2525_v21 = vadd.f32 %v8361_v8, %v2227_v23  ;;  %v2235_v6 = vmul.f32 %v8357_v10, %v1965_v26  ;;  %v6761_v23 = vld [vmem:[#allocation5 + $0x604] ss:$16 sps:$4 sm:$0xff]   ;;  %v6764_v1 = vld [vmem:[#allocation5 + $0x60c] ss:$16 sps:$4 sm:$0xff]  }
 0x400   :  { %4863 = vmatpush1.bf16.msra.mxu0 %v6729_v50  ;;  %5027 = vmatpush1.bf16.msra.mxu1 %v6732_v58  ;;  %v2780_v11 = vmax.f32 %v2524_v15, 0.0  ;;  %v2532_v29 = vadd.f32 %v8352_v38, %v2234_v44 }
 0x401   :  { %4864 = vmatprep.subr.bf16.mxu0 %v6737_v18  ;;  %5028 = vmatprep.subr.bf16.mxu1 %v6740_v16  ;;  %v2781_v53 = vmax.f32 %v2525_v21, 0.0  ;;  %v2533_v4 = vadd.f32 %v8361_v8, %v2235_v6 }
 0x402   :  { %v3167_v24 = vmax.f32 %v3166_v62, %v2780_v11  ;;  %v2788_v37 = vmax.f32 %v2532_v29, 0.0  ;;  %v6759_v29 = vld [vmem:[#allocation5 + $0x600] ss:$16 sps:$4 sm:$0xff]  }
 0x403   :  { %v3188_v61 = vmax.f32 %v3187_v60, %v2781_v53  ;;  %v2789_v52 = vmax.f32 %v2533_v4, 0.0  ;;  %v1969_v27 = vpop.f32.mrb[160].mxu1  ;;  %v3218_v4 = vpack.c.bf16 %v8432_v19, %v8432_v19 }
 0x404   :  { %4865 = vmatpush1.bf16.msra.mxu0 %v6735_v39  ;;  %5029 = vmatpush1.bf16.msra.mxu1 %v6738_v55  ;;  %v3168_v25 = vmax.f32 %v3167_v24, %v2788_v37  ;;  %v2242_v49 = vmul.f32 %v8344_v57, %v1969_v27  ;;  %v1971_v32 = vpop.f32.mrb[161].mxu1  ;;  %v6767_v24 = vld [vmem:[#allocation5 + $0x624] ss:$16 sps:$4 sm:$0xff]   ;;  %v6770_v37 = vld [vmem:[#allocation5 + $0x62c] ss:$16 sps:$4 sm:$0xff]  }
 0x405   :  { %4866 = vmatprep.subr.bf16.mxu0 %v6743_v51  ;;  %5030 = vmatprep.subr.bf16.mxu1 %v6746_v54  ;;  %v3189_v47 = vmax.f32 %v3188_v61, %v2789_v52  ;;  %v2243_v20 = vmul.f32 %v8357_v10, %v1971_v32  ;;  %v1973_v17 = vpop.f32.mrb[162].mxu1  ;;  %v6762_v51 = vld [vmem:[#allocation5 + $0x608] ss:$16 sps:$4 sm:$0xff]   ;;  %v6765_v32 = vld [vmem:[#allocation5 + $0x620] ss:$16 sps:$4 sm:$0xff]  }
 0x406   :  { %v2540_v14 = vadd.f32 %v8352_v38, %v2242_v49  ;;  %v2250_v46 = vmul.f32 %v8344_v57, %v1973_v17  ;;  %v1975_v59 = vpop.f32.mrb[163].mxu1  ;;  %v6776_v17 = vld [vmem:[#allocation5 + $0x64c] ss:$16 sps:$4 sm:$0xff]  }
 0x407   :  { %v2541_v31 = vadd.f32 %v8361_v8, %v2243_v20  ;;  %v2251_v56 = vmul.f32 %v8357_v10, %v1975_v59  ;;  %v6773_v20 = vld [vmem:[#allocation5 + $0x644] ss:$16 sps:$4 sm:$0xff]  }
 0x408   :  { %4867 = vmatpush1.bf16.msra.mxu0 %v6741_v45  ;;  %5031 = vmatpush1.bf16.msra.mxu1 %v6744_v36  ;;  %v2796_v5 = vmax.f32 %v2540_v14, 0.0  ;;  %v2548_v7 = vadd.f32 %v8352_v38, %v2250_v46 }
 0x409   :  { %4868 = vmatprep.subr.bf16.mxu0 %v6749_v9  ;;  %5032 = vmatprep.subr.bf16.mxu1 %v6752_v33  ;;  %v2797_v34 = vmax.f32 %v2541_v31, 0.0  ;;  %v2549_v43 = vadd.f32 %v8361_v8, %v2251_v56  ;;  %v6768_v9 = vld [vmem:[#allocation5 + $0x628] ss:$16 sps:$4 sm:$0xff]  }
 0x40a   :  { %v3169_v30 = vmax.f32 %v3168_v25, %v2796_v5  ;;  %v2804_v41 = vmax.f32 %v2548_v7, 0.0  ;;  %v6771_v7 = vld [vmem:[#allocation5 + $0x640] ss:$16 sps:$4 sm:$0xff]  }
 0x40b   :  { %v3190_v50 = vmax.f32 %v3189_v47, %v2797_v34  ;;  %v2805_v58 = vmax.f32 %v2549_v43, 0.0  ;;  %v1979_v62 = vpop.f32.mrb[164].mxu1  ;;  %v6779_v43 = vld [vmem:[#allocation5 + $0x664] ss:$16 sps:$4 sm:$0xff]  }
 0x40c   :  { %4869 = vmatpush1.bf16.msra.mxu0 %v6747_v28  ;;  %5033 = vmatpush1.bf16.msra.mxu1 %v6750_v3  ;;  %v3170_v18 = vmax.f32 %v3169_v30, %v2804_v41  ;;  %v2258_v16 = vmul.f32 %v8344_v57, %v1979_v62  ;;  %v1981_v60 = vpop.f32.mrb[165].mxu1  ;;  %v6782_v30 = vld [vmem:[#allocation5 + $0x66c] ss:$16 sps:$4 sm:$0xff]  }
 0x40d   :  { %4870 = vmatprep.subr.bf16.mxu0 %v6755_v22  ;;  %5034 = vmatprep.subr.bf16.mxu1 %v6758_v40  ;;  %v3191_v15 = vmax.f32 %v3190_v50, %v2805_v58  ;;  %v2259_v44 = vmul.f32 %v8357_v10, %v1981_v60  ;;  %v1983_v26 = vpop.f32.mrb[166].mxu1  ;;  %v6774_v22 = vld [vmem:[#allocation5 + $0x648] ss:$16 sps:$4 sm:$0xff]  }
 0x40e   :  { %v2556_v21 = vadd.f32 %v8352_v38, %v2258_v16  ;;  %v2266_v6 = vmul.f32 %v8344_v57, %v1983_v26  ;;  %v1985_v39 = vpop.f32.mrb[167].mxu1  ;;  %v6777_v16 = vld [vmem:[#allocation5 + $0x660] ss:$16 sps:$4 sm:$0xff]   ;;  %v6780_v60 = vld [vmem:[#allocation5 + $0x668] ss:$16 sps:$4 sm:$0xff]  }
 0x40f   :  { %v2557_v55 = vadd.f32 %v8361_v8, %v2259_v44  ;;  %v2267_v11 = vmul.f32 %v8357_v10, %v1985_v39  ;;  %v6785_v44 = vld [vmem:[#allocation5 + $0x684] ss:$16 sps:$4 sm:$0xff]   ;;  %v6788_v26 = vld [vmem:[#allocation5 + $0x68c] ss:$16 sps:$4 sm:$0xff]  }
 0x410   :  { %4871 = vmatpush1.bf16.msra.mxu0 %v6753_v0  ;;  %5035 = vmatpush1.bf16.msra.mxu1 %v6756_v12  ;;  %v2812_v54 = vmax.f32 %v2556_v21, 0.0  ;;  %v2564_v53 = vadd.f32 %v8352_v38, %v2266_v6 }
 0x411   :  { %4881 = vmatprep.subr.bf16.mxu0 %v6761_v23  ;;  %5045 = vmatprep.subr.bf16.mxu1 %v6764_v1  ;;  %v2813_v61 = vmax.f32 %v2557_v55, 0.0  ;;  %v2565_v52 = vadd.f32 %v8361_v8, %v2267_v11 }
 0x412   :  { %v3171_v27 = vmax.f32 %v3170_v18, %v2812_v54  ;;  %v2820_v45 = vmax.f32 %v2564_v53, 0.0  ;;  %v6783_v53 = vld [vmem:[#allocation5 + $0x680] ss:$16 sps:$4 sm:$0xff]  }
 0x413   :  { %4873 = vmatmul.mubr.bf16.vlgmr.msra.gmra.mrb[140].mxu0 %v3218_v4  ;;  %5037 = vmatmul.mubr.bf16.vlgmr.msra.gmra.mrb[180].mxu1 %v3218_v4  ;;  %v3192_v36 = vmax.f32 %v3191_v15, %v2813_v61  ;;  %v2821_v25 = vmax.f32 %v2565_v52, 0.0  ;;  %v1989_v49 = vpop.f32.mrb[168].mxu1  ;;  %v6786_v4 = vld [vmem:[#allocation5 + $0x688] ss:$16 sps:$4 sm:$0xff]   ;;  %v6791_v61 = vld [vmem:[#allocation5 + $0x6a4] ss:$16 sps:$4 sm:$0xff]  }
 0x414   :  { %4882 = vmatpush1.bf16.msra.mxu0 %v6759_v29  ;;  %5046 = vmatpush1.bf16.msra.mxu1 %v6762_v51  ;;  %v3172_v33 = vmax.f32 %v3171_v27, %v2820_v45  ;;  %v2274_v19 = vmul.f32 %v8344_v57, %v1989_v49  ;;  %v1991_v47 = vpop.f32.mrb[169].mxu1  ;;  %v6794_v52 = vld [vmem:[#allocation5 + $0x6ac] ss:$16 sps:$4 sm:$0xff]  }
 0x415   :  { %4883 = vmatprep.subr.bf16.mxu0 %v6767_v24  ;;  %5047 = vmatprep.subr.bf16.mxu1 %v6770_v37  ;;  %v3193_v14 = vmax.f32 %v3192_v36, %v2821_v25  ;;  %v2275_v46 = vmul.f32 %v8357_v10, %v1991_v47  ;;  %v1993_v59 = vpop.f32.mrb[170].mxu1  ;;  %v6792_v47 = vld [vmem:[#allocation5 + $0x6a8] ss:$16 sps:$4 sm:$0xff]  }
 0x416   :  { %v2572_v31 = vadd.f32 %v8352_v38, %v2274_v19  ;;  %v2282_v56 = vmul.f32 %v8344_v57, %v1993_v59  ;;  %v1995_v28 = vpop.f32.mrb[171].mxu1  ;;  %v6789_v19 = vld [vmem:[#allocation5 + $0x6a0] ss:$16 sps:$4 sm:$0xff]   ;;  %v6797_v59 = vld [vmem:[#allocation5 + $0x6c4] ss:$16 sps:$4 sm:$0xff]  }
 0x417   :  { %v2573_v3 = vadd.f32 %v8361_v8, %v2275_v46  ;;  %v2283_v5 = vmul.f32 %v8357_v10, %v1995_v28  ;;  %v3032_v46 = vrot.slane %v8454_v48, 4 }
 0x418   :  { %4884 = vmatpush1.bf16.msra.mxu0 %v6765_v32  ;;  %5048 = vmatpush1.bf16.msra.mxu1 %v6768_v9  ;;  %v2828_v40 = vmax.f32 %v2572_v31, 0.0  ;;  %v2580_v34 = vadd.f32 %v8352_v38, %v2282_v56  ;;  %v6800_v31 = vld [vmem:[#allocation5 + $0x6cc] ss:$16 sps:$4 sm:$0xff]  }
 0x419   :  { %4885 = vmatprep.subr.bf16.mxu0 %v6773_v20  ;;  %5049 = vmatprep.subr.bf16.mxu1 %v6776_v17  ;;  %v2829_v41 = vmax.f32 %v2573_v3, 0.0  ;;  %v2581_v50 = vadd.f32 %v8361_v8, %v2283_v5 }
 0x41a   :  { %v3173_v58 = vmax.f32 %v3172_v33, %v2828_v40  ;;  %v2836_v62 = vmax.f32 %v2580_v34, 0.0  ;;  %v3011_v33 = vrot.slane %v8451_v42, 4 }
 0x41b   :  { %v3194_v0 = vmax.f32 %v3193_v14, %v2829_v41  ;;  %v2837_v12 = vmax.f32 %v2581_v50, 0.0  ;;  %v1999_v18 = vpop.f32.mrb[172].mxu1  ;;  %v6798_v41 = vld [vmem:[#allocation5 + $0x6c8] ss:$16 sps:$4 sm:$0xff]  }
 0x41c   :  { %4886 = vmatpush1.bf16.msra.mxu0 %v6771_v7  ;;  %5050 = vmatpush1.bf16.msra.mxu1 %v6774_v22  ;;  %v3174_v23 = vmax.f32 %v3173_v58, %v2836_v62  ;;  %v2290_v1 = vmul.f32 %v8344_v57, %v1999_v18  ;;  %v2001_v15 = vpop.f32.mrb[173].mxu1  ;;  %v3033_v62 = vmax.f32 %v8454_v48, %v3032_v46  ;;  %v6809_v48 = vld [vmem:[#allocation5 + $0x704] ss:$16 sps:$4 sm:$0xff]   ;;  %v6830_v46 = vld [vmem:[#allocation5 + $0x76c] ss:$16 sps:$4 sm:$0xff]  }
 0x41d   :  { %4887 = vmatprep.subr.bf16.mxu0 %v6779_v43  ;;  %5051 = vmatprep.subr.bf16.mxu1 %v6782_v30  ;;  %v3195_v21 = vmax.f32 %v3194_v0, %v2837_v12  ;;  %v2291_v6 = vmul.f32 %v8357_v10, %v2001_v15  ;;  %v2003_v39 = vpop.f32.mrb[174].mxu1  ;;  %v3012_v43 = vmax.f32 %v8451_v42, %v3011_v33  ;;  %v6795_v30 = vld [vmem:[#allocation5 + $0x6c0] ss:$16 sps:$4 sm:$0xff]   ;;  %v6803_v0 = vld [vmem:[#allocation5 + $0x6e4] ss:$16 sps:$4 sm:$0xff]  }
 0x41e   :  { %v2588_v55 = vadd.f32 %v8352_v38, %v2290_v1  ;;  %v2298_v11 = vmul.f32 %v8344_v57, %v2003_v39  ;;  %v2005_v29 = vpop.f32.mrb[175].mxu1  ;;  %v6801_v1 = vld [vmem:[#allocation5 + $0x6e0] ss:$16 sps:$4 sm:$0xff]   ;;  %v6804_v15 = vld [vmem:[#allocation5 + $0x6e8] ss:$16 sps:$4 sm:$0xff]  }
 0x41f   :  { %v2589_v51 = vadd.f32 %v8361_v8, %v2291_v6  ;;  %v2299_v54 = vmul.f32 %v8357_v10, %v2005_v29 }
 0x420   :  { %4888 = vmatpush1.bf16.msra.mxu0 %v6777_v16  ;;  %5052 = vmatpush1.bf16.msra.mxu1 %v6780_v60  ;;  %v2844_v24 = vmax.f32 %v2588_v55, 0.0  ;;  %v2596_v37 = vadd.f32 %v8352_v38, %v2298_v11  ;;  %v6810_v11 = vld [vmem:[#allocation5 + $0x708] ss:$16 sps:$4 sm:$0xff]  }
 0x421   :  { %4889 = vmatprep.subr.bf16.mxu0 %v6785_v44  ;;  %5053 = vmatprep.subr.bf16.mxu1 %v6788_v26  ;;  %v2845_v27 = vmax.f32 %v2589_v51, 0.0  ;;  %v2597_v45 = vadd.f32 %v8361_v8, %v2299_v54  ;;  %v6812_v26 = vld [vmem:[#allocation5 + $0x70c] ss:$16 sps:$4 sm:$0xff]   ;;  %v6815_v54 = vld [vmem:[#allocation5 + $0x724] ss:$16 sps:$4 sm:$0xff]  }
 0x422   :  { %v3175_v36 = vmax.f32 %v3174_v23, %v2844_v24  ;;  %v2852_v25 = vmax.f32 %v2596_v37, 0.0  ;;  %v3013_v23 = vrot.slane %v3012_v43, 2 }
 0x423   :  { %v3196_v49 = vmax.f32 %v3195_v21, %v2845_v27  ;;  %v2853_v32 = vmax.f32 %v2597_v45, 0.0  ;;  %v2009_v9 = vpop.f32.mrb[176].mxu1  ;;  %v6816_v27 = vld [vmem:[#allocation5 + $0x728] ss:$16 sps:$4 sm:$0xff]  }
 0x424   :  { %4890 = vmatpush1.bf16.msra.mxu0 %v6783_v53  ;;  %5054 = vmatpush1.bf16.msra.mxu1 %v6786_v4  ;;  %v3176_v20 = vmax.f32 %v3175_v36, %v2852_v25  ;;  %v2306_v17 = vmul.f32 %v8344_v57, %v2009_v9  ;;  %v2011_v14 = vpop.f32.mrb[177].mxu1  ;;  %v3014_v55 = vmax.f32 %v3012_v43, %v3013_v23  ;;  %v6818_v53 = vld [vmem:[#allocation5 + $0x72c] ss:$16 sps:$4 sm:$0xff]   ;;  %v6821_v25 = vld [vmem:[#allocation5 + $0x744] ss:$16 sps:$4 sm:$0xff]  }
 0x425   :  { %4891 = vmatprep.subr.bf16.mxu0 %v6791_v61  ;;  %5055 = vmatprep.subr.bf16.mxu1 %v6794_v52  ;;  %v3197_v56 = vmax.f32 %v3196_v49, %v2853_v32  ;;  %v2307_v28 = vmul.f32 %v8357_v10, %v2011_v14  ;;  %v2013_v3 = vpop.f32.mrb[178].mxu1  ;;  %v6813_v52 = vld [vmem:[#allocation5 + $0x720] ss:$16 sps:$4 sm:$0xff]   ;;  %v6824_v49 = vld [vmem:[#allocation5 + $0x74c] ss:$16 sps:$4 sm:$0xff]  }
 0x426   :  { %v2604_v5 = vadd.f32 %v8352_v38, %v2306_v17  ;;  %v2314_v7 = vmul.f32 %v8344_v57, %v2013_v3  ;;  %v2015_v22 = vpop.f32.mrb[179].mxu1  ;;  %v6806_v57 = vld [vmem:[#allocation5 + $0x6ec] ss:$16 sps:$4 sm:$0xff]   ;;  %v3015_v61 = vrot.slane %v3014_v55, 1  ;;  %v6822_v17 = vld [vmem:[#allocation5 + $0x748] ss:$16 sps:$4 sm:$0xff]  }
 0x427   :  { %v2605_v40 = vadd.f32 %v8361_v8, %v2307_v28  ;;  %v2315_v34 = vmul.f32 %v8357_v10, %v2015_v22  ;;  %v6827_v14 = vld [vmem:[#allocation5 + $0x764] ss:$16 sps:$4 sm:$0xff]   ;;  %v6825_v3 = vld [vmem:[#allocation5 + $0x760] ss:$16 sps:$4 sm:$0xff]   ;;  %v6834_v43 = vld [vmem:[#allocation5 + $0x788] ss:$16 sps:$4 sm:$0xff]  }
 0x428   :  { %4892 = vmatpush1.bf16.msra.mxu0 %v6789_v19  ;;  %5056 = vmatpush1.bf16.msra.mxu1 %v6792_v47  ;;  %v2860_v50 = vmax.f32 %v2604_v5, 0.0  ;;  %v2612_v58 = vadd.f32 %v8352_v38, %v2314_v7  ;;  %v3034_v38 = vrot.slane %v3033_v62, 2  ;;  %v3016_v19 = vmax.f32 %v3014_v55, %v3015_v61  ;;  %v6828_v5 = vld [vmem:[#allocation5 + $0x768] ss:$16 sps:$4 sm:$0xff]   ;;  %v6833_v22 = vld [vmem:[#allocation5 + $0x784] ss:$16 sps:$4 sm:$0xff]  }
 0x429   :  { %4893 = vmatprep.subr.bf16.mxu0 %v6797_v59  ;;  %5057 = vmatprep.subr.bf16.mxu1 %v6800_v31  ;;  %v2861_v12 = vmax.f32 %v2605_v40, 0.0  ;;  %v2613_v18 = vadd.f32 %v8361_v8, %v2315_v34  ;;  %v6807_v8 = vld [vmem:[#allocation5 + $0x700] ss:$16 sps:$4 sm:$0xff]   ;;  %v6836_v40 = vld [vmem:[#allocation5 + $0x78c] ss:$16 sps:$4 sm:$0xff]  }
 0x42a   :  { %v3177_v16 = vmax.f32 %v3176_v20, %v2860_v50  ;;  %v2868_v10 = vmax.f32 %v2612_v58, 0.0  ;;  %v3035_v51 = vmax.f32 %v3033_v62, %v3034_v38  ;;  %v6819_v20 = vld [vmem:[#allocation5 + $0x740] ss:$16 sps:$4 sm:$0xff]   ;;  %v6840_v58 = vld [vmem:[#allocation5 + $0x7a8] ss:$16 sps:$4 sm:$0xff]  }
 0x42b   :  { %v3198_v60 = vmax.f32 %v3197_v56, %v2861_v12  ;;  %v2869_v42 = vmax.f32 %v2613_v18, 0.0  ;;  %v6831_v34 = vld [vmem:[#allocation5 + $0x780] ss:$16 sps:$4 sm:$0xff]   ;;  %v6845_v62 = vld [vmem:[#allocation5 + $0x7c4] ss:$16 sps:$4 sm:$0xff]  }
 0x42c   :  { %4894 = vmatpush1.bf16.msra.mxu0 %v6795_v30  ;;  %5058 = vmatpush1.bf16.msra.mxu1 %v6798_v41  ;;  %v3178_v44 = vmax.f32 %v3177_v16, %v2868_v10  ;;  %v3036_v32 = vrot.slane %v3035_v51, 1  ;;  %v6839_v30 = vld [vmem:[#allocation5 + $0x7a4] ss:$16 sps:$4 sm:$0xff]   ;;  %v6842_v41 = vld [vmem:[#allocation5 + $0x7ac] ss:$16 sps:$4 sm:$0xff]  }
 0x42d   :  { %4895 = vmatprep.subr.bf16.mxu0 %v6803_v0  ;;  %5059 = vmatprep.subr.bf16.mxu1 %v6806_v57  ;;  %v3199_v21 = vmax.f32 %v3198_v60, %v2869_v42  ;;  %v6837_v50 = vld [vmem:[#allocation5 + $0x7a0] ss:$16 sps:$4 sm:$0xff]   ;;  %v6848_v0 = vld [vmem:[#allocation5 + $0x7cc] ss:$16 sps:$4 sm:$0xff]   ;;  %v6846_v12 = vld [vmem:[#allocation5 + $0x7c8] ss:$16 sps:$4 sm:$0xff]  }
 0x42e   :  { %v3179_v6 = vrot.slane %v3178_v44, 4  ;;  %v3037_v59 = vmax.f32 %v3035_v51, %v3036_v32  ;;  %v6843_v57 = vld [vmem:[#allocation5 + $0x7c0] ss:$16 sps:$4 sm:$0xff]   ;;  %v6851_v18 = vld [vmem:[#allocation5 + $0x7e4] ss:$16 sps:$4 sm:$0xff]  }
 0x42f   :  { %v3200_v39 = vrot.slane %v3199_v21, 4  ;;  %v6854_v16 = vld [vmem:[#allocation5 + $0x7ec] ss:$16 sps:$4 sm:$0xff]   ;;  %v6849_v10 = vld [vmem:[#allocation5 + $0x7e0] ss:$16 sps:$4 sm:$0xff]  }
 0x430   :  { %4896 = vmatpush1.bf16.msra.mxu0 %v6801_v1  ;;  %5060 = vmatpush1.bf16.msra.mxu1 %v6804_v15  ;;  %v3180_v29 = vmax.f32 %v3178_v44, %v3179_v6  ;;  %v6852_v60 = vld [vmem:[#allocation5 + $0x7e8] ss:$16 sps:$4 sm:$0xff]   ;;  %v6857_v42 = vld [vmem:[#allocation7 + $0x4] ss:$8 sps:$4 sm:$0xff]   ;;  %v6860_v15 = vld [vmem:[#allocation7 + $0x14] ss:$8 sps:$4 sm:$0xff]  }
 0x431   :  { %4897 = vmatprep.subr.bf16.mxu0 %v6809_v48  ;;  %5061 = vmatprep.subr.bf16.mxu1 %v6812_v26  ;;  %v3201_v4 = vmax.f32 %v3199_v21, %v3200_v39  ;;  %v6855_v23 = vld [vmem:[#allocation7] ss:$8 sps:$4 sm:$0xff]   ;;  %v6858_v44 = vld [vmem:[#allocation7 + $0x10] ss:$8 sps:$4 sm:$0xff]   ;;  %v6863_v38 = vld [vmem:[#allocation7 + $0x24] ss:$8 sps:$4 sm:$0xff]  }
 0x432   :  { %v3181_v24 = vrot.slane %v3180_v29, 2  ;;  %v6861_v48 = vld [vmem:[#allocation7 + $0x20] ss:$8 sps:$4 sm:$0xff]   ;;  %v6866_v26 = vld [vmem:[#allocation7 + $0x34] ss:$8 sps:$4 sm:$0xff]  }
 0x433   :  { %v3202_v37 = vrot.slane %v3201_v4, 2  ;;  %v6864_v21 = vld [vmem:[#allocation7 + $0x30] ss:$8 sps:$4 sm:$0xff]   ;;  %v6869_v6 = vld [vmem:[#allocation7 + $0x44] ss:$8 sps:$4 sm:$0xff]  }
 0x434   :  { %4898 = vmatpush1.bf16.msra.mxu0 %v6807_v8  ;;  %5062 = vmatpush1.bf16.msra.mxu1 %v6810_v11  ;;  %v3182_v45 = vmax.f32 %v3180_v29, %v3181_v24  ;;  %v6867_v39 = vld [vmem:[#allocation7 + $0x40] ss:$8 sps:$4 sm:$0xff]   ;;  %v6872_v55 = vld [vmem:[#allocation7 + $0x54] ss:$8 sps:$4 sm:$0xff]   ;;  %v6870_v8 = vld [vmem:[#allocation7 + $0x50] ss:$8 sps:$4 sm:$0xff]  }
 0x435   :  { %4899 = vmatprep.subr.bf16.mxu0 %v6815_v54  ;;  %5063 = vmatprep.subr.bf16.mxu1 %v6818_v53  ;;  %v3203_v36 = vmax.f32 %v3201_v4, %v3202_v37  ;;  %v6875_v11 = vld [vmem:[#allocation7 + $0x64] ss:$8 sps:$4 sm:$0xff]   ;;  %v6873_v29 = vld [vmem:[#allocation7 + $0x60] ss:$8 sps:$4 sm:$0xff]   ;;  %v6878_v51 = vld [vmem:[#allocation7 + $0x74] ss:$8 sps:$4 sm:$0xff]  }
 0x436   :  { %v3183_v9 = vrot.slane %v3182_v45, 1  ;;  %v6876_v54 = vld [vmem:[#allocation7 + $0x70] ss:$8 sps:$4 sm:$0xff]   ;;  %v6881_v53 = vld [vmem:[#allocation7 + $0x84] ss:$8 sps:$4 sm:$0xff]  }
 0x437   :  { %v3204_v33 = vrot.slane %v3203_v36, 1  ;;  %v6879_v4 = vld [vmem:[#allocation7 + $0x80] ss:$8 sps:$4 sm:$0xff]   ;;  %v6884_v24 = vld [vmem:[#allocation7 + $0x94] ss:$8 sps:$4 sm:$0xff]  }
 0x438   :  { %4900 = vmatpush1.bf16.msra.mxu0 %v6813_v52  ;;  %5064 = vmatpush1.bf16.msra.mxu1 %v6816_v27  ;;  %v3184_v47 = vmax.f32 %v3182_v45, %v3183_v9  ;;  %v6882_v37 = vld [vmem:[#allocation7 + $0x90] ss:$8 sps:$4 sm:$0xff]   ;;  %v6887_v61 = vld [vmem:[#allocation7 + $0xa4] ss:$8 sps:$4 sm:$0xff]   ;;  %v6885_v52 = vld [vmem:[#allocation7 + $0xa0] ss:$8 sps:$4 sm:$0xff]  }
 0x439   :  { %4901 = vmatprep.subr.bf16.mxu0 %v6821_v25  ;;  %5065 = vmatprep.subr.bf16.mxu1 %v6824_v49  ;;  %v3205_v31 = vmax.f32 %v3203_v36, %v3204_v33  ;;  %v6890_v27 = vld [vmem:[#allocation7 + $0xb4] ss:$8 sps:$4 sm:$0xff]   ;;  %v6888_v45 = vld [vmem:[#allocation7 + $0xb0] ss:$8 sps:$4 sm:$0xff]   ;;  %v6893_v36 = vld [vmem:[#allocation7 + $0xc4] ss:$8 sps:$4 sm:$0xff]  }
 0x43a   :  { %v3212_v56 = vsel %vm200_vm0, %v3016_v19, %v3184_v47  ;;  %v6891_v25 = vld [vmem:[#allocation7 + $0xc0] ss:$8 sps:$4 sm:$0xff]   ;;  %v6896_v49 = vld [vmem:[#allocation7 + $0xd4] ss:$8 sps:$4 sm:$0xff]   ;;  %v6894_v32 = vld [vmem:[#allocation7 + $0xd0] ss:$8 sps:$4 sm:$0xff]  }
 0x43b   :  { %v3213_v28 = vsel %vm200_vm0, %v3037_v59, %v3205_v31  ;;  %v3220_v1 = vpack.c.bf16 %v3212_v56, %v3212_v56  ;;  %v6897_v9 = vld [vmem:[#allocation7 + $0xe0] ss:$8 sps:$4 sm:$0xff]   ;;  %v6899_v33 = vld [vmem:[#allocation7 + $0xe4] ss:$8 sps:$4 sm:$0xff]   ;;  %v6902_v19 = vld [vmem:[#allocation7 + $0xf4] ss:$8 sps:$4 sm:$0xff]  }
 0x43c   :  { %4902 = vmatpush1.bf16.msra.mxu0 %v6819_v20  ;;  %5066 = vmatpush1.bf16.msra.mxu1 %v6822_v17  ;;  %v3221_v7 = vpack.c.bf16 %v3213_v28, %v3213_v28  ;;  %v6900_v47 = vld [vmem:[#allocation7 + $0xf0] ss:$8 sps:$4 sm:$0xff]   ;;  %v6905_v20 = vld [vmem:[#allocation7 + $0x104] ss:$8 sps:$4 sm:$0xff]  }
 0x43d   :  { %4903 = vmatprep.subr.bf16.mxu0 %v6827_v14  ;;  %5067 = vmatprep.subr.bf16.mxu1 %v6830_v46  ;;  %v6951_v17 = vld [vmem:[%s8633_s16 + $0x40] sm:$0xff]   ;;  %v6953_v46 = vld [vmem:[%s8633_s16 + $0x48] sm:$0xff]   ;;  %v6955_v31 = vld [vmem:[%s8633_s16 + $0x50] sm:$0xff]  }
 0x43e   :  { %4913 = vmatprep.mubr.bf16.mxu0 %v3221_v7  ;;  %5077 = vmatprep.mubr.bf16.mxu1 %v3221_v7  ;;  %v6952_v14 = vld [vmem:[%s8633_s16] sm:$0xff]   ;;  %v6954_v59 = vld [vmem:[%s8633_s16 + $0x8] sm:$0xff]   ;;  %v6956_v56 = vld [vmem:[%s8633_s16 + $0x10] sm:$0xff]  }
 0x43f   :  { %v6957_v28 = vld [vmem:[%s8633_s16 + $0x58] sm:$0xff]   ;;  %v6960_v7 = vld [vmem:[%s8633_s16 + $0x20] sm:$0xff]  }
 0x440   :  { %4904 = vmatpush1.bf16.msra.mxu0 %v6825_v3  ;;  %5068 = vmatpush1.bf16.msra.mxu1 %v6828_v5  ;;  %v6958_v3 = vld [vmem:[%s8633_s16 + $0x18] sm:$0xff]   ;;  %v6959_v5 = vld [vmem:[%s8633_s16 + $0x60] sm:$0xff]  }
 0x441   :  { %4905 = vmatprep.subr.bf16.mxu0 %v6833_v22  ;;  %5069 = vmatprep.subr.bf16.mxu1 %v6836_v40  ;;  %v6961_v22 = vld [vmem:[%s8633_s16 + $0x68] sm:$0xff]   ;;  %v5086_v40 = vld [vmem:[%s8628_s11] sm:$0xf] }
 0x444   :  { %4906 = vmatpush1.bf16.msra.mxu0 %v6831_v34  ;;  %5070 = vmatpush1.bf16.msra.mxu1 %v6834_v43  ;;  %v5112_v34 = vld [vmem:[%s8629_s12] sm:$0xf]  ;;  %v5091_v43 = vrot.slane %v5086_v40, %v7672_v63 }
 0x445   :  { %4907 = vmatprep.subr.bf16.mxu0 %v6839_v30  ;;  %5071 = vmatprep.subr.bf16.mxu1 %v6842_v41  ;;  %v5099_v30 = vrot.slane %v5086_v40, %v7749_v35  ;;  %v5095_v41 = vrot.slane %v5086_v40, %v7680_v2 }
 0x448   :  { %4908 = vmatpush1.bf16.msra.mxu0 %v6837_v50  ;;  %5072 = vmatpush1.bf16.msra.mxu1 %v6840_v58  ;;  %v5103_v50 = vrot.slane %v5086_v40, %v7752_v13  ;;  %v5117_v58 = vrot.slane %v5112_v34, %v7672_v63  ;;  %v6948_v40 = vld [vmem:[#allocation7 + $0x1f0] ss:$8 sps:$4 sm:$0xff]  }
 0x449   :  { %4909 = vmatprep.subr.bf16.mxu0 %v6845_v62  ;;  %5073 = vmatprep.subr.bf16.mxu1 %v6848_v0  ;;  %v5125_v62 = vrot.slane %v5112_v34, %v7749_v35 }
 0x44c   :  { %4910 = vmatpush1.bf16.msra.mxu0 %v6843_v57  ;;  %5074 = vmatpush1.bf16.msra.mxu1 %v6846_v12  ;;  %v5121_v12 = vrot.slane %v5112_v34, %v7680_v2 }
 0x44d   :  { %4911 = vmatprep.subr.bf16.mxu0 %v6851_v18  ;;  %5075 = vmatprep.subr.bf16.mxu1 %v6854_v16  ;;  %v5129_v18 = vrot.slane %v5112_v34, %v7752_v13  ;;  %v6903_v13 = vld [vmem:[#allocation7 + $0x100] ss:$8 sps:$4 sm:$0xff]  }
 0x450   :  { %4912 = vmatpush1.bf16.msra.mxu0 %v6849_v10  ;;  %5076 = vmatpush1.bf16.msra.mxu1 %v6852_v60 }
 0x451   :  { %5530 = vmatprep.subr.bf16.mxu0 %v6857_v42  ;;  %6315 = vmatprep.subr.bf16.mxu1 %v6951_v17  ;;  %v6935_v17 = vld [vmem:[#allocation7 + $0x1a4] ss:$8 sps:$4 sm:$0xff]  }
 0x453   :  { %4914 = vmatmul.mubr.bf16.vlgmr.msra.gmra.mrb[140].mxu0 %v3220_v1  ;;  %5078 = vmatmul.mubr.bf16.vlgmr.msra.gmra.mrb[180].mxu1 %v3220_v1 }
 0x454   :  { %5531 = vmatpush1.bf16.msra.mxu0 %v6855_v23  ;;  %6316 = vmatpush3.bf16.msra.mxu1 %v6952_v14  ;;  %v6933_v14 = vld [vmem:[#allocation7 + $0x1a0] ss:$8 sps:$4 sm:$0xff]  }
 0x455   :  { %5532 = vmatprep.subr.bf16.mxu0 %v6860_v15  ;;  %6317 = vmatprep.subr.bf16.mxu1 %v6953_v46  ;;  %v6938_v46 = vld [vmem:[#allocation7 + $0x1b4] ss:$8 sps:$4 sm:$0xff]  }
 0x458   :  { %5533 = vmatpush1.bf16.msra.mxu0 %v6858_v44  ;;  %6318 = vmatpush3.bf16.msra.mxu1 %v6954_v59  ;;  %v6936_v59 = vld [vmem:[#allocation7 + $0x1b0] ss:$8 sps:$4 sm:$0xff]  }
 0x459   :  { %5534 = vmatprep.subr.bf16.mxu0 %v6863_v38  ;;  %6319 = vmatprep.subr.bf16.mxu1 %v6955_v31  ;;  %v6941_v31 = vld [vmem:[#allocation7 + $0x1c4] ss:$8 sps:$4 sm:$0xff]  }
 0x45c   :  { %5535 = vmatpush1.bf16.msra.mxu0 %v6861_v48  ;;  %6320 = vmatpush3.bf16.msra.mxu1 %v6956_v56  ;;  %v6939_v56 = vld [vmem:[#allocation7 + $0x1c0] ss:$8 sps:$4 sm:$0xff]  }
 0x45d   :  { %5536 = vmatprep.subr.bf16.mxu0 %v6866_v26  ;;  %6321 = vmatprep.subr.bf16.mxu1 %v6957_v28  ;;  %v6944_v28 = vld [vmem:[#allocation7 + $0x1d4] ss:$8 sps:$4 sm:$0xff]  }
 0x460   :  { %5537 = vmatpush1.bf16.msra.mxu0 %v6864_v21  ;;  %6322 = vmatpush3.bf16.msra.mxu1 %v6958_v3  ;;  %v6942_v3 = vld [vmem:[#allocation7 + $0x1d0] ss:$8 sps:$4 sm:$0xff]  }
 0x461   :  { %5538 = vmatprep.subr.bf16.mxu0 %v6869_v6  ;;  %6323 = vmatprep.subr.bf16.mxu1 %v6959_v5  ;;  %v6947_v5 = vld [vmem:[#allocation7 + $0x1e4] ss:$8 sps:$4 sm:$0xff]  }
 0x464   :  { %5539 = vmatpush1.bf16.msra.mxu0 %v6867_v39  ;;  %6324 = vmatpush3.bf16.msra.mxu1 %v6960_v7  ;;  %v6945_v7 = vld [vmem:[#allocation7 + $0x1e0] ss:$8 sps:$4 sm:$0xff]  }
 0x465   :  { %5540 = vmatprep.subr.bf16.mxu0 %v6872_v55  ;;  %6325 = vmatprep.subr.bf16.mxu1 %v6961_v22  ;;  %v6950_v22 = vld [vmem:[#allocation7 + $0x1f4] ss:$8 sps:$4 sm:$0xff]  }
 0x468   :  { %5541 = vmatpush1.bf16.msra.mxu0 %v6870_v8 }
 0x469   :  { %5542 = vmatprep.subr.bf16.mxu0 %v6875_v11 }
 0x46c   :  { %5543 = vmatpush1.bf16.msra.mxu0 %v6873_v29 }
 0x46d   :  { %5544 = vmatprep.subr.bf16.mxu0 %v6878_v51  ;;  %v6908_v51 = vld [vmem:[#allocation7 + $0x114] ss:$8 sps:$4 sm:$0xff]  }
 0x470   :  { %5545 = vmatpush1.bf16.msra.mxu0 %v6876_v54 }
 0x471   :  { %5546 = vmatprep.subr.bf16.mxu0 %v6881_v53  ;;  %v6906_v53 = vld [vmem:[#allocation7 + $0x110] ss:$8 sps:$4 sm:$0xff]  }
 0x474   :  { %5547 = vmatpush1.bf16.msra.mxu0 %v6879_v4  ;;  %v6911_v4 = vld [vmem:[#allocation7 + $0x124] ss:$8 sps:$4 sm:$0xff]  }
 0x475   :  { %5548 = vmatprep.subr.bf16.mxu0 %v6884_v24  ;;  %v6909_v24 = vld [vmem:[#allocation7 + $0x120] ss:$8 sps:$4 sm:$0xff]  }
 0x478   :  { %5549 = vmatpush1.bf16.msra.mxu0 %v6882_v37  ;;  %v6914_v37 = vld [vmem:[#allocation7 + $0x134] ss:$8 sps:$4 sm:$0xff]  }
 0x479   :  { %5550 = vmatprep.subr.bf16.mxu0 %v6887_v61  ;;  %v6912_v61 = vld [vmem:[#allocation7 + $0x130] ss:$8 sps:$4 sm:$0xff]  }
 0x47c   :  { %5551 = vmatpush1.bf16.msra.mxu0 %v6885_v52  ;;  %v6917_v52 = vld [vmem:[#allocation7 + $0x144] ss:$8 sps:$4 sm:$0xff]  }
 0x47d   :  { %5552 = vmatprep.subr.bf16.mxu0 %v6890_v27  ;;  %v6915_v27 = vld [vmem:[#allocation7 + $0x140] ss:$8 sps:$4 sm:$0xff]  }
 0x480   :  { %5553 = vmatpush1.bf16.msra.mxu0 %v6888_v45  ;;  %v6920_v45 = vld [vmem:[#allocation7 + $0x154] ss:$8 sps:$4 sm:$0xff]  }
 0x481   :  { %5554 = vmatprep.subr.bf16.mxu0 %v6893_v36  ;;  %v6918_v36 = vld [vmem:[#allocation7 + $0x150] ss:$8 sps:$4 sm:$0xff]  }
 0x484   :  { %5555 = vmatpush1.bf16.msra.mxu0 %v6891_v25  ;;  %v6923_v25 = vld [vmem:[#allocation7 + $0x164] ss:$8 sps:$4 sm:$0xff]  }
 0x485   :  { %5556 = vmatprep.subr.bf16.mxu0 %v6896_v49  ;;  %v6921_v49 = vld [vmem:[#allocation7 + $0x160] ss:$8 sps:$4 sm:$0xff]  }
 0x488   :  { %5557 = vmatpush1.bf16.msra.mxu0 %v6894_v32  ;;  %v6926_v32 = vld [vmem:[#allocation7 + $0x174] ss:$8 sps:$4 sm:$0xff]  }
 0x489   :  { %5558 = vmatprep.subr.bf16.mxu0 %v6899_v33  ;;  %v6929_v33 = vld [vmem:[#allocation7 + $0x184] ss:$8 sps:$4 sm:$0xff]  }
 0x48c   :  { %5559 = vmatpush1.bf16.msra.mxu0 %v6897_v9  ;;  %v6924_v9 = vld [vmem:[#allocation7 + $0x170] ss:$8 sps:$4 sm:$0xff]  }
 0x48d   :  { %5560 = vmatprep.subr.bf16.mxu0 %v6902_v19  ;;  %v6927_v19 = vld [vmem:[#allocation7 + $0x180] ss:$8 sps:$4 sm:$0xff]  }
 0x490   :  { %5561 = vmatpush1.bf16.msra.mxu0 %v6900_v47  ;;  %v6932_v47 = vld [vmem:[#allocation7 + $0x194] ss:$8 sps:$4 sm:$0xff]  }
 0x491   :  { %5571 = vmatprep.subr.bf16.mxu0 %v6905_v20  ;;  %v6930_v20 = vld [vmem:[#allocation7 + $0x190] ss:$8 sps:$4 sm:$0xff]  }
 0x526   :  { %v4915_v0 = vpop.f32.mrb[140].mxu0  ;;  %v5079_v57 = vpop.f32.mrb[180].mxu1 }
 0x527   :  { %v5108_v16 = vmul.f32 %v5091_v43, %v4915_v0  ;;  %v5110_v10 = vmul.f32 %v5099_v30, %v5079_v57  ;;  %v4917_v60 = vpop.f32.mrb[141].mxu0  ;;  %v5081_v42 = vpop.f32.mrb[181].mxu1  ;;  %v6962_v30 = vld [vmem:[%s8633_s16 + $0x28] sm:$0xff]   ;;  %v5612_v0 = vld [vmem:[%s8631_s14] sm:$0x3] }
 0x528   :  { %v5109_v23 = vmul.f32 %v5095_v41, %v4917_v60  ;;  %v5111_v1 = vmul.f32 %v5103_v50, %v5081_v42  ;;  %v4919_v15 = vpop.f32.mrb[142].mxu0  ;;  %v5083_v44 = vpop.f32.mrb[182].mxu1  ;;  %v6963_v41 = vld [vmem:[%s8633_s16 + $0x70] sm:$0xff]   ;;  %6326 = vmatpush3.bf16.msra.mxu1 %v6962_v30  ;;  %v5626_v57 = vld [vmem:[%s8632_s15] sm:$0x3] }
 0x529   :  { %v5134_v38 = vadd.f32 %v5117_v58, %v5108_v16  ;;  %v8574_v48 = vadd.f32 %v5125_v62, %v5110_v10  ;;  %v4920_v26 = vpop.f32.mrb[143].mxu0  ;;  %v5084_v21 = vpop.f32.mrb[183].mxu1  ;;  %v6964_v50 = vld [vmem:[%s8633_s16 + $0x30] sm:$0xff]   ;;  %6327 = vmatprep.subr.bf16.mxu1 %v6963_v41  ;;  %v6965_v58 = vld [vmem:[%s8633_s16 + $0x78] sm:$0xff]   ;;  %v5631_v16 = vrot.slane %v5626_v57, %v7672_v63  ;;  %v5635_v60 = vrot.slane %v5626_v57, %v7680_v2 }
 0x52a   :  { %v5135_v35 = vadd.f32 %v5121_v12, %v5109_v23  ;;  %v5137_v6 = vadd.f32 %v5129_v18, %v5111_v1  ;;  %v6966_v62 = vld [vmem:[%s8633_s16 + $0x38] sm:$0xff]   ;;  %v5617_v12 = vrot.slane %v5612_v0, %v7672_v63  ;;  %v5621_v18 = vrot.slane %v5612_v0, %v7680_v2  ;;  %v6261_v63 = vld [vmem:[%s8634_s17] ss:$0 sm:$0xff]  ;;  %s7074_s16 = smov [#allocation8]  }
 0x52b   :  { %v5138_v39 = vmax.f32 %v5134_v38, 0.0  ;;  %v5140_v34 = vmax.f32 %v8574_v48, 0.0  ;;  %s5827_s20 = sshll.u32 %s7074_s16, 4  ;;  %s5828_s20 = int_to_ptr.vmem [resolvable:$true] %s5827_s20 }
 0x52c   :  { %v5139_v55 = vmax.f32 %v5135_v35, 0.0  ;;  %v5141_v8 = vmax.f32 %v5137_v6, 0.0  ;;  %6328 = vmatpush3.bf16.msra.mxu1 %v6964_v50  ;;  %s7035_s21 = scalar_lea.vmem %s5828_s20, 32  ;;  %p7040_p11 = scmp.lt.s32.totalorder %s5828_s20, %s5828_s20 }
 0x52d   :  { %v5142_v29 = vpack.c.bf16 %v5138_v39, %v5138_v39  ;;  %v5144_v43 = vpack.c.bf16 %v5140_v34, %v5140_v34  ;;  %6329 = vmatprep.subr.bf16.mxu1 %v6965_v58  ;;  %p7036_p10 = scmp.ne.s32.totalorder %s5828_s20, %s7035_s21  ;;  %p7041_p12 = scmp.lt.s32.totalorder %s7035_s21, %s7035_s21 }
 0x52e   :  { %v5143_v11 = vpack.c.bf16 %v5139_v55, %v5139_v55  ;;  %v5145_v54 = vpack.c.bf16 %v5141_v8, %v5141_v8 }
 0x52f   :  { %p7042_p13 = por %p7041_p12, %p7040_p11 }
 0x530   :  { %5562 = vmatprep.mubr.bf16.mxu0 %v5143_v11  ;;  %6330 = vmatpush3.bf16.msra.mxu1 %v6966_v62 }
 0x531   :  { %5563 = vmatmul.mubr.bf16.vlgmr.msra.gmra.mrb[144].mxu0 %v5142_v29  ;;  %p7043_p0 = pnand %p7042_p13, %p7036_p10 }
 0x532   :  { %5572 = vmatpush1.bf16.msra.mxu0 %v6903_v13  ;;  %5603 = vmatprep.mubr.bf16.mxu0 %v5145_v54 }
 0x533   :  { %5573 = vmatprep.subr.bf16.mxu0 %v6908_v51 }
 0x536   :  { %5574 = vmatpush1.bf16.msra.mxu0 %v6906_v53 }
 0x537   :  { %5575 = vmatprep.subr.bf16.mxu0 %v6911_v4 }
 0x53a   :  { %5576 = vmatpush1.bf16.msra.mxu0 %v6909_v24 }
 0x53b   :  { %5577 = vmatprep.subr.bf16.mxu0 %v6914_v37 }
 0x53e   :  { %5578 = vmatpush1.bf16.msra.mxu0 %v6912_v61 }
 0x53f   :  { %5579 = vmatprep.subr.bf16.mxu0 %v6917_v52 }
 0x542   :  { %5580 = vmatpush1.bf16.msra.mxu0 %v6915_v27 }
 0x543   :  { %5581 = vmatprep.subr.bf16.mxu0 %v6920_v45 }
 0x546   :  { %5582 = vmatpush1.bf16.msra.mxu0 %v6918_v36 }
 0x547   :  { %5583 = vmatprep.subr.bf16.mxu0 %v6923_v25 }
 0x54a   :  { %5584 = vmatpush1.bf16.msra.mxu0 %v6921_v49 }
 0x54b   :  { %5585 = vmatprep.subr.bf16.mxu0 %v6926_v32 }
 0x54e   :  { %5586 = vmatpush1.bf16.msra.mxu0 %v6924_v9 }
 0x54f   :  { %5587 = vmatprep.subr.bf16.mxu0 %v6929_v33 }
 0x552   :  { %5588 = vmatpush1.bf16.msra.mxu0 %v6927_v19 }
 0x553   :  { %5589 = vmatprep.subr.bf16.mxu0 %v6932_v47 }
 0x556   :  { %5590 = vmatpush1.bf16.msra.mxu0 %v6930_v20 }
 0x557   :  { %5591 = vmatprep.subr.bf16.mxu0 %v6935_v17 }
 0x55a   :  { %5592 = vmatpush1.bf16.msra.mxu0 %v6933_v14 }
 0x55b   :  { %5593 = vmatprep.subr.bf16.mxu0 %v6938_v46 }
 0x55e   :  { %5594 = vmatpush1.bf16.msra.mxu0 %v6936_v59 }
 0x55f   :  { %5595 = vmatprep.subr.bf16.mxu0 %v6941_v31 }
 0x562   :  { %5596 = vmatpush1.bf16.msra.mxu0 %v6939_v56 }
 0x563   :  { %5597 = vmatprep.subr.bf16.mxu0 %v6944_v28 }
 0x566   :  { %5598 = vmatpush1.bf16.msra.mxu0 %v6942_v3 }
 0x567   :  { %5599 = vmatprep.subr.bf16.mxu0 %v6947_v5 }
 0x56a   :  { %5600 = vmatpush1.bf16.msra.mxu0 %v6945_v7 }
 0x56b   :  { %5601 = vmatprep.subr.bf16.mxu0 %v6950_v22 }
 0x56e   :  { %5602 = vmatpush1.bf16.msra.mxu0 %v6948_v40 }
 0x571   :  { %5604 = vmatmul.mubr.bf16.vlgmr.msra.gmra.mrb[144].mxu0 %v5144_v43 }
 0x644   :  { %v5605_v10 = vpop.f32.mrb[144].mxu0 }
 0x645   :  { %v5624_v42 = vmul.f32 %v5617_v12, %v5605_v10  ;;  %v5607_v23 = vpop.f32.mrb[145].mxu0 }
 0x646   :  { %v5625_v1 = vmul.f32 %v5621_v18, %v5607_v23  ;;  %v5609_v15 = vpop.f32.mrb[146].mxu0 }
 0x647   :  { %v5638_v44 = vadd.f32 %v5631_v16, %v5624_v42  ;;  %v5610_v38 = vpop.f32.mrb[147].mxu0 }
 0x648   :  { %v5639_v48 = vadd.f32 %v5635_v60, %v5625_v1 }
 0x649   :  { %v5640_v26 = vmax.f32 %v5638_v44, 0.0 }
 0x64a   :  { %v5641_v21 = vmax.f32 %v5639_v48, 0.0 }
 0x64b   :  { %v5642_v6 = vpack.c.bf16 %v5640_v26, %v5640_v26 }
 0x64c   :  { %v5643_v35 = vpack.c.bf16 %v5641_v21, %v5641_v21 }
 0x64e   :  { %5811 = vmatprep.mubr.bf16.mxu1 %v5643_v35 }
 0x64f   :  { %5812 = vmatmul.mubr.bf16.vlgmr.msra.gmra.mrb[184].mxu1 %v5642_v6 }
 0x722   :  { %v6331_v39 = vpop.f32.mrb[184].mxu1 }
 0x723   :  { %v6332_v55 = vpop.f32.mrb[185].mxu1 }
 0x724   :  { %v6333_v2 = vadd.f32 %v6332_v55, %v6331_v39  ;;  %v6334_v8 = vpop.f32.mrb[186].mxu1 }
 0x725   :  { %v6335_v11 = vpop.f32.mrb[187].mxu1 }
 0x726   :  { %v5814_v13 = vadd.f32 %v6333_v2, %v6261_v63 }
 0x728   :  { %5820 = vst.msk [vmem:[#allocation8] sm:$0x3] %vm5819_vm4, %v5814_v13 }
 0x729   :  { %7046 = shalt.err (!%p7043_p0)
}
 0x72a   :  { %s7047_s17 = scalar_lea.hbm %s8635_s18, 32 }
 0x72b   :  { %p7048_p1 = scmp.ne.s32.totalorder %s8635_s18, %s7047_s17  ;;  %p7051_p2 = scmp.lt.u32.totalorder %s7047_s17, %s8635_s18 }
 0x72d   :  { %p7053_p3 = pnand %p7051_p2, %p7048_p1 }
 0x72f   :  { %7056 = shalt.err (!%p7053_p3)
}
 0x730   :  { %5830 = dma.vmem_to_hbm [thread:$0]  %s5828_s20, 32, %s8635_s18, [#allocation4]  }
 0x731   :  { %7061 = dma.done.wait [#allocation4], 32  }
 0x732   :  { %7062 = vsyncadd [#allocation4], 4294967264 }
 0x733   :  { %5834 = vsyncpa [#allocation3], 1 }
 0x734   :  { %5835 = vsyncpa [#allocation6], 1 }
 0x735   :  { %5836 = vsyncpa [#allocation4], 1 }

</bundles_post_ra>
